<compile_context>
chip_gen: v5e
topology: v5e:2x2
jax: 0.10.0
libtpu: 0.0.40
codegen_flags: <defaults>
</compile_context>

<pallas_src>
import jax
import jax.numpy as jnp
from jax.experimental import pallas as pl
from jax.experimental.pallas import tpu as pltpu

# ---- constants from the PyTorch module ---------------------------------------------------
KSIZE = 3                       # conv kernel size
POOL = 2                        # maxpool kernel size
LAYERS = 6                      # parallel branches
OUT_CH = 64                     # channels per branch
PAD = 1
STRIDE = 1
WIDTH = 100
CONV_OUT = (WIDTH + 2 * PAD - KSIZE) // STRIDE + 1      # 100
POOL_OUT = CONV_OUT // POOL                             # 50 pooled positions
FEAT = LAYERS * OUT_CH * POOL_OUT                       # 19200
HIDDEN = 30

# ---- kernel layout constants --------------------------------------------------------------
KIN = LAYERS * KSIZE            # 18   im2col contraction size (block-diag matmul K)
NCH = LAYERS * OUT_CH           # 384  all branches' channels side by side (3 lane tiles)
HALF_ROWS = 56                  # 50 pooled positions zero-padded to a sublane multiple
ROWS = 2 * HALF_ROWS            # 112  rows [0,56) = even conv positions, [56,112) = odd
CHUNK = 8                       # pooled positions handled per in-kernel step
NCHUNK = HALF_ROWS // CHUNK     # 7

HI = jax.lax.Precision.HIGHEST


def _fused_kernel(x_ref, wbd_ref, bias_ref, wf_ref, beff_ref, out_ref):
    """Fused conv + ReLU + maxpool + folded dense head + sigmoid for one batch tile.

    x_ref:    (TB, 112, 18)  im2col input (even-position rows then odd-position rows)
    wbd_ref:  (18, 384)      block-diagonal conv weight (row 3i+k, col 64i+c = Wc[i,c,k])
    bias_ref: (1, 384)       conv biases, branch-major
    wf_ref:   (56, 384)      folded dense weight reordered to (pooled pos, 64i+c); rows 50..55 = 0
    beff_ref: (1, 1)  SMEM   folded dense bias
    out_ref:  (TB, 1)        sigmoid output
    """
    tb = out_ref.shape[0]
    wbd = wbd_ref[...]                                   # (18, 384), MXU RHS
    bias = bias_ref[...].reshape(1, 1, NCH)              # (1, 1, 384)

    acc = jnp.zeros((tb, 1), jnp.float32)                # only carried state: 4 B / row
    for c in range(NCHUNK):                              # static unroll over position chunks
        r0 = c * CHUNK
        # im2col rows for this chunk: even conv positions 2q and odd positions 2q+1
        xe = x_ref[:, r0:r0 + CHUNK, :].reshape(tb * CHUNK, KIN)
        xo = x_ref[:, HALF_ROWS + r0:HALF_ROWS + r0 + CHUNK, :].reshape(tb * CHUNK, KIN)

        # Conv1d of all 6 branches as one block-diagonal matmul on the MXU.
        ce = jnp.dot(xe, wbd, preferred_element_type=jnp.float32).reshape(tb, CHUNK, NCH)
        co = jnp.dot(xo, wbd, preferred_element_type=jnp.float32).reshape(tb, CHUNK, NCH)

        # bias + ReLU, then MaxPool1d(2) == elementwise max of even/odd positions.
        pooled = jnp.maximum(jnp.maximum(ce + bias, 0.0),
                             jnp.maximum(co + bias, 0.0))          # (TB, 8, 384)

        # Folded dense-head contribution of this chunk, reduced immediately to (TB, 1).
        wfc = wf_ref[r0:r0 + CHUNK, :].reshape(1, CHUNK, NCH)
        contrib = jnp.sum(pooled * wfc, axis=2)                    # (TB, 8)  lane reduce
        acc = acc + jnp.sum(contrib, axis=1, keepdims=True)        # (TB, 1)

    z = acc + beff_ref[0, 0]
    out_ref[...] = 1.0 / (1.0 + jnp.exp(-z))                       # Sigmoid


def preprocess_params(params):
    """One-time parameter preprocessing (all weight reshuffles hoisted out of forward)."""
    Wc, bc, W1, b1, W2, b2 = (params[k] for k in ("Wc", "bc", "W1", "b1", "W2", "b2"))

    # Block-diagonal conv weight: wbd[3i+k, 64i+c] = Wc[i, c, k].
    wbd = jnp.zeros((KIN, NCH), jnp.float32)
    for i in range(LAYERS):
        wbd = wbd.at[i * KSIZE:(i + 1) * KSIZE, i * OUT_CH:(i + 1) * OUT_CH].set(Wc[i].T)
    bias = bc.reshape(1, NCH).astype(jnp.float32)

    # Fold Linear(19200,30) -> Linear(30,1): exact, no nonlinearity between them.
    w_eff = jnp.dot(W1.T, W2.T, precision=HI).reshape(LAYERS, OUT_CH, POOL_OUT)  # [i, c, q]
    wf = jnp.transpose(w_eff, (2, 0, 1)).reshape(POOL_OUT, NCH)                  # [q, 64i+c]
    wf = jnp.pad(wf, ((0, HALF_ROWS - POOL_OUT), (0, 0)))                        # zero pad rows
    b_eff = (jnp.dot(b1, W2.T, precision=HI) + b2).reshape(1, 1)

    return dict(wbd=wbd, bias=bias, wf=wf.astype(jnp.float32),
                b_eff=b_eff.astype(jnp.float32))


def _build_im2col(x):
    """(B, 6, 100) -> (B, 112, 18): rows [0,56) even conv positions, [56,112) odd positions.

    Column 3i+k of row q holds x_pad[b, i, 2q+k] (even half) / x_pad[b, i, 2q+1+k] (odd half).
    """
    B = x.shape[0]
    xp = jnp.pad(x.astype(jnp.float32), ((0, 0), (0, 0), (PAD, PAD)))       # (B, 6, 102)

    def half(off):
        taps = jnp.stack(
            [xp[:, :, off + k: off + k + CONV_OUT: POOL] for k in range(KSIZE)],
            axis=-1)                                                         # (B, 6, 50, 3)
        t = jnp.transpose(taps, (0, 2, 1, 3)).reshape(B, POOL_OUT, KIN)      # (B, 50, 18)
        return jnp.pad(t, ((0, 0), (0, HALF_ROWS - POOL_OUT), (0, 0)))       # (B, 56, 18)

    return jnp.concatenate([half(0), half(1)], axis=1)                       # (B, 112, 18)


@jax.jit
def parallel_conv_model(x, prep):
    """x: (B, 6, 100) float32 NCW, prep: preprocess_params output -> (B, 1) sigmoid."""
    B = x.shape[0]
    xcol = _build_im2col(x)                                                  # (B, 112, 18)

    # Batch tile: multiple of 8, capped at 128, and >=2 tiles whenever B > 8 so both
    # v7x TensorCores get work.  (On v5e the cap could be raised further.)
    tb = min(128, max(8, (-(-B // 2) + 7) // 8 * 8))
    nb = -(-B // tb)
    bp = nb * tb
    if bp != B:
        xcol = jnp.pad(xcol, ((0, bp - B), (0, 0), (0, 0)))

    out = pl.pallas_call(
        _fused_kernel,
        out_shape=jax.ShapeDtypeStruct((bp, 1), jnp.float32),
        grid=(nb,),
        in_specs=[
            pl.BlockSpec((tb, ROWS, KIN), lambda b: (b, 0, 0)),              # im2col input
            pl.BlockSpec((KIN, NCH), lambda b: (0, 0)),                      # conv weight (resident)
            pl.BlockSpec((1, NCH), lambda b: (0, 0)),                        # conv bias  (resident)
            pl.BlockSpec((HALF_ROWS, NCH), lambda b: (0, 0)),                # folded head (resident)
            pl.BlockSpec(memory_space=pltpu.MemorySpace.SMEM),               # folded bias scalar
        ],
        out_specs=pl.BlockSpec((tb, 1), lambda b: (b, 0)),
        compiler_params=pltpu.CompilerParams(
            dimension_semantics=("parallel",),
            vmem_limit_bytes=40 * 1024 * 1024,
        ),
    )(xcol, prep["wbd"], prep["bias"], prep["wf"], prep["b_eff"])
    return out[:B]


def init_params(key):
    ks = jax.random.split(key, 6)
    return dict(
        Wc=jax.random.normal(ks[0], (LAYERS, OUT_CH, KSIZE), jnp.float32) * 0.3,
        bc=jax.random.normal(ks[1], (LAYERS, OUT_CH), jnp.float32) * 0.1,
        W1=jax.random.normal(ks[2], (HIDDEN, FEAT), jnp.float32) * 0.01,
        b1=jax.random.normal(ks[3], (HIDDEN,), jnp.float32) * 0.1,
        W2=jax.random.normal(ks[4], (1, HIDDEN), jnp.float32) * 0.1,
        b2=jax.random.normal(ks[5], (1,), jnp.float32) * 0.1,
    )


def reference_forward(x, p):
    """Pure-JAX re-statement of the PyTorch forward (NCW, PyTorch flatten order)."""
    B = x.shape[0]
    outs = []
    for i in range(LAYERS):
        xi = jnp.pad(x[:, i, :], ((0, 0), (PAD, PAD)))                       # (B, 102)
        y = jnp.zeros((B, OUT_CH, CONV_OUT), jnp.float32)
        for k in range(KSIZE):
            y = y + xi[:, None, k:k + CONV_OUT] * p["Wc"][i, :, k][None, :, None]
        y = y + p["bc"][i][None, :, None]
        y = jnp.maximum(y, 0.0)
        y = y.reshape(B, OUT_CH, POOL_OUT, POOL).max(axis=-1)                # MaxPool1d(2)
        outs.append(y.reshape(B, OUT_CH * POOL_OUT))                         # Flatten
    feat = jnp.concatenate(outs, axis=1)                                     # (B, 19200)
    h = jnp.dot(feat, p["W1"].T, precision=HI) + p["b1"]
    o = jnp.dot(h, p["W2"].T, precision=HI) + p["b2"]
    return 1.0 / (1.0 + jnp.exp(-o))


if __name__ == "__main__":
    key = jax.random.PRNGKey(0)
    pkey, xkey1, xkey2 = jax.random.split(key, 3)
    params = init_params(pkey)
    prep = preprocess_params(params)          # one-time weight preprocessing (hoisted)

    # B=2 (single tile) and B=50 (two tiles + batch padding) to exercise both grid paths.
    for B, xk in ((2, xkey1), (50, xkey2)):
        x = jax.random.normal(xk, (B, LAYERS, WIDTH), jnp.float32)           # (B, 6, 100) NCW
        out = jax.block_until_ready(parallel_conv_model(x, prep))
        ref = reference_forward(x, params)
        assert out.shape == (B, 1), out.shape
        if not jnp.allclose(out, ref, atol=1e-3, rtol=1e-3):
            raise AssertionError(
                f"B={B}: mismatch, max|diff|={float(jnp.max(jnp.abs(out - ref)))}")
    print("KERNEL_OK")
</pallas_src>

<mosaic_0001>
module attributes {stable_mosaic.version = 11 : i64} {
  func.func @_fused_kernel(%arg0: i32, %arg1: memref<8x112x18xf32, #tpu.memory_space<vmem>>, %arg2: memref<18x384xf32, #tpu.memory_space<vmem>>, %arg3: memref<1x384xf32, #tpu.memory_space<vmem>>, %arg4: memref<56x384xf32, #tpu.memory_space<vmem>>, %arg5: memref<1x1xf32, #tpu.memory_space<smem>>, %arg6: memref<8x1xf32, #tpu.memory_space<vmem>>) attributes {dimension_semantics = [#tpu.dimension_semantics<parallel>], iteration_bounds = array<i64: 1>, scalar_prefetch = 0 : i64, scratch_operands = 0 : i64, tpu.core_type = #tpu.core_type<tc>, window_params = [{transform_indices = @transform_0, window_bounds = array<i64: 8, 112, 18>}, {pipeline_mode = #tpu.pipeline_mode<synchronous>, transform_indices = @transform_1, window_bounds = array<i64: 18, 384>}, {pipeline_mode = #tpu.pipeline_mode<synchronous>, transform_indices = @transform_2, window_bounds = array<i64: 1, 384>}, {pipeline_mode = #tpu.pipeline_mode<synchronous>, transform_indices = @transform_3, window_bounds = array<i64: 56, 384>}, {transform_indices = @transform_4, window_bounds = array<i64: 1, 1>}, {transform_indices = @transform_5, window_bounds = array<i64: 8, 1>}]} {
    %c0 = arith.constant 0 : index
    %c0_0 = arith.constant 0 : index
    %0 = vector.load %arg2[%c0, %c0_0] : memref<18x384xf32, #tpu.memory_space<vmem>>, vector<18x384xf32>
    %c0_1 = arith.constant 0 : index
    %c0_2 = arith.constant 0 : index
    %1 = vector.load %arg3[%c0_1, %c0_2] : memref<1x384xf32, #tpu.memory_space<vmem>>, vector<1x384xf32>
    %2 = vector.shape_cast %1 : vector<1x384xf32> to vector<1x1x384xf32>
    %cst = arith.constant 0.000000e+00 : f32
    %3 = vector.broadcast %cst : f32 to vector<8x1xf32>
    %c0_3 = arith.constant 0 : index
    %c0_4 = arith.constant 0 : index
    %c0_5 = arith.constant 0 : index
    %4 = vector.load %arg1[%c0_3, %c0_4, %c0_5] : memref<8x112x18xf32, #tpu.memory_space<vmem>>, vector<8x8x18xf32>
    %5 = vector.shape_cast %4 : vector<8x8x18xf32> to vector<64x18xf32>
    %c0_6 = arith.constant 0 : index
    %c56 = arith.constant 56 : index
    %c0_7 = arith.constant 0 : index
    %6 = vector.load %arg1[%c0_6, %c56, %c0_7] : memref<8x112x18xf32, #tpu.memory_space<vmem>>, vector<8x8x18xf32>
    %7 = vector.shape_cast %6 : vector<8x8x18xf32> to vector<64x18xf32>
    %cst_8 = arith.constant dense<0.000000e+00> : vector<64x384xf32>
    %8 = tpu.matmul %5, %0, %cst_8 {dimension_numbers = #tpu.dot_dimension_numbers<[1], [0], [0], [1], [0, 0, 1, 1], [], []>} : vector<64x18xf32>, vector<18x384xf32>, vector<64x384xf32> -> vector<64x384xf32>
    %9 = vector.shape_cast %8 : vector<64x384xf32> to vector<8x8x384xf32>
    %cst_9 = arith.constant dense<0.000000e+00> : vector<64x384xf32>
    %10 = tpu.matmul %7, %0, %cst_9 {dimension_numbers = #tpu.dot_dimension_numbers<[1], [0], [0], [1], [0, 0, 1, 1], [], []>} : vector<64x18xf32>, vector<18x384xf32>, vector<64x384xf32> -> vector<64x384xf32>
    %11 = vector.shape_cast %10 : vector<64x384xf32> to vector<8x8x384xf32>
    %12 = vector.broadcast %2 : vector<1x1x384xf32> to vector<8x8x384xf32>
    %13 = arith.addf %9, %12 : vector<8x8x384xf32>
    %cst_10 = arith.constant 0.000000e+00 : f32
    %14 = vector.broadcast %cst_10 : f32 to vector<8x8x384xf32>
    %15 = arith.maximumf %13, %14 : vector<8x8x384xf32>
    %16 = vector.broadcast %2 : vector<1x1x384xf32> to vector<8x8x384xf32>
    %17 = arith.addf %11, %16 : vector<8x8x384xf32>
    %cst_11 = arith.constant 0.000000e+00 : f32
    %18 = vector.broadcast %cst_11 : f32 to vector<8x8x384xf32>
    %19 = arith.maximumf %17, %18 : vector<8x8x384xf32>
    %20 = arith.maximumf %15, %19 : vector<8x8x384xf32>
    %c0_12 = arith.constant 0 : index
    %c0_13 = arith.constant 0 : index
    %21 = vector.load %arg4[%c0_12, %c0_13] : memref<56x384xf32, #tpu.memory_space<vmem>>, vector<8x384xf32>
    %22 = vector.shape_cast %21 : vector<8x384xf32> to vector<1x8x384xf32>
    %23 = vector.broadcast %22 : vector<1x8x384xf32> to vector<8x8x384xf32>
    %24 = arith.mulf %20, %23 : vector<8x8x384xf32>
    %cst_14 = arith.constant dense<0.000000e+00> : vector<8x8xf32>
    %25 = vector.multi_reduction <add>, %24, %cst_14 [2] : vector<8x8x384xf32> to vector<8x8xf32>
    %cst_15 = arith.constant dense<0.000000e+00> : vector<8xf32>
    %26 = vector.multi_reduction <add>, %25, %cst_15 [1] : vector<8x8xf32> to vector<8xf32>
    %27 = vector.shape_cast %26 : vector<8xf32> to vector<8x1xf32>
    %28 = arith.addf %3, %27 : vector<8x1xf32>
    %c0_16 = arith.constant 0 : index
    %c8 = arith.constant 8 : index
    %c0_17 = arith.constant 0 : index
    %29 = vector.load %arg1[%c0_16, %c8, %c0_17] : memref<8x112x18xf32, #tpu.memory_space<vmem>>, vector<8x8x18xf32>
    %30 = vector.shape_cast %29 : vector<8x8x18xf32> to vector<64x18xf32>
    %c0_18 = arith.constant 0 : index
    %c64 = arith.constant 64 : index
    %c0_19 = arith.constant 0 : index
    %31 = vector.load %arg1[%c0_18, %c64, %c0_19] : memref<8x112x18xf32, #tpu.memory_space<vmem>>, vector<8x8x18xf32>
    %32 = vector.shape_cast %31 : vector<8x8x18xf32> to vector<64x18xf32>
    %cst_20 = arith.constant dense<0.000000e+00> : vector<64x384xf32>
    %33 = tpu.matmul %30, %0, %cst_20 {dimension_numbers = #tpu.dot_dimension_numbers<[1], [0], [0], [1], [0, 0, 1, 1], [], []>} : vector<64x18xf32>, vector<18x384xf32>, vector<64x384xf32> -> vector<64x384xf32>
    %34 = vector.shape_cast %33 : vector<64x384xf32> to vector<8x8x384xf32>
    %cst_21 = arith.constant dense<0.000000e+00> : vector<64x384xf32>
    %35 = tpu.matmul %32, %0, %cst_21 {dimension_numbers = #tpu.dot_dimension_numbers<[1], [0], [0], [1], [0, 0, 1, 1], [], []>} : vector<64x18xf32>, vector<18x384xf32>, vector<64x384xf32> -> vector<64x384xf32>
    %36 = vector.shape_cast %35 : vector<64x384xf32> to vector<8x8x384xf32>
    %37 = vector.broadcast %2 : vector<1x1x384xf32> to vector<8x8x384xf32>
    %38 = arith.addf %34, %37 : vector<8x8x384xf32>
    %cst_22 = arith.constant 0.000000e+00 : f32
    %39 = vector.broadcast %cst_22 : f32 to vector<8x8x384xf32>
    %40 = arith.maximumf %38, %39 : vector<8x8x384xf32>
    %41 = vector.broadcast %2 : vector<1x1x384xf32> to vector<8x8x384xf32>
    %42 = arith.addf %36, %41 : vector<8x8x384xf32>
    %cst_23 = arith.constant 0.000000e+00 : f32
    %43 = vector.broadcast %cst_23 : f32 to vector<8x8x384xf32>
    %44 = arith.maximumf %42, %43 : vector<8x8x384xf32>
    %45 = arith.maximumf %40, %44 : vector<8x8x384xf32>
    %c8_24 = arith.constant 8 : index
    %c0_25 = arith.constant 0 : index
    %46 = vector.load %arg4[%c8_24, %c0_25] : memref<56x384xf32, #tpu.memory_space<vmem>>, vector<8x384xf32>
    %47 = vector.shape_cast %46 : vector<8x384xf32> to vector<1x8x384xf32>
    %48 = vector.broadcast %47 : vector<1x8x384xf32> to vector<8x8x384xf32>
    %49 = arith.mulf %45, %48 : vector<8x8x384xf32>
    %cst_26 = arith.constant dense<0.000000e+00> : vector<8x8xf32>
    %50 = vector.multi_reduction <add>, %49, %cst_26 [2] : vector<8x8x384xf32> to vector<8x8xf32>
    %cst_27 = arith.constant dense<0.000000e+00> : vector<8xf32>
    %51 = vector.multi_reduction <add>, %50, %cst_27 [1] : vector<8x8xf32> to vector<8xf32>
    %52 = vector.shape_cast %51 : vector<8xf32> to vector<8x1xf32>
    %53 = arith.addf %28, %52 : vector<8x1xf32>
    %c0_28 = arith.constant 0 : index
    %c16 = arith.constant 16 : index
    %c0_29 = arith.constant 0 : index
    %54 = vector.load %arg1[%c0_28, %c16, %c0_29] : memref<8x112x18xf32, #tpu.memory_space<vmem>>, vector<8x8x18xf32>
    %55 = vector.shape_cast %54 : vector<8x8x18xf32> to vector<64x18xf32>
    %c0_30 = arith.constant 0 : index
    %c72 = arith.constant 72 : index
    %c0_31 = arith.constant 0 : index
    %56 = vector.load %arg1[%c0_30, %c72, %c0_31] : memref<8x112x18xf32, #tpu.memory_space<vmem>>, vector<8x8x18xf32>
    %57 = vector.shape_cast %56 : vector<8x8x18xf32> to vector<64x18xf32>
    %cst_32 = arith.constant dense<0.000000e+00> : vector<64x384xf32>
    %58 = tpu.matmul %55, %0, %cst_32 {dimension_numbers = #tpu.dot_dimension_numbers<[1], [0], [0], [1], [0, 0, 1, 1], [], []>} : vector<64x18xf32>, vector<18x384xf32>, vector<64x384xf32> -> vector<64x384xf32>
    %59 = vector.shape_cast %58 : vector<64x384xf32> to vector<8x8x384xf32>
    %cst_33 = arith.constant dense<0.000000e+00> : vector<64x384xf32>
    %60 = tpu.matmul %57, %0, %cst_33 {dimension_numbers = #tpu.dot_dimension_numbers<[1], [0], [0], [1], [0, 0, 1, 1], [], []>} : vector<64x18xf32>, vector<18x384xf32>, vector<64x384xf32> -> vector<64x384xf32>
    %61 = vector.shape_cast %60 : vector<64x384xf32> to vector<8x8x384xf32>
    %62 = vector.broadcast %2 : vector<1x1x384xf32> to vector<8x8x384xf32>
    %63 = arith.addf %59, %62 : vector<8x8x384xf32>
    %cst_34 = arith.constant 0.000000e+00 : f32
    %64 = vector.broadcast %cst_34 : f32 to vector<8x8x384xf32>
    %65 = arith.maximumf %63, %64 : vector<8x8x384xf32>
    %66 = vector.broadcast %2 : vector<1x1x384xf32> to vector<8x8x384xf32>
    %67 = arith.addf %61, %66 : vector<8x8x384xf32>
    %cst_35 = arith.constant 0.000000e+00 : f32
    %68 = vector.broadcast %cst_35 : f32 to vector<8x8x384xf32>
    %69 = arith.maximumf %67, %68 : vector<8x8x384xf32>
    %70 = arith.maximumf %65, %69 : vector<8x8x384xf32>
    %c16_36 = arith.constant 16 : index
    %c0_37 = arith.constant 0 : index
    %71 = vector.load %arg4[%c16_36, %c0_37] : memref<56x384xf32, #tpu.memory_space<vmem>>, vector<8x384xf32>
    %72 = vector.shape_cast %71 : vector<8x384xf32> to vector<1x8x384xf32>
    %73 = vector.broadcast %72 : vector<1x8x384xf32> to vector<8x8x384xf32>
    %74 = arith.mulf %70, %73 : vector<8x8x384xf32>
    %cst_38 = arith.constant dense<0.000000e+00> : vector<8x8xf32>
    %75 = vector.multi_reduction <add>, %74, %cst_38 [2] : vector<8x8x384xf32> to vector<8x8xf32>
    %cst_39 = arith.constant dense<0.000000e+00> : vector<8xf32>
    %76 = vector.multi_reduction <add>, %75, %cst_39 [1] : vector<8x8xf32> to vector<8xf32>
    %77 = vector.shape_cast %76 : vector<8xf32> to vector<8x1xf32>
    %78 = arith.addf %53, %77 : vector<8x1xf32>
    %c0_40 = arith.constant 0 : index
    %c24 = arith.constant 24 : index
    %c0_41 = arith.constant 0 : index
    %79 = vector.load %arg1[%c0_40, %c24, %c0_41] : memref<8x112x18xf32, #tpu.memory_space<vmem>>, vector<8x8x18xf32>
    %80 = vector.shape_cast %79 : vector<8x8x18xf32> to vector<64x18xf32>
    %c0_42 = arith.constant 0 : index
    %c80 = arith.constant 80 : index
    %c0_43 = arith.constant 0 : index
    %81 = vector.load %arg1[%c0_42, %c80, %c0_43] : memref<8x112x18xf32, #tpu.memory_space<vmem>>, vector<8x8x18xf32>
    %82 = vector.shape_cast %81 : vector<8x8x18xf32> to vector<64x18xf32>
    %cst_44 = arith.constant dense<0.000000e+00> : vector<64x384xf32>
    %83 = tpu.matmul %80, %0, %cst_44 {dimension_numbers = #tpu.dot_dimension_numbers<[1], [0], [0], [1], [0, 0, 1, 1], [], []>} : vector<64x18xf32>, vector<18x384xf32>, vector<64x384xf32> -> vector<64x384xf32>
    %84 = vector.shape_cast %83 : vector<64x384xf32> to vector<8x8x384xf32>
    %cst_45 = arith.constant dense<0.000000e+00> : vector<64x384xf32>
    %85 = tpu.matmul %82, %0, %cst_45 {dimension_numbers = #tpu.dot_dimension_numbers<[1], [0], [0], [1], [0, 0, 1, 1], [], []>} : vector<64x18xf32>, vector<18x384xf32>, vector<64x384xf32> -> vector<64x384xf32>
    %86 = vector.shape_cast %85 : vector<64x384xf32> to vector<8x8x384xf32>
    %87 = vector.broadcast %2 : vector<1x1x384xf32> to vector<8x8x384xf32>
    %88 = arith.addf %84, %87 : vector<8x8x384xf32>
    %cst_46 = arith.constant 0.000000e+00 : f32
    %89 = vector.broadcast %cst_46 : f32 to vector<8x8x384xf32>
    %90 = arith.maximumf %88, %89 : vector<8x8x384xf32>
    %91 = vector.broadcast %2 : vector<1x1x384xf32> to vector<8x8x384xf32>
    %92 = arith.addf %86, %91 : vector<8x8x384xf32>
    %cst_47 = arith.constant 0.000000e+00 : f32
    %93 = vector.broadcast %cst_47 : f32 to vector<8x8x384xf32>
    %94 = arith.maximumf %92, %93 : vector<8x8x384xf32>
    %95 = arith.maximumf %90, %94 : vector<8x8x384xf32>
    %c24_48 = arith.constant 24 : index
    %c0_49 = arith.constant 0 : index
    %96 = vector.load %arg4[%c24_48, %c0_49] : memref<56x384xf32, #tpu.memory_space<vmem>>, vector<8x384xf32>
    %97 = vector.shape_cast %96 : vector<8x384xf32> to vector<1x8x384xf32>
    %98 = vector.broadcast %97 : vector<1x8x384xf32> to vector<8x8x384xf32>
    %99 = arith.mulf %95, %98 : vector<8x8x384xf32>
    %cst_50 = arith.constant dense<0.000000e+00> : vector<8x8xf32>
    %100 = vector.multi_reduction <add>, %99, %cst_50 [2] : vector<8x8x384xf32> to vector<8x8xf32>
    %cst_51 = arith.constant dense<0.000000e+00> : vector<8xf32>
    %101 = vector.multi_reduction <add>, %100, %cst_51 [1] : vector<8x8xf32> to vector<8xf32>
    %102 = vector.shape_cast %101 : vector<8xf32> to vector<8x1xf32>
    %103 = arith.addf %78, %102 : vector<8x1xf32>
    %c0_52 = arith.constant 0 : index
    %c32 = arith.constant 32 : index
    %c0_53 = arith.constant 0 : index
    %104 = vector.load %arg1[%c0_52, %c32, %c0_53] : memref<8x112x18xf32, #tpu.memory_space<vmem>>, vector<8x8x18xf32>
    %105 = vector.shape_cast %104 : vector<8x8x18xf32> to vector<64x18xf32>
    %c0_54 = arith.constant 0 : index
    %c88 = arith.constant 88 : index
    %c0_55 = arith.constant 0 : index
    %106 = vector.load %arg1[%c0_54, %c88, %c0_55] : memref<8x112x18xf32, #tpu.memory_space<vmem>>, vector<8x8x18xf32>
    %107 = vector.shape_cast %106 : vector<8x8x18xf32> to vector<64x18xf32>
    %cst_56 = arith.constant dense<0.000000e+00> : vector<64x384xf32>
    %108 = tpu.matmul %105, %0, %cst_56 {dimension_numbers = #tpu.dot_dimension_numbers<[1], [0], [0], [1], [0, 0, 1, 1], [], []>} : vector<64x18xf32>, vector<18x384xf32>, vector<64x384xf32> -> vector<64x384xf32>
    %109 = vector.shape_cast %108 : vector<64x384xf32> to vector<8x8x384xf32>
    %cst_57 = arith.constant dense<0.000000e+00> : vector<64x384xf32>
    %110 = tpu.matmul %107, %0, %cst_57 {dimension_numbers = #tpu.dot_dimension_numbers<[1], [0], [0], [1], [0, 0, 1, 1], [], []>} : vector<64x18xf32>, vector<18x384xf32>, vector<64x384xf32> -> vector<64x384xf32>
    %111 = vector.shape_cast %110 : vector<64x384xf32> to vector<8x8x384xf32>
    %112 = vector.broadcast %2 : vector<1x1x384xf32> to vector<8x8x384xf32>
    %113 = arith.addf %109, %112 : vector<8x8x384xf32>
    %cst_58 = arith.constant 0.000000e+00 : f32
    %114 = vector.broadcast %cst_58 : f32 to vector<8x8x384xf32>
    %115 = arith.maximumf %113, %114 : vector<8x8x384xf32>
    %116 = vector.broadcast %2 : vector<1x1x384xf32> to vector<8x8x384xf32>
    %117 = arith.addf %111, %116 : vector<8x8x384xf32>
    %cst_59 = arith.constant 0.000000e+00 : f32
    %118 = vector.broadcast %cst_59 : f32 to vector<8x8x384xf32>
    %119 = arith.maximumf %117, %118 : vector<8x8x384xf32>
    %120 = arith.maximumf %115, %119 : vector<8x8x384xf32>
    %c32_60 = arith.constant 32 : index
    %c0_61 = arith.constant 0 : index
    %121 = vector.load %arg4[%c32_60, %c0_61] : memref<56x384xf32, #tpu.memory_space<vmem>>, vector<8x384xf32>
    %122 = vector.shape_cast %121 : vector<8x384xf32> to vector<1x8x384xf32>
    %123 = vector.broadcast %122 : vector<1x8x384xf32> to vector<8x8x384xf32>
    %124 = arith.mulf %120, %123 : vector<8x8x384xf32>
    %cst_62 = arith.constant dense<0.000000e+00> : vector<8x8xf32>
    %125 = vector.multi_reduction <add>, %124, %cst_62 [2] : vector<8x8x384xf32> to vector<8x8xf32>
    %cst_63 = arith.constant dense<0.000000e+00> : vector<8xf32>
    %126 = vector.multi_reduction <add>, %125, %cst_63 [1] : vector<8x8xf32> to vector<8xf32>
    %127 = vector.shape_cast %126 : vector<8xf32> to vector<8x1xf32>
    %128 = arith.addf %103, %127 : vector<8x1xf32>
    %c0_64 = arith.constant 0 : index
    %c40 = arith.constant 40 : index
    %c0_65 = arith.constant 0 : index
    %129 = vector.load %arg1[%c0_64, %c40, %c0_65] : memref<8x112x18xf32, #tpu.memory_space<vmem>>, vector<8x8x18xf32>
    %130 = vector.shape_cast %129 : vector<8x8x18xf32> to vector<64x18xf32>
    %c0_66 = arith.constant 0 : index
    %c96 = arith.constant 96 : index
    %c0_67 = arith.constant 0 : index
    %131 = vector.load %arg1[%c0_66, %c96, %c0_67] : memref<8x112x18xf32, #tpu.memory_space<vmem>>, vector<8x8x18xf32>
    %132 = vector.shape_cast %131 : vector<8x8x18xf32> to vector<64x18xf32>
    %cst_68 = arith.constant dense<0.000000e+00> : vector<64x384xf32>
    %133 = tpu.matmul %130, %0, %cst_68 {dimension_numbers = #tpu.dot_dimension_numbers<[1], [0], [0], [1], [0, 0, 1, 1], [], []>} : vector<64x18xf32>, vector<18x384xf32>, vector<64x384xf32> -> vector<64x384xf32>
    %134 = vector.shape_cast %133 : vector<64x384xf32> to vector<8x8x384xf32>
    %cst_69 = arith.constant dense<0.000000e+00> : vector<64x384xf32>
    %135 = tpu.matmul %132, %0, %cst_69 {dimension_numbers = #tpu.dot_dimension_numbers<[1], [0], [0], [1], [0, 0, 1, 1], [], []>} : vector<64x18xf32>, vector<18x384xf32>, vector<64x384xf32> -> vector<64x384xf32>
    %136 = vector.shape_cast %135 : vector<64x384xf32> to vector<8x8x384xf32>
    %137 = vector.broadcast %2 : vector<1x1x384xf32> to vector<8x8x384xf32>
    %138 = arith.addf %134, %137 : vector<8x8x384xf32>
    %cst_70 = arith.constant 0.000000e+00 : f32
    %139 = vector.broadcast %cst_70 : f32 to vector<8x8x384xf32>
    %140 = arith.maximumf %138, %139 : vector<8x8x384xf32>
    %141 = vector.broadcast %2 : vector<1x1x384xf32> to vector<8x8x384xf32>
    %142 = arith.addf %136, %141 : vector<8x8x384xf32>
    %cst_71 = arith.constant 0.000000e+00 : f32
    %143 = vector.broadcast %cst_71 : f32 to vector<8x8x384xf32>
    %144 = arith.maximumf %142, %143 : vector<8x8x384xf32>
    %145 = arith.maximumf %140, %144 : vector<8x8x384xf32>
    %c40_72 = arith.constant 40 : index
    %c0_73 = arith.constant 0 : index
    %146 = vector.load %arg4[%c40_72, %c0_73] : memref<56x384xf32, #tpu.memory_space<vmem>>, vector<8x384xf32>
    %147 = vector.shape_cast %146 : vector<8x384xf32> to vector<1x8x384xf32>
    %148 = vector.broadcast %147 : vector<1x8x384xf32> to vector<8x8x384xf32>
    %149 = arith.mulf %145, %148 : vector<8x8x384xf32>
    %cst_74 = arith.constant dense<0.000000e+00> : vector<8x8xf32>
    %150 = vector.multi_reduction <add>, %149, %cst_74 [2] : vector<8x8x384xf32> to vector<8x8xf32>
    %cst_75 = arith.constant dense<0.000000e+00> : vector<8xf32>
    %151 = vector.multi_reduction <add>, %150, %cst_75 [1] : vector<8x8xf32> to vector<8xf32>
    %152 = vector.shape_cast %151 : vector<8xf32> to vector<8x1xf32>
    %153 = arith.addf %128, %152 : vector<8x1xf32>
    %c0_76 = arith.constant 0 : index
    %c48 = arith.constant 48 : index
    %c0_77 = arith.constant 0 : index
    %154 = vector.load %arg1[%c0_76, %c48, %c0_77] : memref<8x112x18xf32, #tpu.memory_space<vmem>>, vector<8x8x18xf32>
    %155 = vector.shape_cast %154 : vector<8x8x18xf32> to vector<64x18xf32>
    %c0_78 = arith.constant 0 : index
    %c104 = arith.constant 104 : index
    %c0_79 = arith.constant 0 : index
    %156 = vector.load %arg1[%c0_78, %c104, %c0_79] : memref<8x112x18xf32, #tpu.memory_space<vmem>>, vector<8x8x18xf32>
    %157 = vector.shape_cast %156 : vector<8x8x18xf32> to vector<64x18xf32>
    %cst_80 = arith.constant dense<0.000000e+00> : vector<64x384xf32>
    %158 = tpu.matmul %155, %0, %cst_80 {dimension_numbers = #tpu.dot_dimension_numbers<[1], [0], [0], [1], [0, 0, 1, 1], [], []>} : vector<64x18xf32>, vector<18x384xf32>, vector<64x384xf32> -> vector<64x384xf32>
    %159 = vector.shape_cast %158 : vector<64x384xf32> to vector<8x8x384xf32>
    %cst_81 = arith.constant dense<0.000000e+00> : vector<64x384xf32>
    %160 = tpu.matmul %157, %0, %cst_81 {dimension_numbers = #tpu.dot_dimension_numbers<[1], [0], [0], [1], [0, 0, 1, 1], [], []>} : vector<64x18xf32>, vector<18x384xf32>, vector<64x384xf32> -> vector<64x384xf32>
    %161 = vector.shape_cast %160 : vector<64x384xf32> to vector<8x8x384xf32>
    %162 = vector.broadcast %2 : vector<1x1x384xf32> to vector<8x8x384xf32>
    %163 = arith.addf %159, %162 : vector<8x8x384xf32>
    %cst_82 = arith.constant 0.000000e+00 : f32
    %164 = vector.broadcast %cst_82 : f32 to vector<8x8x384xf32>
    %165 = arith.maximumf %163, %164 : vector<8x8x384xf32>
    %166 = vector.broadcast %2 : vector<1x1x384xf32> to vector<8x8x384xf32>
    %167 = arith.addf %161, %166 : vector<8x8x384xf32>
    %cst_83 = arith.constant 0.000000e+00 : f32
    %168 = vector.broadcast %cst_83 : f32 to vector<8x8x384xf32>
    %169 = arith.maximumf %167, %168 : vector<8x8x384xf32>
    %170 = arith.maximumf %165, %169 : vector<8x8x384xf32>
    %c48_84 = arith.constant 48 : index
    %c0_85 = arith.constant 0 : index
    %171 = vector.load %arg4[%c48_84, %c0_85] : memref<56x384xf32, #tpu.memory_space<vmem>>, vector<8x384xf32>
    %172 = vector.shape_cast %171 : vector<8x384xf32> to vector<1x8x384xf32>
    %173 = vector.broadcast %172 : vector<1x8x384xf32> to vector<8x8x384xf32>
    %174 = arith.mulf %170, %173 : vector<8x8x384xf32>
    %cst_86 = arith.constant dense<0.000000e+00> : vector<8x8xf32>
    %175 = vector.multi_reduction <add>, %174, %cst_86 [2] : vector<8x8x384xf32> to vector<8x8xf32>
    %cst_87 = arith.constant dense<0.000000e+00> : vector<8xf32>
    %176 = vector.multi_reduction <add>, %175, %cst_87 [1] : vector<8x8xf32> to vector<8xf32>
    %177 = vector.shape_cast %176 : vector<8xf32> to vector<8x1xf32>
    %178 = arith.addf %153, %177 : vector<8x1xf32>
    %c0_88 = arith.constant 0 : index
    %c0_89 = arith.constant 0 : index
    %179 = memref.load %arg5[%c0_88, %c0_89] : memref<1x1xf32, #tpu.memory_space<smem>>
    %180 = vector.broadcast %179 : f32 to vector<8x1xf32>
    %181 = arith.addf %178, %180 : vector<8x1xf32>
    %cst_90 = arith.constant 0.000000e+00 : f32
    %182 = vector.broadcast %cst_90 : f32 to vector<8x1xf32>
    %183 = arith.subf %182, %181 : vector<8x1xf32>
    %184 = math.exp %183 : vector<8x1xf32>
    %cst_91 = arith.constant 1.000000e+00 : f32
    %185 = vector.broadcast %cst_91 : f32 to vector<8x1xf32>
    %186 = arith.addf %185, %184 : vector<8x1xf32>
    %cst_92 = arith.constant 1.000000e+00 : f32
    %187 = vector.broadcast %cst_92 : f32 to vector<8x1xf32>
    %188 = arith.divf %187, %186 : vector<8x1xf32>
    %c0_93 = arith.constant 0 : index
    %c0_94 = arith.constant 0 : index
    %189 = vector.load %arg6[%c0_93, %c0_94] : memref<8x1xf32, #tpu.memory_space<vmem>>, vector<8x1xf32>
    tpu.vector_store %arg6[%c0_93, %c0_94], %188 {strides = array<i32>} : memref<8x1xf32, #tpu.memory_space<vmem>>, vector<8x1xf32>,
    return
  }
  func.func @transform_0(%arg0: i32) -> (i32, i32, i32) {
    %c0_i32 = arith.constant 0 : i32
    %c0_i32_0 = arith.constant 0 : i32
    %c0_i32_1 = arith.constant 0 : i32
    return %arg0, %c0_i32, %c0_i32_0 : i32, i32, i32
  }
  func.func @transform_1(%arg0: i32) -> (i32, i32) {
    %c0_i32 = arith.constant 0 : i32
    %c0_i32_0 = arith.constant 0 : i32
    %c0_i32_1 = arith.constant 0 : i32
    return %c0_i32, %c0_i32_0 : i32, i32
  }
  func.func @transform_2(%arg0: i32) -> (i32, i32) {
    %c0_i32 = arith.constant 0 : i32
    %c0_i32_0 = arith.constant 0 : i32
    %c0_i32_1 = arith.constant 0 : i32
    return %c0_i32, %c0_i32_0 : i32, i32
  }
  func.func @transform_3(%arg0: i32) -> (i32, i32) {
    %c0_i32 = arith.constant 0 : i32
    %c0_i32_0 = arith.constant 0 : i32
    %c0_i32_1 = arith.constant 0 : i32
    return %c0_i32, %c0_i32_0 : i32, i32
  }
  func.func @transform_4(%arg0: i32) -> (i32, i32) {
    %c0_i32 = arith.constant 0 : i32
    %c0_i32_0 = arith.constant 0 : i32
    %c0_i32_1 = arith.constant 0 : i32
    return %c0_i32, %c0_i32_0 : i32, i32
  }
  func.func @transform_5(%arg0: i32) -> (i32, i32) {
    %c0_i32 = arith.constant 0 : i32
    %c0_i32_0 = arith.constant 0 : i32
    return %arg0, %c0_i32 : i32, i32
  }
}

</mosaic_0001>

<bundles_post_ra>
// kernel: parallel_conv_model.1
= control target key start
LH: loop header
LB: loop body
LE: loop exit
PB: predicated region body
PF: predicated region fallthrough
CT: control target
= control target key end

     0   :  { %vm72_vm0 = vcmask 1041408   ;;  %vm47_vm1 = vcmask 146432   ;;  %vm556_vm2 = vcmask 1041409   ;;  %vm558_vm3 = vcmask 1042434   ;;  %s6670_s1 = inlined_call_operand.vmem [shape: f32[18,384], index: 1, kind: input, shape index: {}]   ;;  %s6671_s0 = inlined_call_operand.vmem [shape: f32[8,112,18], index: 0, kind: input, shape index: {}]   ;;  %s6672_s2 = inlined_call_operand.vmem [shape: f32[1,384], index: 2, kind: input, shape index: {}]   ;;  %s6673_s3 = inlined_call_operand.vmem [shape: f32[56,384], index: 3, kind: input, shape index: {}]   ;;  %s6674_s4 = inlined_call_operand.<no memory space> [shape: f32[1,1], index: 4, kind: input, shape index: {}]   ;;  %s6675_s5 = inlined_call_operand.vmem [shape: f32[8,1], index: 5, kind: output, shape index: {}]  }
   0x1   :  { %v4145_v0 = vld [vmem:[%s6670_s1 + $0x30] sm:$0x3]  ;;  %v4150_v1 = vld [vmem:[%s6670_s1 + $0x38] sm:$0x3]  ;;  %v4164_v3 = vld [vmem:[%s6670_s1 + $0x20] sm:$0xff]  ;;  %vm560_vm4 = vcmask 1043459  }
   0x2   :  { %v4155_v2 = vld [vmem:[%s6670_s1 + $0x18] sm:$0xff]  ;;  %3706 = vmatpush.msk.msra.mxu0 %vm72_vm0, %v4145_v0  ;;  %4084 = vmatpush.msk.msra.mxu2 %vm72_vm0, %v4145_v0  ;;  %v4171_v4 = vld [vmem:[%s6670_s1] sm:$0xff]  ;;  %v4180_v5 = vld [vmem:[%s6670_s1 + $0x8] sm:$0xff]  ;;  %vm562_vm5 = vcmask 1044484   ;;  %vm564_vm6 = vcmask 1045509   ;;  %vm566_vm7 = vcmask 1046534  }
   0x3   :  { %4087 = vmatpush.msk.msra.mxu3 %vm72_vm0, %v4150_v1  ;;  %3715 = vmatpush.msk.msra.mxu1 %vm72_vm0, %v4150_v1  ;;  %v31_v6 = vld [vmem:[%s6671_s0] sm:$0xff]  ;;  %v4212_v9 = vld [vmem:[%s6670_s1 + $0x28] sm:$0xff]  ;;  %v4222_v10 = vld [vmem:[%s6670_s1 + $0x10] sm:$0xff]  ;;  %vm568_vm8 = vcmask 1047559   ;;  %vm571_vm9 = vcmask 64512   ;;  %vm3700_vm12 = vcmask 7168  }
   0x4   :  { %96 = vmatpush.msra.mxu0 %v4155_v2  ;;  %4085 = vmatpush.msra.mxu2 %v4155_v2  ;;  %v4189_v7 = vld [vmem:[%s6671_s0 + $0x1c0] sm:$0xff]  ;;  %v32_v11 = vld [vmem:[%s6671_s0 + $0x70] sm:$0xff]  ;;  %v39_v17 = vld [vmem:[%s6671_s0 + $0x38] sm:$0xff] }
   0x5   :  { %4088 = vmatpush.msra.mxu3 %v4164_v3  ;;  %137 = vmatpush.msra.mxu1 %v4164_v3  ;;  %v4197_v8 = vld [vmem:[%s6670_s1 + $0x40] sm:$0x3]  ;;  %v4233_v12 = vld [vmem:[%s6671_s0 + $0x230] sm:$0xff]  ;;  %v40_v18 = vld [vmem:[%s6671_s0 + $0xa8] sm:$0xff] }
   0x6   :  { %97 = vmatpush.msra.mxu0 %v4171_v4  ;;  %4086 = vmatpush.msra.mxu2 %v4171_v4  ;;  %v33_v13 = vld [vmem:[%s6671_s0 + $0xe0] sm:$0xff]  ;;  %v34_v15 = vld [vmem:[%s6671_s0 + $0x150] sm:$0xff]  ;;  %v41_v19 = vld [vmem:[%s6671_s0 + $0x118] sm:$0xff] }
   0x7   :  { %4089 = vmatpush.msra.mxu3 %v4180_v5  ;;  %3707 = vmatmul.msk.f32.vlgmr.msra.gmra.mxu0 %vm47_vm1, %v31_v6  ;;  %v37_v14 = vld [vmem:[%s6671_s0 + $0x2a0] sm:$0xff]  ;;  %v38_v16 = vld [vmem:[%s6671_s0 + $0x310] sm:$0xff]  ;;  %v42_v20 = vld [vmem:[%s6671_s0 + $0x188] sm:$0xff] }
   0x8   :  { %3711 = vmatmul.msk.f32.vlgmr.msra.gmra.mxu2 %vm47_vm1, %v4189_v7  ;;  %3720 = vmatmul.msk.f32.vlgmr.msra.gmra.mxu3 %vm47_vm1, %v4189_v7  ;;  %v43_v21 = vld [vmem:[%s6671_s0 + $0x1f8] sm:$0xff]  ;;  %v44_v22 = vld [vmem:[%s6671_s0 + $0x268] sm:$0xff]  ;;  %v4366_v26 = vld [vmem:[%s6671_s0 + $0x40] sm:$0xff] }
   0x9   :  { %3733 = vmatpush.msk.msrb.mxu3 %vm72_vm0, %v4145_v0  ;;  %3724 = vmatpush.msk.msrb.mxu2 %vm72_vm0, %v4197_v8  ;;  %v45_v23 = vld [vmem:[%s6671_s0 + $0x2d8] sm:$0xff]  ;;  %v46_v24 = vld [vmem:[%s6671_s0 + $0x348] sm:$0xff]  ;;  %v4393_v28 = vld [vmem:[%s6671_s0 + $0xb0] sm:$0xff] }
   0xa   :  { %3742 = vmatpush.msk.msrb.mxu0 %vm72_vm0, %v4150_v1  ;;  %138 = vmatpush.msra.mxu1 %v4180_v5  ;;  %v576_v25 = vld [vmem:[%s6671_s0 + $0x8] sm:$0xff]  ;;  %v577_v27 = vld [vmem:[%s6671_s0 + $0x78] sm:$0xff]  ;;  %v4408_v30 = vld [vmem:[%s6671_s0 + $0x120] sm:$0xff] }
   0xb   :  { %3716 = vmatmul.msk.f32.vlgmr.msra.gmra.mxu1 %vm47_vm1, %v31_v6  ;;  %243 = vmatpush.msrb.mxu3 %v4155_v2  ;;  %v578_v29 = vld [vmem:[%s6671_s0 + $0xe8] sm:$0xff]  ;;  %v579_v31 = vld [vmem:[%s6671_s0 + $0x158] sm:$0xff]  ;;  %v4421_v32 = vld [vmem:[%s6671_s0 + $0x190] sm:$0xff] }
   0xc   :  { %3751 = vmatpush.msk.msrb.mxu1 %vm72_vm0, %v4197_v8  ;;  %178 = vmatpush.msrb.mxu2 %v4212_v9  ;;  %v580_v34 = vld [vmem:[%s6671_s0 + $0x1c8] sm:$0xff]  ;;  %v4434_v36 = vld [vmem:[%s6671_s0 + $0x200] sm:$0xff]  ;;  %v581_v40 = vld [vmem:[%s6671_s0 + $0x238] sm:$0xff] }
   0xd   :  { %284 = vmatpush.msrb.mxu0 %v4164_v3  ;;  %244 = vmatpush.msrb.mxu3 %v4171_v4  ;;  %v4455_v42 = vld [vmem:[%s6671_s0 + $0x270] sm:$0xff]  ;;  %v582_v46 = vld [vmem:[%s6671_s0 + $0x2a8] sm:$0xff]  ;;  %v4476_v48 = vld [vmem:[%s6671_s0 + $0x2e0] sm:$0xff] }
   0xe   :  { %325 = vmatpush.msrb.mxu1 %v4212_v9  ;;  %179 = vmatpush.msrb.mxu2 %v4222_v10  ;;  %v583_v52 = vld [vmem:[%s6671_s0 + $0x318] sm:$0xff]  ;;  %v4497_v54 = vld [vmem:[%s6671_s0 + $0x350] sm:$0xff]  ;;  %v30_v55 = vld [vmem:[%s6672_s2] sm:$0x7] }
   0xf   :  { %3708 = vmatmul.msk.f32.gmra.mxu0 %vm47_vm1, %v32_v11  ;;  %3769 = vmatpush.msk.msra.mxu3 %vm72_vm0, %v4150_v1  ;;  %v4508_v58 = vperm.slane %v30_v55, 1  ;;  %v4513_v60 = vld [vmem:[%s6671_s0 + $0x10] sm:$0xff]  ;;  %v4515_v61 = vperm.slane %v30_v55, 0  ;;  %v4517_v62 = vperm.slane %v30_v55, 2 }
  0x10   :  { %3712 = vmatmul.msk.f32.gmra.mxu2 %vm47_vm1, %v4233_v12  ;;  %3721 = vmatmul.msk.f32.gmra.mxu3 %vm47_vm1, %v4233_v12 }
  0x11   :  { %285 = vmatpush.msrb.mxu0 %v4180_v5  ;;  %326 = vmatpush.msrb.mxu1 %v4222_v10 }
  0x12   :  { %3760 = vmatpush.msk.msra.mxu2 %vm72_vm0, %v4145_v0  ;;  %671 = vmatpush.msra.mxu3 %v4164_v3 }
  0x13   :  { %3778 = vmatpush.msk.msra.mxu0 %vm72_vm0, %v4197_v8  ;;  %3717 = vmatmul.msk.f32.gmra.mxu1 %vm47_vm1, %v32_v11 }
  0x14   :  { %3787 = vmatpush.msk.msra.mxu1 %vm72_vm0, %v4145_v0  ;;  %630 = vmatpush.msra.mxu2 %v4155_v2 }
  0x15   :  { %712 = vmatpush.msra.mxu0 %v4212_v9  ;;  %672 = vmatpush.msra.mxu3 %v4180_v5 }
  0x16   :  { %777 = vmatpush.msra.mxu1 %v4155_v2  ;;  %631 = vmatpush.msra.mxu2 %v4171_v4 }
  0x17   :  { %3709 = vmatmul.msk.f32.gmra.mxu0 %vm47_vm1, %v33_v13 }
  0x18   :  { %3713 = vmatmul.msk.f32.gmra.mxu2 %vm47_vm1, %v37_v14  ;;  %3722 = vmatmul.msk.f32.gmra.mxu3 %vm47_vm1, %v37_v14 }
  0x19   :  { %713 = vmatpush.msra.mxu0 %v4222_v10  ;;  %778 = vmatpush.msra.mxu1 %v4171_v4 }
  0x1b   :  { %3718 = vmatmul.msk.f32.gmra.mxu1 %vm47_vm1, %v33_v13 }
  0x1f   :  { %3710 = vmatmul.msk.f32.gmra.mxu0 %vm47_vm1, %v34_v15 }
  0x20   :  { %3714 = vmatmul.msk.f32.gmra.mxu2 %vm47_vm1, %v38_v16  ;;  %3723 = vmatmul.msk.f32.gmra.mxu3 %vm47_vm1, %v38_v16 }
  0x23   :  { %3719 = vmatmul.msk.f32.gmra.mxu1 %vm47_vm1, %v34_v15 }
  0x27   :  { %3743 = vmatmul.msk.f32.vlgmr.msrb.gmra.mxu0 %vm47_vm1, %v39_v17 }
  0x28   :  { %3725 = vmatmul.msk.f32.vlgmr.msrb.gmra.mxu2 %vm47_vm1, %v31_v6  ;;  %3734 = vmatmul.msk.f32.vlgmr.msrb.gmra.mxu3 %vm47_vm1, %v39_v17 }
  0x29   :  { %3805 = vmatpush.msk.msrb.mxu3 %vm72_vm0, %v4197_v8  ;;  %3796 = vmatpush.msk.msrb.mxu2 %vm72_vm0, %v4150_v1 }
  0x2a   :  { %3814 = vmatpush.msk.msrb.mxu0 %vm72_vm0, %v4145_v0 }
  0x2b   :  { %3752 = vmatmul.msk.f32.vlgmr.msrb.gmra.mxu1 %vm47_vm1, %v39_v17  ;;  %859 = vmatpush.msrb.mxu3 %v4212_v9 }
  0x2c   :  { %3823 = vmatpush.msk.msrb.mxu1 %vm72_vm0, %v4150_v1  ;;  %818 = vmatpush.msrb.mxu2 %v4164_v3 }
  0x2d   :  { %1147 = vmatpush.msrb.mxu0 %v4155_v2  ;;  %860 = vmatpush.msrb.mxu3 %v4222_v10 }
  0x2e   :  { %1188 = vmatpush.msrb.mxu1 %v4164_v3  ;;  %819 = vmatpush.msrb.mxu2 %v4180_v5 }
  0x2f   :  { %3744 = vmatmul.msk.f32.gmra.mxu0 %vm47_vm1, %v40_v18 }
  0x30   :  { %3726 = vmatmul.msk.f32.gmra.mxu2 %vm47_vm1, %v32_v11  ;;  %3735 = vmatmul.msk.f32.gmra.mxu3 %vm47_vm1, %v40_v18 }
  0x31   :  { %1148 = vmatpush.msrb.mxu0 %v4171_v4  ;;  %1189 = vmatpush.msrb.mxu1 %v4180_v5 }
  0x33   :  { %3753 = vmatmul.msk.f32.gmra.mxu1 %vm47_vm1, %v40_v18 }
  0x37   :  { %3745 = vmatmul.msk.f32.gmra.mxu0 %vm47_vm1, %v41_v19 }
  0x38   :  { %3727 = vmatmul.msk.f32.gmra.mxu2 %vm47_vm1, %v33_v13  ;;  %3736 = vmatmul.msk.f32.gmra.mxu3 %vm47_vm1, %v41_v19 }
  0x3b   :  { %3754 = vmatmul.msk.f32.gmra.mxu1 %vm47_vm1, %v41_v19 }
  0x3f   :  { %3746 = vmatmul.msk.f32.gmra.mxu0 %vm47_vm1, %v42_v20 }
  0x40   :  { %3728 = vmatmul.msk.f32.gmra.mxu2 %vm47_vm1, %v34_v15  ;;  %3737 = vmatmul.msk.f32.gmra.mxu3 %vm47_vm1, %v42_v20 }
  0x43   :  { %3755 = vmatmul.msk.f32.gmra.mxu1 %vm47_vm1, %v42_v20 }
  0x47   :  { %3747 = vmatmul.msk.f32.gmra.mxu0 %vm47_vm1, %v43_v21 }
  0x48   :  { %3729 = vmatmul.msk.f32.gmra.mxu2 %vm47_vm1, %v4189_v7  ;;  %3738 = vmatmul.msk.f32.gmra.mxu3 %vm47_vm1, %v43_v21 }
  0x4b   :  { %3756 = vmatmul.msk.f32.gmra.mxu1 %vm47_vm1, %v43_v21  ;;  %v4543_v21 = vld [vmem:[%s6671_s0 + $0x80] sm:$0xff] }
  0x4f   :  { %3748 = vmatmul.msk.f32.gmra.mxu0 %vm47_vm1, %v44_v22 }
  0x50   :  { %3730 = vmatmul.msk.f32.gmra.mxu2 %vm47_vm1, %v4233_v12  ;;  %3739 = vmatmul.msk.f32.gmra.mxu3 %vm47_vm1, %v44_v22 }
  0x53   :  { %3757 = vmatmul.msk.f32.gmra.mxu1 %vm47_vm1, %v44_v22 }
  0x57   :  { %3749 = vmatmul.msk.f32.gmra.mxu0 %vm47_vm1, %v45_v23 }
  0x58   :  { %3731 = vmatmul.msk.f32.gmra.mxu2 %vm47_vm1, %v37_v14  ;;  %3740 = vmatmul.msk.f32.gmra.mxu3 %vm47_vm1, %v45_v23 }
  0x5b   :  { %3758 = vmatmul.msk.f32.gmra.mxu1 %vm47_vm1, %v45_v23 }
  0x5f   :  { %3750 = vmatmul.msk.f32.gmra.mxu0 %vm47_vm1, %v46_v24 }
  0x60   :  { %3732 = vmatmul.msk.f32.gmra.mxu2 %vm47_vm1, %v38_v16  ;;  %3741 = vmatmul.msk.f32.gmra.mxu3 %vm47_vm1, %v46_v24 }
  0x63   :  { %3759 = vmatmul.msk.f32.gmra.mxu1 %vm47_vm1, %v46_v24 }
  0x67   :  { %3779 = vmatmul.msk.f32.vlgmr.msra.gmra.mxu0 %vm47_vm1, %v576_v25 }
  0x68   :  { %3761 = vmatmul.msk.f32.vlgmr.msra.gmra.mxu2 %vm47_vm1, %v576_v25  ;;  %3770 = vmatmul.msk.f32.vlgmr.msra.gmra.mxu3 %vm47_vm1, %v576_v25 }
  0x69   :  { %3841 = vmatpush.msk.msra.mxu3 %vm72_vm0, %v4145_v0  ;;  %3832 = vmatpush.msk.msra.mxu2 %vm72_vm0, %v4197_v8 }
  0x6a   :  { %3850 = vmatpush.msk.msra.mxu0 %vm72_vm0, %v4150_v1 }
  0x6b   :  { %3788 = vmatmul.msk.f32.vlgmr.msra.gmra.mxu1 %vm47_vm1, %v4366_v26  ;;  %1294 = vmatpush.msra.mxu3 %v4155_v2 }
  0x6c   :  { %3859 = vmatpush.msk.msra.mxu1 %vm72_vm0, %v4197_v8  ;;  %1229 = vmatpush.msra.mxu2 %v4212_v9 }
  0x6d   :  { %1335 = vmatpush.msra.mxu0 %v4164_v3  ;;  %1295 = vmatpush.msra.mxu3 %v4171_v4 }
  0x6e   :  { %1376 = vmatpush.msra.mxu1 %v4212_v9  ;;  %1230 = vmatpush.msra.mxu2 %v4222_v10 }
  0x6f   :  { %3780 = vmatmul.msk.f32.gmra.mxu0 %vm47_vm1, %v577_v27 }
  0x70   :  { %3762 = vmatmul.msk.f32.gmra.mxu2 %vm47_vm1, %v577_v27  ;;  %3771 = vmatmul.msk.f32.gmra.mxu3 %vm47_vm1, %v577_v27 }
  0x71   :  { %1336 = vmatpush.msra.mxu0 %v4180_v5  ;;  %1377 = vmatpush.msra.mxu1 %v4222_v10 }
  0x73   :  { %3789 = vmatmul.msk.f32.gmra.mxu1 %vm47_vm1, %v4393_v28 }
  0x77   :  { %3781 = vmatmul.msk.f32.gmra.mxu0 %vm47_vm1, %v578_v29 }
  0x78   :  { %3763 = vmatmul.msk.f32.gmra.mxu2 %vm47_vm1, %v578_v29  ;;  %3772 = vmatmul.msk.f32.gmra.mxu3 %vm47_vm1, %v578_v29  ;;  %v4560_v29 = vld [vmem:[%s6673_s3] sm:$0xff] }
  0x7b   :  { %3790 = vmatmul.msk.f32.gmra.mxu1 %vm47_vm1, %v4408_v30 }
  0x7f   :  { %3782 = vmatmul.msk.f32.gmra.mxu0 %vm47_vm1, %v579_v31 }
  0x80   :  { %3764 = vmatmul.msk.f32.gmra.mxu2 %vm47_vm1, %v579_v31  ;;  %3773 = vmatmul.msk.f32.gmra.mxu3 %vm47_vm1, %v579_v31  ;;  %v4565_v31 = vld [vmem:[%s6673_s3 + $0x8] sm:$0xff] }
  0x83   :  { %3791 = vmatmul.msk.f32.gmra.mxu1 %vm47_vm1, %v4421_v32 }
  0x84   :  { %v99_v33 = vpop.f32.mrf.mxu0 }
  0x85   :  { %v359_v11 = vadd.f32 %v4515_v61, %v99_v33  ;;  %v4570_v33 = vld [vmem:[%s6673_s3 + $0x10] sm:$0xff] }
  0x87   :  { %3783 = vmatmul.msk.f32.gmra.mxu0 %vm47_vm1, %v580_v34  ;;  %v383_v22 = vmax.f32 %v359_v11, 0.0 }
  0x88   :  { %3765 = vmatmul.msk.f32.gmra.mxu2 %vm47_vm1, %v580_v34  ;;  %3774 = vmatmul.msk.f32.gmra.mxu3 %vm47_vm1, %v580_v34  ;;  %v140_v35 = vpop.f32.mrf.mxu1 }
  0x89   :  { %v360_v6 = vadd.f32 %v4508_v58, %v140_v35 }
  0x8b   :  { %v4436_v37 = vpop.f32.mrf.mxu2  ;;  %v4438_v38 = vpop.f32.mrf.mxu3  ;;  %3792 = vmatmul.msk.f32.gmra.mxu1 %vm47_vm1, %v4434_v36  ;;  %v384_v16 = vmax.f32 %v360_v6, 0.0 }
  0x8c   :  { %v4442_v39 = vpop.f32.mrf.mxu0 }
  0x8f   :  { %3784 = vmatmul.msk.f32.gmra.mxu0 %vm47_vm1, %v581_v40 }
  0x90   :  { %3766 = vmatmul.msk.f32.gmra.mxu2 %vm47_vm1, %v581_v40  ;;  %3775 = vmatmul.msk.f32.gmra.mxu3 %vm47_vm1, %v581_v40  ;;  %v4450_v41 = vpop.f32.mrf.mxu1 }
  0x91   :  { %v363_v27 = vadd.f32 %v4508_v58, %v4450_v41  ;;  %v362_v41 = vadd.f32 %v4515_v61, %v4442_v39 }
  0x93   :  { %v4457_v43 = vpop.f32.mrf.mxu2  ;;  %v4459_v44 = vpop.f32.mrf.mxu3  ;;  %3793 = vmatmul.msk.f32.gmra.mxu1 %vm47_vm1, %v4455_v42  ;;  %v387_v6 = vmax.f32 %v363_v27, 0.0 }
  0x94   :  { %v4463_v45 = vpop.f32.mrf.mxu0 }
  0x95   :  { %v365_v27 = vadd.f32 %v4515_v61, %v4463_v45 }
  0x97   :  { %3785 = vmatmul.msk.f32.gmra.mxu0 %vm47_vm1, %v582_v46 }
  0x98   :  { %3767 = vmatmul.msk.f32.gmra.mxu2 %vm47_vm1, %v582_v46  ;;  %3776 = vmatmul.msk.f32.gmra.mxu3 %vm47_vm1, %v582_v46  ;;  %v4471_v47 = vpop.f32.mrf.mxu1 }
  0x9b   :  { %v4478_v49 = vpop.f32.mrf.mxu2  ;;  %v4480_v50 = vpop.f32.mrf.mxu3  ;;  %3794 = vmatmul.msk.f32.gmra.mxu1 %vm47_vm1, %v4476_v48 }
  0x9c   :  { %v4484_v51 = vpop.f32.mrf.mxu0 }
  0x9f   :  { %3786 = vmatmul.msk.f32.gmra.mxu0 %vm47_vm1, %v583_v52 }
  0xa0   :  { %3768 = vmatmul.msk.f32.gmra.mxu2 %vm47_vm1, %v583_v52  ;;  %3777 = vmatmul.msk.f32.gmra.mxu3 %vm47_vm1, %v583_v52  ;;  %v4492_v53 = vpop.f32.mrf.mxu1 }
  0xa3   :  { %v4502_v56 = vpop.f32.mrf.mxu2  ;;  %v4504_v57 = vpop.f32.mrf.mxu3  ;;  %3795 = vmatmul.msk.f32.gmra.mxu1 %vm47_vm1, %v4497_v54 }
  0xa4   :  { %v287_v59 = vpop.f32.mrf.mxu0 }
  0xa5   :  { %v408_v63 = vadd.f32 %v4508_v58, %v287_v59 }
  0xa7   :  { %3815 = vmatmul.msk.f32.vlgmr.msrb.gmra.mxu0 %vm47_vm1, %v4513_v60  ;;  %v432_v13 = vmax.f32 %v408_v63, 0.0 }
  0xa8   :  { %3797 = vmatmul.msk.f32.vlgmr.msrb.gmra.mxu2 %vm47_vm1, %v4366_v26  ;;  %3806 = vmatmul.msk.f32.vlgmr.msrb.gmra.mxu3 %vm47_vm1, %v4366_v26  ;;  %v328_v7 = vpop.f32.mrf.mxu1 }
  0xa9   :  { %v409_v12 = vadd.f32 %v4517_v62, %v328_v7  ;;  %3877 = vmatpush.msk.msrb.mxu3 %vm72_vm0, %v4150_v1  ;;  %3868 = vmatpush.msk.msrb.mxu2 %vm72_vm0, %v4145_v0  ;;  %v456_v23 = vmax.f32 %v384_v16, %v432_v13  ;;  %v386_v16 = vmax.f32 %v362_v41, 0.0 }
  0xaa   :  { %3886 = vmatpush.msk.msrb.mxu0 %vm72_vm0, %v4197_v8 }
  0xab   :  { %v181_v14 = vpop.f32.mrf.mxu2  ;;  %v246_v15 = vpop.f32.mrf.mxu3  ;;  %3824 = vmatmul.msk.f32.vlgmr.msrb.gmra.mxu1 %vm47_vm1, %v4513_v60  ;;  %1705 = vmatpush.msrb.mxu3 %v4164_v3  ;;  %v433_v20 = vmax.f32 %v409_v12, 0.0  ;;  %v483_v59 = vmul.f32 %v4565_v31, %v456_v23  ;;  %v366_v23 = vadd.f32 %v4508_v58, %v4471_v47 }
  0xac   :  { %v361_v17 = vadd.f32 %v4517_v62, %v181_v14  ;;  %v407_v18 = vadd.f32 %v4515_v61, %v246_v15  ;;  %v290_v19 = vpop.f32.mrf.mxu0  ;;  %3895 = vmatpush.msk.msrb.mxu1 %vm72_vm0, %v4145_v0  ;;  %1664 = vmatpush.msrb.mxu2 %v4155_v2  ;;  %v4591_v14 = vld [vmem:[%s6671_s0 + $0xf0] sm:$0xff] }
  0xad   :  { %1746 = vmatpush.msrb.mxu0 %v4212_v9  ;;  %1706 = vmatpush.msrb.mxu3 %v4180_v5  ;;  %v411_v26 = vadd.f32 %v4508_v58, %v290_v19 }
  0xae   :  { %v385_v24 = vmax.f32 %v361_v17, 0.0  ;;  %v431_v25 = vmax.f32 %v407_v18, 0.0  ;;  %1811 = vmatpush.msrb.mxu1 %v4155_v2  ;;  %1665 = vmatpush.msrb.mxu2 %v4171_v4 }
  0xaf   :  { %3816 = vmatmul.msk.f32.gmra.mxu0 %vm47_vm1, %v4543_v21  ;;  %v435_v52 = vmax.f32 %v411_v26, 0.0 }
  0xb0   :  { %v455_v34 = vmax.f32 %v383_v22, %v431_v25  ;;  %3798 = vmatmul.msk.f32.gmra.mxu2 %vm47_vm1, %v4393_v28  ;;  %3807 = vmatmul.msk.f32.gmra.mxu3 %vm47_vm1, %v4393_v28  ;;  %v331_v35 = vpop.f32.mrf.mxu1  ;;  %v457_v40 = vmax.f32 %v385_v24, %v433_v20 }
  0xb1   :  { %v412_v46 = vadd.f32 %v4517_v62, %v331_v35  ;;  %1747 = vmatpush.msrb.mxu0 %v4222_v10  ;;  %1812 = vmatpush.msrb.mxu1 %v4171_v4  ;;  %v459_v18 = vmax.f32 %v387_v6, %v435_v52  ;;  %v4615_v6 = vld [vmem:[%s6671_s0 + $0x160] sm:$0xff] }
  0xb2   :  { %v482_v55 = vmul.f32 %v4560_v29, %v455_v34  ;;  %v484_v63 = vmul.f32 %v4570_v33, %v457_v40 }
  0xb3   :  { %v184_v28 = vpop.f32.mrf.mxu2  ;;  %v249_v7 = vpop.f32.mrf.mxu3  ;;  %3825 = vmatmul.msk.f32.gmra.mxu1 %vm47_vm1, %v4543_v21  ;;  %v436_v13 = vmax.f32 %v412_v46, 0.0  ;;  %v486_v40 = vmul.f32 %v4565_v31, %v459_v18  ;;  %v390_v46 = vmax.f32 %v366_v23, 0.0 }
  0xb4   :  { %v364_v39 = vadd.f32 %v4517_v62, %v184_v28  ;;  %v410_v11 = vadd.f32 %v4515_v61, %v249_v7  ;;  %v293_v12 = vpop.f32.mrf.mxu0  ;;  %v506_v15 = vadd.f32 %v483_v59, %v482_v55  ;;  %v389_v7 = vmax.f32 %v365_v27, 0.0 }
  0xb5   :  { %v414_v17 = vadd.f32 %v4508_v58, %v293_v12 }
  0xb6   :  { %v388_v19 = vmax.f32 %v364_v39, 0.0  ;;  %v434_v20 = vmax.f32 %v410_v11, 0.0  ;;  %v507_v22 = vadd.f32 %v506_v15, %v484_v63 }
  0xb7   :  { %3817 = vmatmul.msk.f32.gmra.mxu0 %vm47_vm1, %v4591_v14  ;;  %v438_v34 = vmax.f32 %v414_v17, 0.0 }
  0xb8   :  { %v458_v24 = vmax.f32 %v386_v16, %v434_v20  ;;  %v460_v25 = vmax.f32 %v388_v19, %v436_v13  ;;  %3799 = vmatmul.msk.f32.gmra.mxu2 %vm47_vm1, %v4408_v30  ;;  %3808 = vmatmul.msk.f32.gmra.mxu3 %vm47_vm1, %v4408_v30  ;;  %v334_v26 = vpop.f32.mrf.mxu1  ;;  %v369_v16 = vadd.f32 %v4508_v58, %v4492_v53 }
  0xb9   :  { %508 = vadd.xlane.f32.xlu0 %v507_v22  ;;  %v415_v35 = vadd.f32 %v4517_v62, %v334_v26  ;;  %v462_v39 = vmax.f32 %v390_v46, %v438_v34  ;;  %v368_v20 = vadd.f32 %v4515_v61, %v4484_v51 }
  0xba   :  { %v485_v47 = vmul.f32 %v4560_v29, %v458_v24  ;;  %v487_v41 = vmul.f32 %v4570_v33, %v460_v25  ;;  %v393_v26 = vmax.f32 %v369_v16, 0.0 }
  0xbb   :  { %v187_v52 = vpop.f32.mrf.mxu2  ;;  %v252_v55 = vpop.f32.mrf.mxu3  ;;  %3826 = vmatmul.msk.f32.gmra.mxu1 %vm47_vm1, %v4591_v14  ;;  %v439_v63 = vmax.f32 %v415_v35, 0.0  ;;  %v489_v24 = vmul.f32 %v4565_v31, %v462_v39  ;;  %v392_v46 = vmax.f32 %v368_v20, 0.0 }
  0xbc   :  { %v367_v30 = vadd.f32 %v4517_v62, %v187_v52  ;;  %v413_v45 = vadd.f32 %v4515_v61, %v252_v55  ;;  %v296_v59 = vpop.f32.mrf.mxu0  ;;  %v510_v28 = vadd.f32 %v486_v40, %v485_v47  ;;  %v4639_v40 = vld [vmem:[%s6671_s0 + $0x1d0] sm:$0xff] }
  0xbd   :  { %v417_v13 = vadd.f32 %v4508_v58, %v296_v59 }
  0xbe   :  { %v391_v11 = vmax.f32 %v367_v30, 0.0  ;;  %v437_v12 = vmax.f32 %v413_v45, 0.0  ;;  %v511_v15 = vadd.f32 %v510_v28, %v487_v41 }
  0xbf   :  { %3818 = vmatmul.msk.f32.gmra.mxu0 %vm47_vm1, %v4615_v6  ;;  %v441_v23 = vmax.f32 %v417_v13, 0.0 }
  0xc0   :  { %v461_v17 = vmax.f32 %v389_v7, %v437_v12  ;;  %3800 = vmatmul.msk.f32.gmra.mxu2 %vm47_vm1, %v4421_v32  ;;  %3809 = vmatmul.msk.f32.gmra.mxu3 %vm47_vm1, %v4421_v32  ;;  %v337_v18 = vpop.f32.mrf.mxu1  ;;  %v463_v19 = vmax.f32 %v391_v11, %v439_v63  ;;  %v372_v63 = vadd.f32 %v4508_v58, %v4438_v38 }
  0xc1   :  { %512 = vadd.xlane.f32.xlu0 %v511_v15  ;;  %v418_v22 = vadd.f32 %v4517_v62, %v337_v18  ;;  %v465_v55 = vmax.f32 %v393_v26, %v441_v23  ;;  %v371_v11 = vadd.f32 %v4515_v61, %v4436_v37  ;;  %v4663_v23 = vld [vmem:[%s6671_s0 + $0x240] sm:$0xff] }
  0xc2   :  { %v488_v53 = vmul.f32 %v4560_v29, %v461_v17  ;;  %v490_v25 = vmul.f32 %v4570_v33, %v463_v19  ;;  %v396_v17 = vmax.f32 %v372_v63, 0.0 }
  0xc3   :  { %v190_v27 = vpop.f32.mrf.mxu2  ;;  %v255_v34 = vpop.f32.mrf.mxu3  ;;  %3827 = vmatmul.msk.f32.gmra.mxu1 %vm47_vm1, %v4615_v6  ;;  %v442_v47 = vmax.f32 %v418_v22, 0.0  ;;  %v492_v15 = vmul.f32 %v4565_v31, %v465_v55 }
  0xc4   :  { %v370_v32 = vadd.f32 %v4517_v62, %v190_v27  ;;  %v416_v51 = vadd.f32 %v4515_v61, %v255_v34  ;;  %v299_v35 = vpop.f32.mrf.mxu0  ;;  %v514_v41 = vadd.f32 %v489_v24, %v488_v53  ;;  %v395_v24 = vmax.f32 %v371_v11, 0.0  ;;  %v4687_v11 = vld [vmem:[%s6671_s0 + $0x2b0] sm:$0xff] }
  0xc5   :  { %v420_v52 = vadd.f32 %v4508_v58, %v299_v35 }
  0xc6   :  { %v394_v30 = vmax.f32 %v370_v32, 0.0  ;;  %v440_v45 = vmax.f32 %v416_v51, 0.0  ;;  %v515_v59 = vadd.f32 %v514_v41, %v490_v25  ;;  %v375_v51 = vadd.f32 %v4508_v58, %v4459_v44 }
  0xc7   :  { %3819 = vmatmul.msk.f32.gmra.mxu0 %vm47_vm1, %v4639_v40  ;;  %v444_v12 = vmax.f32 %v420_v52, 0.0 }
  0xc8   :  { %v464_v28 = vmax.f32 %v392_v46, %v440_v45  ;;  %v466_v7 = vmax.f32 %v394_v30, %v442_v47  ;;  %3801 = vmatmul.msk.f32.gmra.mxu2 %vm47_vm1, %v4434_v36  ;;  %3810 = vmatmul.msk.f32.gmra.mxu3 %vm47_vm1, %v4434_v36  ;;  %v340_v39 = vpop.f32.mrf.mxu1  ;;  %v374_v46 = vadd.f32 %v4515_v61, %v4457_v43 }
  0xc9   :  { %516 = vadd.xlane.f32.xlu1 %v515_v59  ;;  %v421_v13 = vadd.f32 %v4517_v62, %v340_v39  ;;  %v468_v25 = vmax.f32 %v396_v17, %v444_v12  ;;  %v399_v59 = vmax.f32 %v375_v51, 0.0 }
  0xca   :  { %v491_v38 = vmul.f32 %v4560_v29, %v464_v28  ;;  %v493_v16 = vmul.f32 %v4570_v33, %v466_v7 }
  0xcb   :  { %v193_v18 = vpop.f32.mrf.mxu2  ;;  %v258_v19 = vpop.f32.mrf.mxu3  ;;  %3828 = vmatmul.msk.f32.gmra.mxu1 %vm47_vm1, %v4639_v40  ;;  %v445_v22 = vmax.f32 %v421_v13, 0.0  ;;  %v495_v30 = vmul.f32 %v4565_v31, %v468_v25  ;;  %v398_v13 = vmax.f32 %v374_v46, 0.0 }
  0xcc   :  { %v373_v36 = vadd.f32 %v4517_v62, %v193_v18  ;;  %v419_v37 = vadd.f32 %v4515_v61, %v258_v19  ;;  %v302_v20 = vpop.f32.mrf.mxu0  ;;  %v518_v53 = vadd.f32 %v492_v15, %v491_v38  ;;  %v378_v19 = vadd.f32 %v4508_v58, %v4480_v50 }
  0xcd   :  { %v423_v34 = vadd.f32 %v4508_v58, %v302_v20 }
  0xce   :  { %v397_v26 = vmax.f32 %v373_v36, 0.0  ;;  %v443_v27 = vmax.f32 %v419_v37, 0.0  ;;  %v519_v32 = vadd.f32 %v518_v53, %v493_v16 }
  0xcf   :  { %3820 = vmatmul.msk.f32.gmra.mxu0 %vm47_vm1, %v4663_v23  ;;  %v447_v55 = vmax.f32 %v423_v34, 0.0 }
  0xd0   :  { %v467_v35 = vmax.f32 %v395_v24, %v443_v27  ;;  %3802 = vmatmul.msk.f32.gmra.mxu2 %vm47_vm1, %v4455_v42  ;;  %3811 = vmatmul.msk.f32.gmra.mxu3 %vm47_vm1, %v4455_v42  ;;  %v343_v47 = vpop.f32.mrf.mxu1  ;;  %v469_v41 = vmax.f32 %v397_v26, %v445_v22  ;;  %v377_v22 = vadd.f32 %v4515_v61, %v4478_v49  ;;  %v402_v27 = vmax.f32 %v378_v19, 0.0  ;;  %v1101_v19 = vld [vmem:[%s6671_s0 + $0x48] sm:$0xff] }
  0xd1   :  { %520 = vadd.xlane.f32.xlu1 %v519_v32  ;;  %v424_v52 = vadd.f32 %v4517_v62, %v343_v47  ;;  %v471_v15 = vmax.f32 %v399_v59, %v447_v55  ;;  %v4711_v47 = vld [vmem:[%s6671_s0 + $0x320] sm:$0xff]  ;;  %v381_v59 = vadd.f32 %v4508_v58, %v4504_v57 }
  0xd2   :  { %v494_v44 = vmul.f32 %v4560_v29, %v467_v35  ;;  %v496_v45 = vmul.f32 %v4570_v33, %v469_v41  ;;  %v401_v46 = vmax.f32 %v377_v22, 0.0 }
  0xd3   :  { %v196_v63 = vpop.f32.mrf.mxu2  ;;  %v261_v28 = vpop.f32.mrf.mxu3  ;;  %3829 = vmatmul.msk.f32.gmra.mxu1 %vm47_vm1, %v4663_v23  ;;  %v448_v39 = vmax.f32 %v424_v52, 0.0  ;;  %v498_v25 = vmul.f32 %v4565_v31, %v471_v15 }
  0xd4   :  { %v376_v42 = vadd.f32 %v4517_v62, %v196_v63  ;;  %v422_v43 = vadd.f32 %v4515_v61, %v261_v28  ;;  %v305_v7 = vpop.f32.mrf.mxu0  ;;  %v522_v12 = vadd.f32 %v495_v30, %v494_v44 }
  0xd5   :  { %v426_v38 = vadd.f32 %v4508_v58, %v305_v7 }
  0xd6   :  { %v400_v16 = vmax.f32 %v376_v42, 0.0  ;;  %v446_v17 = vmax.f32 %v422_v43, 0.0  ;;  %v523_v18 = vadd.f32 %v522_v12, %v496_v45  ;;  %v380_v43 = vadd.f32 %v4515_v61, %v4502_v56 }
  0xd7   :  { %3821 = vmatmul.msk.f32.gmra.mxu0 %vm47_vm1, %v4687_v11  ;;  %v450_v53 = vmax.f32 %v426_v38, 0.0  ;;  %v405_v38 = vmax.f32 %v381_v59, 0.0 }
  0xd8   :  { %v470_v36 = vmax.f32 %v398_v13, %v446_v17  ;;  %v472_v37 = vmax.f32 %v400_v16, %v448_v39  ;;  %3803 = vmatmul.msk.f32.gmra.mxu2 %vm47_vm1, %v4476_v48  ;;  %3812 = vmatmul.msk.f32.gmra.mxu3 %vm47_vm1, %v4476_v48  ;;  %v346_v20 = vpop.f32.mrf.mxu1 }
  0xd9   :  { %524 = vadd.xlane.f32.xlu2 %v523_v18  ;;  %v427_v24 = vadd.f32 %v4517_v62, %v346_v20  ;;  %v474_v52 = vmax.f32 %v402_v27, %v450_v53 }
  0xda   :  { %v497_v50 = vmul.f32 %v4560_v29, %v470_v36  ;;  %v499_v26 = vmul.f32 %v4570_v33, %v472_v37  ;;  %v404_v37 = vmax.f32 %v380_v43, 0.0 }
  0xdb   :  { %v199_v34 = vpop.f32.mrf.mxu2  ;;  %v264_v32 = vpop.f32.mrf.mxu3  ;;  %3830 = vmatmul.msk.f32.gmra.mxu1 %vm47_vm1, %v4687_v11  ;;  %v451_v35 = vmax.f32 %v427_v24, 0.0  ;;  %v501_v12 = vmul.f32 %v4565_v31, %v474_v52 }
  0xdc   :  { %v379_v48 = vadd.f32 %v4517_v62, %v199_v34  ;;  %v425_v49 = vadd.f32 %v4515_v61, %v264_v32  ;;  %v308_v51 = vpop.f32.mrf.mxu0  ;;  %v526_v41 = vadd.f32 %v498_v25, %v497_v50 }
  0xdd   :  { %v429_v30 = vadd.f32 %v4508_v58, %v308_v51 }
  0xde   :  { %v403_v55 = vmax.f32 %v379_v48, 0.0  ;;  %v449_v44 = vmax.f32 %v425_v49, 0.0  ;;  %v527_v45 = vadd.f32 %v526_v41, %v499_v26  ;;  %v1104_v49 = vld [vmem:[%s6671_s0 + $0x198] sm:$0xff] }
  0xdf   :  { %3822 = vmatmul.msk.f32.gmra.mxu0 %vm47_vm1, %v4711_v47  ;;  %v453_v39 = vmax.f32 %v429_v30, 0.0  ;;  %v1106_v30 = vld [vmem:[%s6671_s0 + $0x278] sm:$0xff] }
  0xe0   :  { %v473_v63 = vmax.f32 %v401_v46, %v449_v44  ;;  %v475_v28 = vmax.f32 %v403_v55, %v451_v35  ;;  %3804 = vmatmul.msk.f32.gmra.mxu2 %vm47_vm1, %v4497_v54  ;;  %3813 = vmatmul.msk.f32.gmra.mxu3 %vm47_vm1, %v4497_v54  ;;  %v349_v42 = vpop.f32.mrf.mxu1  ;;  %v1105_v46 = vld [vmem:[%s6671_s0 + $0x208] sm:$0xff] }
  0xe1   :  { %528 = vadd.xlane.f32.xlu2 %v527_v45  ;;  %v430_v7 = vadd.f32 %v4517_v62, %v349_v42  ;;  %v477_v20 = vmax.f32 %v405_v38, %v453_v39  ;;  %v1108_v39 = vld [vmem:[%s6671_s0 + $0x358] sm:$0xff] }
  0xe2   :  { %v500_v57 = vmul.f32 %v4560_v29, %v473_v63  ;;  %v502_v13 = vmul.f32 %v4570_v33, %v475_v28  ;;  %v1107_v28 = vld [vmem:[%s6671_s0 + $0x2e8] sm:$0xff]  ;;  %v1610_v38 = vld [vmem:[%s6671_s0 + $0x18] sm:$0xff] }
  0xe3   :  { %v202_v15 = vpop.f32.mrf.mxu2  ;;  %v267_v16 = vpop.f32.mrf.mxu3  ;;  %3831 = vmatmul.msk.f32.gmra.mxu1 %vm47_vm1, %v4711_v47  ;;  %v454_v17 = vmax.f32 %v430_v7, 0.0  ;;  %v504_v34 = vmul.f32 %v4565_v31, %v477_v20  ;;  %v4919_v20 = vld [vmem:[%s6670_s1 + $0x38] sm:$0x3] }
  0xe4   :  { %v382_v54 = vadd.f32 %v4517_v62, %v202_v15  ;;  %v428_v56 = vadd.f32 %v4515_v61, %v267_v16  ;;  %v4732_v18 = vpop.f32.mrf.mxu0  ;;  %v530_v36 = vadd.f32 %v501_v12, %v500_v57 }
  0xe6   :  { %v406_v22 = vmax.f32 %v382_v54, 0.0  ;;  %v452_v53 = vmax.f32 %v428_v56, 0.0  ;;  %v531_v24 = vadd.f32 %v530_v36, %v502_v13  ;;  %v4896_v54 = vld [vmem:[%s6671_s0 + $0x50] sm:$0xff]  ;;  %v888_v56 = vadd.f32 %v4732_v18, %v4517_v62 }
  0xe7   :  { %3851 = vmatmul.msk.f32.vlgmr.msra.gmra.mxu0 %vm47_vm1, %v1101_v19 }
  0xe8   :  { %v476_v50 = vmax.f32 %v404_v37, %v452_v53  ;;  %v478_v25 = vmax.f32 %v406_v22, %v454_v17  ;;  %3833 = vmatmul.msk.f32.vlgmr.msra.gmra.mxu2 %vm47_vm1, %v4513_v60  ;;  %3842 = vmatmul.msk.f32.vlgmr.msra.gmra.mxu3 %vm47_vm1, %v1101_v19  ;;  %v4741_v26 = vpop.f32.mrf.mxu1  ;;  %v4903_v17 = vld [vmem:[%s6670_s1 + $0x30] sm:$0x3] }
  0xe9   :  { %532 = vadd.xlane.f32.xlu0 %v531_v24  ;;  %3913 = vmatpush.msk.msra.mxu3 %vm72_vm0, %v4197_v8  ;;  %v4928_v24 = vld [vmem:[%s6670_s1 + $0x18] sm:$0xff] }
  0xea   :  { %v503_v27 = vmul.f32 %v4560_v29, %v476_v50  ;;  %v505_v32 = vmul.f32 %v4570_v33, %v478_v25  ;;  %3904 = vmatpush.msk.msra.mxu2 %vm72_vm0, %v4150_v1  ;;  %3922 = vmatpush.msk.msra.mxu0 %vm72_vm0, %v4145_v0  ;;  %v1102_v29 = vld [vmem:[%s6671_s0 + $0xb8] sm:$0xff] }
  0xeb   :  { %v4752_v60 = vpop.f32.mrf.mxu2  ;;  %v4754_v48 = vpop.f32.mrf.mxu3  ;;  %3860 = vmatmul.msk.f32.vlgmr.msra.gmra.mxu1 %vm47_vm1, %v1101_v19  ;;  %1893 = vmatpush.msra.mxu3 %v4212_v9  ;;  %v4910_v19 = vld [vmem:[%s6670_s1 + $0x40] sm:$0x3] }
  0xec   :  { %v4758_v8 = vpop.f32.mrf.mxu0  ;;  %v534_v31 = vadd.f32 %v504_v34, %v503_v27  ;;  %3931 = vmatpush.msk.msra.mxu1 %vm72_vm0, %v4150_v1  ;;  %1852 = vmatpush.msra.mxu2 %v4164_v3  ;;  %v886_v15 = vadd.f32 %v4752_v60, %v4515_v61  ;;  %v887_v18 = vadd.f32 %v4754_v48, %v4508_v58  ;;  %v1611_v27 = vld [vmem:[%s6671_s0 + $0x88] sm:$0xff] }
  0xed   :  { %2181 = vmatpush.msra.mxu0 %v4155_v2  ;;  %1894 = vmatpush.msra.mxu3 %v4222_v10  ;;  %v1103_v10 = vld [vmem:[%s6671_s0 + $0x128] sm:$0xff] }
  0xee   :  { %v535_v0 = vadd.f32 %v534_v31, %v505_v32  ;;  %2222 = vmatpush.msra.mxu1 %v4164_v3  ;;  %1853 = vmatpush.msra.mxu2 %v4180_v5  ;;  %v910_v36 = vmax.f32 %v886_v15, 0.0  ;;  %v4943_v34 = vld [vmem:[%s6670_s1 + $0x28] sm:$0xff]  ;;  %v912_v32 = vmax.f32 %v888_v56, 0.0  ;;  %v4959_v31 = vld [vmem:[%s6670_s1] sm:$0xff] }
  0xef   :  { %3852 = vmatmul.msk.f32.gmra.mxu0 %vm47_vm1, %v1102_v29  ;;  %v4987_v15 = vld [vmem:[%s6671_s0 + $0xc0] sm:$0xff] }
  0xf0   :  { %3834 = vmatmul.msk.f32.gmra.mxu2 %vm47_vm1, %v4543_v21  ;;  %3843 = vmatmul.msk.f32.gmra.mxu3 %vm47_vm1, %v1102_v29  ;;  %v4774_v9 = vpop.f32.mrf.mxu1  ;;  %6681 = vst [vmem:[#allocation5_spill] sm:$0xff] %v4987_v15 }
  0xf1   :  { %536 = vadd.xlane.f32.xlu1 %v535_v0  ;;  %2182 = vmatpush.msra.mxu0 %v4171_v4  ;;  %v937_v48 = vadd.f32 %v4774_v9, %v4515_v61  ;;  %v911_v0 = vmax.f32 %v887_v18, 0.0  ;;  %v4966_v9 = vld [vmem:[%s6670_s1 + $0x10] sm:$0xff] }
  0xf2   :  { %2223 = vmatpush.msra.mxu1 %v4180_v5  ;;  %6680 = vst [vmem:[#allocation4_spill] sm:$0xff] %v4966_v9 }
  0xf3   :  { %v4778_v1 = vpop.f32.mrf.mxu2  ;;  %v4780_v2 = vpop.f32.mrf.mxu3  ;;  %3861 = vmatmul.msk.f32.gmra.mxu1 %vm47_vm1, %v1102_v29  ;;  %v4953_v29 = vld [vmem:[%s6670_s1 + $0x20] sm:$0xff]  ;;  %v961_v18 = vmax.f32 %v937_v48, 0.0 }
  0xf4   :  { %v4783_v3 = vpop.f32.mrf.mxu0  ;;  %v889_v60 = vadd.f32 %v4778_v1, %v4515_v61 }
  0xf6   :  { %v913_v56 = vmax.f32 %v889_v60, 0.0  ;;  %v1612_v60 = vld [vmem:[%s6671_s0 + $0xf8] sm:$0xff] }
  0xf7   :  { %3853 = vmatmul.msk.f32.gmra.mxu0 %vm47_vm1, %v1103_v10 }
  0xf8   :  { %3835 = vmatmul.msk.f32.gmra.mxu2 %vm47_vm1, %v4591_v14  ;;  %3844 = vmatmul.msk.f32.gmra.mxu3 %vm47_vm1, %v1103_v10  ;;  %v4792_v4 = vpop.f32.mrf.mxu1 }
  0xfb   :  { %v4794_v5 = vpop.f32.mrf.mxu2  ;;  %v4796_v21 = vpop.f32.mrf.mxu3  ;;  %3862 = vmatmul.msk.f32.gmra.mxu1 %vm47_vm1, %v1103_v10 }
  0xfc   :  { %v4799_v33 = vpop.f32.mrf.mxu0 }
  0xff   :  { %3854 = vmatmul.msk.f32.gmra.mxu0 %vm47_vm1, %v1104_v49 }
 0x100   :  { %3836 = vmatmul.msk.f32.gmra.mxu2 %vm47_vm1, %v4615_v6  ;;  %3845 = vmatmul.msk.f32.gmra.mxu3 %vm47_vm1, %v1104_v49  ;;  %v4808_v14 = vpop.f32.mrf.mxu1 }
 0x103   :  { %v4810_v51 = vpop.f32.mrf.mxu2  ;;  %v4812_v35 = vpop.f32.mrf.mxu3  ;;  %3863 = vmatmul.msk.f32.gmra.mxu1 %vm47_vm1, %v1104_v49 }
 0x104   :  { %v4815_v41 = vpop.f32.mrf.mxu0 }
 0x107   :  { %3855 = vmatmul.msk.f32.gmra.mxu0 %vm47_vm1, %v1105_v46 }
 0x108   :  { %3837 = vmatmul.msk.f32.gmra.mxu2 %vm47_vm1, %v4639_v40  ;;  %3846 = vmatmul.msk.f32.gmra.mxu3 %vm47_vm1, %v1105_v46  ;;  %v4824_v6 = vpop.f32.mrf.mxu1 }
 0x10b   :  { %v4826_v52 = vpop.f32.mrf.mxu2  ;;  %v4828_v55 = vpop.f32.mrf.mxu3  ;;  %3864 = vmatmul.msk.f32.gmra.mxu1 %vm47_vm1, %v1105_v46  ;;  %v4973_v46 = vld [vmem:[%s6673_s3 + $0x18] sm:$0xff] }
 0x10c   :  { %v4831_v44 = vpop.f32.mrf.mxu0 }
 0x10f   :  { %3856 = vmatmul.msk.f32.gmra.mxu0 %vm47_vm1, %v1106_v30 }
 0x110   :  { %3838 = vmatmul.msk.f32.gmra.mxu2 %vm47_vm1, %v4663_v23  ;;  %3847 = vmatmul.msk.f32.gmra.mxu3 %vm47_vm1, %v1106_v30  ;;  %v4840_v40 = vpop.f32.mrf.mxu1 }
 0x113   :  { %v4842_v45 = vpop.f32.mrf.mxu2  ;;  %v4844_v59 = vpop.f32.mrf.mxu3  ;;  %3865 = vmatmul.msk.f32.gmra.mxu1 %vm47_vm1, %v1106_v30  ;;  %v4978_v30 = vld [vmem:[%s6673_s3 + $0x20] sm:$0xff] }
 0x114   :  { %v4847_v63 = vpop.f32.mrf.mxu0 }
 0x117   :  { %3857 = vmatmul.msk.f32.gmra.mxu0 %vm47_vm1, %v1107_v28 }
 0x118   :  { %3839 = vmatmul.msk.f32.gmra.mxu2 %vm47_vm1, %v4687_v11  ;;  %3848 = vmatmul.msk.f32.gmra.mxu3 %vm47_vm1, %v1107_v28  ;;  %v4856_v23 = vpop.f32.mrf.mxu1 }
 0x11b   :  { %v4858_v42 = vpop.f32.mrf.mxu2  ;;  %v4860_v43 = vpop.f32.mrf.mxu3  ;;  %3866 = vmatmul.msk.f32.gmra.mxu1 %vm47_vm1, %v1107_v28 }
 0x11c   :  { %v4863_v7 = vpop.f32.mrf.mxu0 }
 0x11f   :  { %3858 = vmatmul.msk.f32.gmra.mxu0 %vm47_vm1, %v1108_v39 }
 0x120   :  { %3840 = vmatmul.msk.f32.gmra.mxu2 %vm47_vm1, %v4711_v47  ;;  %3849 = vmatmul.msk.f32.gmra.mxu3 %vm47_vm1, %v1108_v39  ;;  %v4872_v11 = vpop.f32.mrf.mxu1  ;;  %v934_v47 = vadd.f32 %v4741_v26, %v4515_v61 }
 0x122   :  { %v958_v37 = vmax.f32 %v934_v47, 0.0  ;;  %v891_v47 = vadd.f32 %v4758_v8, %v4517_v62 }
 0x123   :  { %v4874_v57 = vpop.f32.mrf.mxu2  ;;  %v4876_v12 = vpop.f32.mrf.mxu3  ;;  %3867 = vmatmul.msk.f32.gmra.mxu1 %vm47_vm1, %v1108_v39 }
 0x124   :  { %v4879_v13 = vpop.f32.mrf.mxu0  ;;  %v982_v10 = vmax.f32 %v910_v36, %v958_v37  ;;  %v890_v36 = vadd.f32 %v4780_v2, %v4508_v58  ;;  %v4996_v37 = vld [vmem:[%s6673_s3 + $0x28] sm:$0xff] }
 0x126   :  { %v1009_v8 = vmul.f32 %v4973_v46, %v982_v10  ;;  %v915_v10 = vmax.f32 %v891_v47, 0.0  ;;  %v893_v47 = vadd.f32 %v4796_v21, %v4508_v58  ;;  %v1613_v21 = vld [vmem:[%s6671_s0 + $0x168] sm:$0xff] }
 0x127   :  { %3887 = vmatmul.msk.f32.vlgmr.msrb.gmra.mxu0 %vm47_vm1, %v1610_v38 }
 0x128   :  { %3869 = vmatmul.msk.f32.vlgmr.msrb.gmra.mxu2 %vm47_vm1, %v1610_v38  ;;  %3878 = vmatmul.msk.f32.vlgmr.msrb.gmra.mxu3 %vm47_vm1, %v1610_v38  ;;  %v4891_v16 = vpop.f32.mrf.mxu1 }
 0x129   :  { %3949 = vmatpush.msk.msrb.mxu3 %vm72_vm0, %v4903_v17  ;;  %3940 = vmatpush.msk.msrb.mxu2 %vm72_vm0, %v4910_v19 }
 0x12a   :  { %3958 = vmatpush.msk.msrb.mxu0 %vm72_vm0, %v4919_v20 }
 0x12b   :  { %v821_v22 = vpop.f32.mrf.mxu2  ;;  %v862_v53 = vpop.f32.mrf.mxu3  ;;  %3896 = vmatmul.msk.f32.vlgmr.msrb.gmra.mxu1 %vm47_vm1, %v4896_v54  ;;  %2328 = vmatpush.msrb.mxu3 %v4928_v24 }
 0x12c   :  { %v935_v50 = vadd.f32 %v821_v22, %v4508_v58  ;;  %v936_v25 = vadd.f32 %v862_v53, %v4517_v62  ;;  %v4933_v26 = vpop.f32.mrf.mxu0  ;;  %3967 = vmatpush.msk.msrb.mxu1 %vm72_vm0, %v4910_v19  ;;  %2263 = vmatpush.msrb.mxu2 %v4943_v34  ;;  %v5001_v22 = vld [vmem:[%s6670_s1 + $0x8] sm:$0xff] }
 0x12d   :  { %6679 = vst [vmem:[#allocation3_spill] sm:$0xff] %v4933_v26  ;;  %2369 = vmatpush.msrb.mxu0 %v4953_v29  ;;  %2329 = vmatpush.msrb.mxu3 %v4959_v31 }
 0x12e   :  { %v959_v1 = vmax.f32 %v935_v50, 0.0  ;;  %v960_v49 = vmax.f32 %v936_v25, 0.0  ;;  %2410 = vmatpush.msrb.mxu1 %v4943_v34  ;;  %2264 = vmatpush.msrb.mxu2 %v4966_v9 }
 0x12f   :  { %3888 = vmatmul.msk.f32.gmra.mxu0 %vm47_vm1, %v1611_v27 }
 0x130   :  { %v983_v28 = vmax.f32 %v911_v0, %v959_v1  ;;  %v984_v39 = vmax.f32 %v912_v32, %v960_v49  ;;  %3870 = vmatmul.msk.f32.gmra.mxu2 %vm47_vm1, %v1611_v27  ;;  %3879 = vmatmul.msk.f32.gmra.mxu3 %vm47_vm1, %v1611_v27  ;;  %v4982_v38 = vpop.f32.mrf.mxu1  ;;  %v914_v1 = vmax.f32 %v890_v36, 0.0  ;;  %v985_v49 = vmax.f32 %v913_v56, %v961_v18 }
 0x131   :  { %2370 = vmatpush.msrb.mxu0 %v5001_v22  ;;  %2411 = vmatpush.msrb.mxu1 %v4966_v9 }
 0x132   :  { %v1010_v53 = vmul.f32 %v4978_v30, %v983_v28  ;;  %v1011_v48 = vmul.f32 %v4996_v37, %v984_v39  ;;  %v940_v28 = vadd.f32 %v4792_v4, %v4515_v61  ;;  %v5029_v4 = vld [vmem:[%s6671_s0 + $0x130] sm:$0xff]  ;;  %v1012_v36 = vmul.f32 %v4973_v46, %v985_v49 }
 0x133   :  { %v824_v2 = vpop.f32.mrf.mxu2  ;;  %v865_v50 = vpop.f32.mrf.mxu3  ;;  %3897 = vmatmul.msk.f32.gmra.mxu1 %vm47_vm1, %v4987_v15 }
 0x134   :  { %v938_v25 = vadd.f32 %v824_v2, %v4508_v58  ;;  %v939_v27 = vadd.f32 %v865_v50, %v4517_v62  ;;  %v5011_v32 = vpop.f32.mrf.mxu0  ;;  %v1033_v0 = vadd.f32 %v1010_v53, %v1009_v8  ;;  %v892_v2 = vadd.f32 %v4794_v5, %v4515_v61 }
 0x135   :  { %6682 = vst [vmem:[#allocation6_spill] sm:$0xff] %v5011_v32  ;;  %v894_v5 = vadd.f32 %v4783_v3, %v4517_v62  ;;  %v964_v56 = vmax.f32 %v940_v28, 0.0 }
 0x136   :  { %v962_v9 = vmax.f32 %v938_v25, 0.0  ;;  %v963_v50 = vmax.f32 %v939_v27, 0.0  ;;  %v1034_v26 = vadd.f32 %v1033_v0, %v1011_v48  ;;  %v895_v0 = vadd.f32 %v4810_v51, %v4515_v61  ;;  %v5059_v51 = vld [vmem:[%s6671_s0 + $0x1a0] sm:$0xff] }
 0x137   :  { %3889 = vmatmul.msk.f32.gmra.mxu0 %vm47_vm1, %v1612_v60  ;;  %v918_v48 = vmax.f32 %v894_v5, 0.0 }
 0x138   :  { %v986_v32 = vmax.f32 %v914_v1, %v962_v9  ;;  %v987_v15 = vmax.f32 %v915_v10, %v963_v50  ;;  %3871 = vmatmul.msk.f32.gmra.mxu2 %vm47_vm1, %v1612_v60  ;;  %3880 = vmatmul.msk.f32.gmra.mxu3 %vm47_vm1, %v1612_v60  ;;  %v5024_v39 = vpop.f32.mrf.mxu1  ;;  %v916_v9 = vmax.f32 %v892_v2, 0.0  ;;  %v943_v10 = vadd.f32 %v4808_v14, %v4515_v61 }
 0x139   :  { %1035 = vadd.xlane.f32.xlu0 %v1034_v26  ;;  %v897_v14 = vadd.f32 %v4799_v33, %v4517_v62  ;;  %v919_v5 = vmax.f32 %v895_v0, 0.0  ;;  %v946_v0 = vadd.f32 %v4824_v6, %v4515_v61  ;;  %v5089_v6 = vld [vmem:[%s6671_s0 + $0x210] sm:$0xff] }
 0x13a   :  { %v1013_v18 = vmul.f32 %v4978_v30, %v986_v32  ;;  %v1014_v26 = vmul.f32 %v4996_v37, %v987_v15  ;;  %v917_v32 = vmax.f32 %v893_v47, 0.0  ;;  %v988_v1 = vmax.f32 %v916_v9, %v964_v56 }
 0x13b   :  { %v827_v8 = vpop.f32.mrf.mxu2  ;;  %v868_v53 = vpop.f32.mrf.mxu3  ;;  %3898 = vmatmul.msk.f32.gmra.mxu1 %vm47_vm1, %v5029_v4  ;;  %v896_v47 = vadd.f32 %v4812_v35, %v4508_v58  ;;  %v967_v9 = vmax.f32 %v943_v10, 0.0  ;;  %v1614_v35 = vld [vmem:[%s6671_s0 + $0x1d8] sm:$0xff]  ;;  %v898_v10 = vadd.f32 %v4826_v52, %v4515_v61  ;;  %v900_v52 = vadd.f32 %v4815_v41, %v4517_v62 }
 0x13c   :  { %v941_v25 = vadd.f32 %v827_v8, %v4508_v58  ;;  %v942_v27 = vadd.f32 %v868_v53, %v4517_v62  ;;  %v5041_v3 = vpop.f32.mrf.mxu0  ;;  %v1037_v60 = vadd.f32 %v1013_v18, %v1012_v36  ;;  %v1015_v56 = vmul.f32 %v4973_v46, %v988_v1 }
 0x13e   :  { %v965_v49 = vmax.f32 %v941_v25, 0.0  ;;  %v966_v28 = vmax.f32 %v942_v27, 0.0  ;;  %v1038_v2 = vadd.f32 %v1037_v60, %v1014_v26  ;;  %v921_v60 = vmax.f32 %v897_v14, 0.0 }
 0x13f   :  { %3890 = vmatmul.msk.f32.gmra.mxu0 %vm47_vm1, %v1613_v21  ;;  %v899_v14 = vadd.f32 %v4828_v55, %v4508_v58  ;;  %v1615_v55 = vld [vmem:[%s6671_s0 + $0x248] sm:$0xff] }
 0x140   :  { %v989_v50 = vmax.f32 %v917_v32, %v965_v49  ;;  %v990_v8 = vmax.f32 %v918_v48, %v966_v28  ;;  %3872 = vmatmul.msk.f32.gmra.mxu2 %vm47_vm1, %v1613_v21  ;;  %3881 = vmatmul.msk.f32.gmra.mxu3 %vm47_vm1, %v1613_v21  ;;  %v5054_v15 = vpop.f32.mrf.mxu1  ;;  %v920_v48 = vmax.f32 %v896_v47, 0.0  ;;  %v991_v32 = vmax.f32 %v919_v5, %v967_v9 }
 0x141   :  { %1039 = vadd.xlane.f32.xlu1 %v1038_v2  ;;  %v922_v5 = vmax.f32 %v898_v10, 0.0  ;;  %v970_v47 = vmax.f32 %v946_v0, 0.0 }
 0x142   :  { %v1016_v36 = vmul.f32 %v4978_v30, %v989_v50  ;;  %v1017_v21 = vmul.f32 %v4996_v37, %v990_v8  ;;  %v1018_v9 = vmul.f32 %v4973_v46, %v991_v32  ;;  %v5111_v32 = vpop.xlane.xlu0 %508 }
 0x143   :  { %v830_v18 = vpop.f32.mrf.mxu2  ;;  %v871_v53 = vpop.f32.mrf.mxu3  ;;  %3899 = vmatmul.msk.f32.gmra.mxu1 %vm47_vm1, %v5059_v51  ;;  %v994_v0 = vmax.f32 %v922_v5, %v970_v47 }
 0x144   :  { %v944_v25 = vadd.f32 %v830_v18, %v4508_v58  ;;  %v945_v27 = vadd.f32 %v871_v53, %v4517_v62  ;;  %v5071_v33 = vpop.f32.mrf.mxu0  ;;  %v1041_v26 = vadd.f32 %v1016_v36, %v1015_v56 }
 0x145   :  { %v1021_v47 = vmul.f32 %v4973_v46, %v994_v0  ;;  %v904_v0 = vadd.f32 %v4858_v42, %v4515_v61 }
 0x146   :  { %v968_v1 = vmax.f32 %v944_v25, 0.0  ;;  %v969_v49 = vmax.f32 %v945_v27, 0.0  ;;  %v1042_v28 = vadd.f32 %v1041_v26, %v1017_v21  ;;  %v924_v21 = vmax.f32 %v900_v52, 0.0 }
 0x147   :  { %3891 = vmatmul.msk.f32.gmra.mxu0 %vm47_vm1, %v1614_v35  ;;  %v923_v26 = vmax.f32 %v899_v14, 0.0 }
 0x148   :  { %v992_v2 = vmax.f32 %v920_v48, %v968_v1  ;;  %v993_v50 = vmax.f32 %v921_v60, %v969_v49  ;;  %3873 = vmatmul.msk.f32.gmra.mxu2 %vm47_vm1, %v1614_v35  ;;  %3882 = vmatmul.msk.f32.gmra.mxu3 %vm47_vm1, %v1614_v35  ;;  %v5084_v8 = vpop.f32.mrf.mxu1  ;;  %v901_v60 = vadd.f32 %v4842_v45, %v4515_v61  ;;  %v5125_v45 = vld [vmem:[%s6671_s0 + $0x280] sm:$0xff] }
 0x149   :  { %1043 = vadd.xlane.f32.xlu2 %v1042_v28  ;;  %v949_v48 = vadd.f32 %v4840_v40, %v4515_v61  ;;  %v903_v28 = vadd.f32 %v4831_v44, %v4517_v62  ;;  %v902_v44 = vadd.f32 %v4844_v59, %v4508_v58 }
 0x14a   :  { %v1019_v56 = vmul.f32 %v4978_v30, %v992_v2  ;;  %v1020_v27 = vmul.f32 %v4996_v37, %v993_v50  ;;  %v5116_v2 = vpop.xlane.xlu1 %516  ;;  %v925_v14 = vmax.f32 %v901_v60, 0.0 }
 0x14b   :  { %v833_v36 = vpop.f32.mrf.mxu2  ;;  %v874_v18 = vpop.f32.mrf.mxu3  ;;  %3900 = vmatmul.msk.f32.gmra.mxu1 %vm47_vm1, %v5089_v6  ;;  %v973_v5 = vmax.f32 %v949_v48, 0.0  ;;  %v926_v60 = vmax.f32 %v902_v44, 0.0 }
 0x14c   :  { %v947_v53 = vadd.f32 %v833_v36, %v4508_v58  ;;  %v948_v25 = vadd.f32 %v874_v18, %v4517_v62  ;;  %v5101_v41 = vpop.f32.mrf.mxu0  ;;  %v1045_v35 = vadd.f32 %v1019_v56, %v1018_v9  ;;  %v927_v56 = vmax.f32 %v903_v28, 0.0 }
 0x14d   :  { %v5133_v36 = vadd.f32 %v4847_v63, %v4517_v62  ;;  %v546_v18 = vlaneseq  ;;  %v997_v48 = vmax.f32 %v925_v14, %v973_v5  ;;  %v928_v5 = vmax.f32 %v904_v0, 0.0 }
 0x14e   :  { %v971_v10 = vmax.f32 %v947_v53, 0.0  ;;  %v972_v1 = vmax.f32 %v948_v25, 0.0  ;;  %v1046_v49 = vadd.f32 %v1045_v35, %v1020_v27 }
 0x14f   :  { %3892 = vmatmul.msk.f32.gmra.mxu0 %vm47_vm1, %v1615_v55  ;;  %v5158_v14 = vand.u32 127, %v546_v18  ;;  %v1024_v18 = vmul.f32 %v4973_v46, %v997_v48 }
 0x150   :  { %v995_v50 = vmax.f32 %v923_v26, %v971_v10  ;;  %v996_v52 = vmax.f32 %v924_v21, %v972_v1  ;;  %3874 = vmatmul.msk.f32.gmra.mxu2 %vm47_vm1, %v1615_v55  ;;  %3883 = vmatmul.msk.f32.gmra.mxu3 %vm47_vm1, %v1615_v55  ;;  %v5120_v40 = vpop.f32.mrf.mxu1  ;;  %v5137_v55 = vpop.xlane.xlu2 %524  ;;  %v1616_v21 = vld [vmem:[%s6671_s0 + $0x2b8] sm:$0xff]  ;;  %v952_v10 = vadd.f32 %v4856_v23, %v4515_v61 }
 0x151   :  { %1047 = vadd.xlane.f32.xlu0 %v1046_v49  ;;  %v905_v1 = vadd.f32 %v4860_v43, %v4508_v58  ;;  %v5167_v43 = vld [vmem:[%s6671_s0 + $0x2f0] sm:$0xff] }
 0x152   :  { %v1022_v9 = vmul.f32 %v4978_v30, %v995_v50  ;;  %v1023_v63 = vmul.f32 %v4996_v37, %v996_v52  ;;  %v513_v52 = vpop.xlane.xlu0 %512 }
 0x153   :  { %v836_v53 = vpop.f32.mrf.mxu2  ;;  %v877_v25 = vpop.f32.mrf.mxu3  ;;  %3901 = vmatmul.msk.f32.gmra.mxu1 %vm47_vm1, %v5125_v45 }
 0x154   :  { %v950_v59 = vadd.f32 %v836_v53, %v4508_v58  ;;  %v951_v27 = vadd.f32 %v877_v25, %v4517_v62  ;;  %v5141_v35 = vpop.f32.mrf.mxu0  ;;  %v1049_v26 = vadd.f32 %v1022_v9, %v1021_v47  ;;  %v5155_v53 = vadd.f32 %v4863_v7, %v4517_v62 }
 0x155   :  { %6683 = vst [vmem:[#allocation7_spill] sm:$0xff] %v5141_v35  ;;  %v930_v7 = vmax.f32 %v5133_v36, 0.0  ;;  %v976_v47 = vmax.f32 %v952_v10, 0.0  ;;  %v929_v9 = vmax.f32 %v905_v1, 0.0  ;;  %v549_v36 = vperm.slane %v513_v52, %v5158_v14 }
 0x156   :  { %v974_v49 = vmax.f32 %v950_v59, 0.0  ;;  %v975_v28 = vmax.f32 %v951_v27, 0.0  ;;  %v1050_v50 = vadd.f32 %v1049_v26, %v1023_v63  ;;  %v907_v27 = vadd.f32 %v4874_v57, %v4515_v61  ;;  %v1617_v57 = vld [vmem:[%s6671_s0 + $0x328] sm:$0xff] }
 0x157   :  { %3893 = vmatmul.msk.f32.gmra.mxu0 %vm47_vm1, %v1616_v21  ;;  %v1000_v1 = vmax.f32 %v928_v5, %v976_v47 }
 0x158   :  { %v998_v44 = vmax.f32 %v926_v60, %v974_v49  ;;  %v999_v42 = vmax.f32 %v927_v56, %v975_v28  ;;  %3875 = vmatmul.msk.f32.gmra.mxu2 %vm47_vm1, %v1616_v21  ;;  %3884 = vmatmul.msk.f32.gmra.mxu3 %vm47_vm1, %v1616_v21  ;;  %v5162_v23 = vpop.f32.mrf.mxu1  ;;  %v521_v56 = vpop.xlane.xlu1 %520  ;;  %v955_v21 = vadd.f32 %v4872_v11, %v4515_v61 }
 0x159   :  { %1051 = vadd.xlane.f32.xlu1 %v1050_v50  ;;  %v908_v49 = vadd.f32 %v4876_v12, %v4508_v58  ;;  %v548_v28 = vperm.slane %v5111_v32, %v5158_v14  ;;  %v550_v50 = vperm.slane %v5116_v2, %v5158_v14  ;;  %v551_v52 = vperm.slane %v521_v56, %v5158_v14  ;;  %v5206_v56 = vld [vmem:[%s6671_s0 + $0x360] sm:$0xff] }
 0x15a   :  { %v1025_v25 = vmul.f32 %v4978_v30, %v998_v44  ;;  %v1026_v10 = vmul.f32 %v4996_v37, %v999_v42  ;;  %v529_v44 = vpop.xlane.xlu2 %528  ;;  %v979_v35 = vmax.f32 %v955_v21, 0.0  ;;  %v552_v42 = vperm.slane %v5137_v55, %v5158_v14 }
 0x15b   :  { %v839_v63 = vpop.f32.mrf.mxu2  ;;  %v880_v26 = vpop.f32.mrf.mxu3  ;;  %3902 = vmatmul.msk.f32.gmra.mxu1 %vm47_vm1, %v5167_v43  ;;  %v557_v12 = vsel %vm556_vm2, %v549_v36, %v548_v28  ;;  %v932_v55 = vmax.f32 %v908_v49, 0.0 }
 0x15c   :  { %v953_v60 = vadd.f32 %v839_v63, %v4508_v58  ;;  %v954_v48 = vadd.f32 %v880_v26, %v4517_v62  ;;  %v5182_v0 = vpop.f32.mrf.mxu0  ;;  %v1053_v11 = vadd.f32 %v1025_v25, %v1024_v18  ;;  %v533_v5 = vpop.xlane.xlu0 %532  ;;  %v559_v18 = vsel %vm558_vm3, %v550_v50, %v557_v12 }
 0x15d   :  { %6684 = vst [vmem:[#allocation8_spill] sm:$0xff] %v5182_v0  ;;  %v931_v0 = vmax.f32 %v907_v27, 0.0  ;;  %v553_v25 = vperm.slane %v529_v44, %v5158_v14  ;;  %v554_v27 = vperm.slane %v533_v5, %v5158_v14  ;;  %v1404_v5 = vadd.f32 %v4891_v16, %v4508_v58 }
 0x15e   :  { %v977_v63 = vmax.f32 %v953_v60, 0.0  ;;  %v978_v26 = vmax.f32 %v954_v48, 0.0  ;;  %v1054_v59 = vadd.f32 %v1053_v11, %v1026_v10  ;;  %v1403_v16 = vadd.f32 %v4879_v13, %v4515_v61 }
 0x15f   :  { %3894 = vmatmul.msk.f32.gmra.mxu0 %vm47_vm1, %v1617_v57  ;;  %v1003_v36 = vmax.f32 %v931_v0, %v979_v35  ;;  %v5223_v35 = vld [vmem:[%s6671_s0 + $0x20] sm:$0xff] }
 0x160   :  { %v1001_v32 = vmax.f32 %v929_v9, %v977_v63  ;;  %v1002_v2 = vmax.f32 %v930_v7, %v978_v26  ;;  %3876 = vmatmul.msk.f32.gmra.mxu2 %vm47_vm1, %v1617_v57  ;;  %3885 = vmatmul.msk.f32.gmra.mxu3 %vm47_vm1, %v1617_v57  ;;  %v5201_v47 = vpop.f32.mrf.mxu1  ;;  %v1027_v9 = vmul.f32 %v4973_v46, %v1000_v1 }
 0x161   :  { %1055 = vadd.xlane.f32.xlu2 %v1054_v59  ;;  %v561_v7 = vsel %vm560_vm4, %v551_v52, %v559_v18 }
 0x162   :  { %v1028_v21 = vmul.f32 %v4978_v30, %v1001_v32  ;;  %v563_v60 = vsel %vm562_vm5, %v552_v42, %v561_v7  ;;  %v1029_v49 = vmul.f32 %v4996_v37, %v1002_v2  ;;  %v6685_v2 = vmax.f32 %v5155_v53, 0.0 }
 0x163   :  { %v842_v48 = vpop.f32.mrf.mxu2  ;;  %v883_v57 = vpop.f32.mrf.mxu3  ;;  %3903 = vmatmul.msk.f32.gmra.mxu1 %vm47_vm1, %v5206_v56  ;;  %v565_v0 = vsel %vm564_vm6, %v553_v25, %v563_v60  ;;  %v1030_v53 = vmul.f32 %v4973_v46, %v1003_v36 }
 0x164   :  { %v956_v59 = vadd.f32 %v842_v48, %v4508_v58  ;;  %v957_v10 = vadd.f32 %v883_v57, %v4517_v62  ;;  %v537_v11 = vpop.xlane.xlu1 %536  ;;  %v1338_v1 = vpop.f32.mrf.mxu0  ;;  %v1057_v28 = vadd.f32 %v1028_v21, %v1027_v9  ;;  %v567_v42 = vsel %vm566_vm7, %v554_v27, %v565_v0  ;;  %v5260_v48 = vld [vmem:[%s6671_s0 + $0x90] sm:$0xff]  ;;  %v6687_v0 = vld [vmem:[#allocation3_spill] sm:$0xff] }
 0x165   :  { %v555_v50 = vperm.slane %v537_v11, %v5158_v14  ;;  %v1452_v52 = vadd.f32 %v1338_v1, %v4508_v58 }
 0x166   :  { %v980_v44 = vmax.f32 %v956_v59, 0.0  ;;  %v981_v63 = vmax.f32 %v957_v10, 0.0  ;;  %v1058_v26 = vadd.f32 %v1057_v28, %v1029_v49  ;;  %v6686_v49 = vld [vmem:[#allocation5_spill] sm:$0xff] }
 0x167   :  { %3923 = vmatmul.msk.f32.vlgmr.msra.gmra.mxu0 %vm47_vm1, %v5223_v35  ;;  %v569_v12 = vsel %vm568_vm8, %v555_v50, %v567_v42  ;;  %v1476_v7 = vmax.f32 %v1452_v52, 0.0  ;;  %v1406_v50 = vadd.f32 %v6687_v0, %v4515_v61 }
 0x168   :  { %v1004_v32 = vmax.f32 %v932_v55, %v980_v44  ;;  %v1005_v18 = vmax.f32 %v6685_v2, %v981_v63  ;;  %3905 = vmatmul.msk.f32.vlgmr.msra.gmra.mxu2 %vm47_vm1, %v4896_v54  ;;  %3914 = vmatmul.msk.f32.vlgmr.msra.gmra.mxu3 %vm47_vm1, %v4896_v54  ;;  %v572_v25 = vsel %vm571_vm9, %v569_v12, 0.0  ;;  %v1379_v9 = vpop.f32.mrf.mxu1  ;;  %v1428_v54 = vmax.f32 %v1404_v5, 0.0  ;;  %v6688_v44 = vld [vmem:[#allocation4_spill] sm:$0xff] }
 0x169   :  { %1059 = vadd.xlane.f32.xlu0 %v1058_v26  ;;  %573 = vadd.xlane.f32.xlu2 %v572_v25  ;;  %v1453_v55 = vadd.f32 %v1379_v9, %v4517_v62 }
 0x16a   :  { %v1031_v27 = vmul.f32 %v4978_v30, %v1004_v32  ;;  %3985 = vmatpush.msk.msra.mxu3 %vm72_vm0, %v4919_v20  ;;  %3976 = vmatpush.msk.msra.mxu2 %vm72_vm0, %v4903_v17  ;;  %v1032_v13 = vmul.f32 %v4996_v37, %v1005_v18  ;;  %v1427_v37 = vmax.f32 %v1403_v16, 0.0  ;;  %v1500_v59 = vmax.f32 %v1428_v54, %v1476_v7  ;;  %v5309_v7 = vld [vmem:[%s6671_s0 + $0x100] sm:$0xff] }
 0x16b   :  { %v1232_v21 = vpop.f32.mrf.mxu2  ;;  %v1297_v60 = vpop.f32.mrf.mxu3  ;;  %3932 = vmatmul.msk.f32.vlgmr.msra.gmra.mxu1 %vm47_vm1, %v5223_v35  ;;  %3994 = vmatpush.msk.msra.mxu0 %vm72_vm0, %v4910_v19  ;;  %v1477_v20 = vmax.f32 %v1453_v55, 0.0 }
 0x16c   :  { %v1405_v46 = vadd.f32 %v1232_v21, %v4517_v62  ;;  %v1451_v30 = vadd.f32 %v1297_v60, %v4515_v61  ;;  %v1341_v36 = vpop.f32.mrf.mxu0  ;;  %v1061_v57 = vadd.f32 %v1031_v27, %v1030_v53  ;;  %4003 = vmatpush.msk.msra.mxu1 %vm72_vm0, %v4903_v17  ;;  %2739 = vmatpush.msra.mxu3 %v4953_v29  ;;  %v5277_v29 = vld [vmem:[%s6673_s3 + $0x30] sm:$0xff]  ;;  %v1430_v53 = vmax.f32 %v1406_v50, 0.0 }
 0x16d   :  { %2698 = vmatpush.msra.mxu2 %v4928_v24  ;;  %2780 = vmatpush.msra.mxu0 %v4943_v34  ;;  %v1455_v11 = vadd.f32 %v1341_v36, %v4508_v58  ;;  %v1407_v17 = vadd.f32 %v4982_v38, %v4508_v58  ;;  %v5282_v34 = vld [vmem:[%s6673_s3 + $0x38] sm:$0xff] }
 0x16e   :  { %v1429_v19 = vmax.f32 %v1405_v46, 0.0  ;;  %v1475_v10 = vmax.f32 %v1451_v30, 0.0  ;;  %v1062_v1 = vadd.f32 %v1061_v57, %v1032_v13  ;;  %2845 = vmatpush.msra.mxu1 %v4928_v24  ;;  %2740 = vmatpush.msra.mxu3 %v5001_v22  ;;  %v5287_v24 = vld [vmem:[%s6673_s3 + $0x40] sm:$0xff]  ;;  %v1527_v42 = vmul.f32 %v5282_v34, %v1500_v59 }
 0x16f   :  { %3924 = vmatmul.msk.f32.gmra.mxu0 %vm47_vm1, %v5260_v48  ;;  %2699 = vmatpush.msra.mxu2 %v4959_v31  ;;  %v1479_v63 = vmax.f32 %v1455_v11, 0.0  ;;  %v1431_v12 = vmax.f32 %v1407_v17, 0.0  ;;  %v1410_v13 = vadd.f32 %v5024_v39, %v4508_v58 }
 0x170   :  { %v1499_v38 = vmax.f32 %v1427_v37, %v1475_v10  ;;  %v1501_v22 = vmax.f32 %v1429_v19, %v1477_v20  ;;  %3906 = vmatmul.msk.f32.gmra.mxu2 %vm47_vm1, %v6686_v49  ;;  %3915 = vmatmul.msk.f32.gmra.mxu3 %vm47_vm1, %v6686_v49  ;;  %v1382_v28 = vpop.f32.mrf.mxu1  ;;  %v6689_v20 = vld [vmem:[#allocation6_spill] sm:$0xff] }
 0x171   :  { %1063 = vadd.xlane.f32.xlu1 %v1062_v1  ;;  %v1456_v52 = vadd.f32 %v1382_v28, %v4517_v62  ;;  %2781 = vmatpush.msra.mxu0 %v6688_v44  ;;  %v1503_v27 = vmax.f32 %v1431_v12, %v1479_v63  ;;  %v1409_v57 = vadd.f32 %v6689_v20, %v4515_v61  ;;  %v1434_v11 = vmax.f32 %v1410_v13, 0.0  ;;  %v5333_v28 = vld [vmem:[%s6671_s0 + $0x170] sm:$0xff] }
 0x172   :  { %v1526_v26 = vmul.f32 %v5277_v29, %v1499_v38  ;;  %v1528_v5 = vmul.f32 %v5287_v24, %v1501_v22  ;;  %2846 = vmatpush.msra.mxu1 %v4959_v31 }
 0x173   :  { %v1235_v32 = vpop.f32.mrf.mxu2  ;;  %v1300_v2 = vpop.f32.mrf.mxu3  ;;  %3933 = vmatmul.msk.f32.gmra.mxu1 %vm47_vm1, %v5260_v48  ;;  %v1480_v16 = vmax.f32 %v1456_v52, 0.0  ;;  %v1530_v19 = vmul.f32 %v5282_v34, %v1503_v27  ;;  %v1433_v50 = vmax.f32 %v1409_v57, 0.0 }
 0x174   :  { %v1408_v18 = vadd.f32 %v1235_v32, %v4517_v62  ;;  %v1454_v25 = vadd.f32 %v1300_v2, %v4515_v61  ;;  %v1344_v9 = vpop.f32.mrf.mxu0  ;;  %v1550_v55 = vadd.f32 %v1527_v42, %v1526_v26 }
 0x175   :  { %v1458_v31 = vadd.f32 %v1344_v9, %v4508_v58 }
 0x176   :  { %v1432_v54 = vmax.f32 %v1408_v18, 0.0  ;;  %v1478_v21 = vmax.f32 %v1454_v25, 0.0  ;;  %v1551_v60 = vadd.f32 %v1550_v55, %v1528_v5  ;;  %v1413_v5 = vadd.f32 %v5054_v15, %v4508_v58 }
 0x177   :  { %3925 = vmatmul.msk.f32.gmra.mxu0 %vm47_vm1, %v5309_v7  ;;  %v1482_v37 = vmax.f32 %v1458_v31, 0.0  ;;  %v1412_v18 = vadd.f32 %v5041_v3, %v4515_v61 }
 0x178   :  { %v1502_v46 = vmax.f32 %v1430_v53, %v1478_v21  ;;  %v1504_v30 = vmax.f32 %v1432_v54, %v1480_v16  ;;  %3907 = vmatmul.msk.f32.gmra.mxu2 %vm47_vm1, %v5029_v4  ;;  %3916 = vmatmul.msk.f32.gmra.mxu3 %vm47_vm1, %v5029_v4  ;;  %v1385_v36 = vpop.f32.mrf.mxu1  ;;  %v1437_v53 = vmax.f32 %v1413_v5, 0.0 }
 0x179   :  { %1552 = vadd.xlane.f32.xlu0 %v1551_v60  ;;  %v1459_v59 = vadd.f32 %v1385_v36, %v4517_v62  ;;  %v1506_v52 = vmax.f32 %v1434_v11, %v1482_v37  ;;  %v5357_v60 = vld [vmem:[%s6671_s0 + $0x1e0] sm:$0xff]  ;;  %v1415_v11 = vadd.f32 %v5071_v33, %v4515_v61 }
 0x17a   :  { %v1529_v39 = vmul.f32 %v5277_v29, %v1502_v46  ;;  %v1531_v10 = vmul.f32 %v5287_v24, %v1504_v30  ;;  %v1436_v46 = vmax.f32 %v1412_v18, 0.0  ;;  %v1419_v18 = vadd.f32 %v5120_v40, %v4508_v58 }
 0x17b   :  { %v1238_v1 = vpop.f32.mrf.mxu2  ;;  %v1303_v17 = vpop.f32.mrf.mxu3  ;;  %3934 = vmatmul.msk.f32.gmra.mxu1 %vm47_vm1, %v5309_v7  ;;  %v1483_v49 = vmax.f32 %v1459_v59, 0.0  ;;  %v1533_v16 = vmul.f32 %v5282_v34, %v1506_v52  ;;  %v1416_v59 = vadd.f32 %v5084_v8, %v4508_v58 }
 0x17c   :  { %v1411_v4 = vadd.f32 %v1238_v1, %v4517_v62  ;;  %v1457_v38 = vadd.f32 %v1303_v17, %v4515_v61  ;;  %v1347_v22 = vpop.f32.mrf.mxu0  ;;  %v1554_v0 = vadd.f32 %v1530_v19, %v1529_v39 }
 0x17d   :  { %v1461_v26 = vadd.f32 %v1347_v22, %v4508_v58  ;;  %v1440_v22 = vmax.f32 %v1416_v59, 0.0 }
 0x17e   :  { %v1435_v44 = vmax.f32 %v1411_v4, 0.0  ;;  %v1481_v63 = vmax.f32 %v1457_v38, 0.0  ;;  %v1555_v42 = vadd.f32 %v1554_v0, %v1531_v10 }
 0x17f   :  { %3926 = vmatmul.msk.f32.gmra.mxu0 %vm47_vm1, %v5333_v28  ;;  %v1485_v9 = vmax.f32 %v1461_v26, 0.0  ;;  %v1439_v26 = vmax.f32 %v1415_v11, 0.0 }
 0x180   :  { %v1505_v12 = vmax.f32 %v1433_v50, %v1481_v63  ;;  %v1507_v32 = vmax.f32 %v1435_v44, %v1483_v49  ;;  %3908 = vmatmul.msk.f32.gmra.mxu2 %vm47_vm1, %v5059_v51  ;;  %3917 = vmatmul.msk.f32.gmra.mxu3 %vm47_vm1, %v5059_v51  ;;  %v1388_v2 = vpop.f32.mrf.mxu1  ;;  %v5381_v44 = vld [vmem:[%s6671_s0 + $0x250] sm:$0xff] }
 0x181   :  { %1556 = vadd.xlane.f32.xlu1 %v1555_v42  ;;  %v1462_v25 = vadd.f32 %v1388_v2, %v4517_v62  ;;  %v1509_v36 = vmax.f32 %v1437_v53, %v1485_v9 }
 0x182   :  { %v1532_v15 = vmul.f32 %v5277_v29, %v1505_v12  ;;  %v1534_v55 = vmul.f32 %v5287_v24, %v1507_v32 }
 0x183   :  { %v1241_v31 = vpop.f32.mrf.mxu2  ;;  %v1306_v27 = vpop.f32.mrf.mxu3  ;;  %3935 = vmatmul.msk.f32.gmra.mxu1 %vm47_vm1, %v5333_v28  ;;  %v1486_v21 = vmax.f32 %v1462_v25, 0.0  ;;  %v1536_v4 = vmul.f32 %v5282_v34, %v1509_v36 }
 0x184   :  { %v1414_v51 = vadd.f32 %v1241_v31, %v4517_v62  ;;  %v1460_v3 = vadd.f32 %v1306_v27, %v4515_v61  ;;  %v1350_v54 = vpop.f32.mrf.mxu0  ;;  %v1558_v13 = vadd.f32 %v1533_v16, %v1532_v15  ;;  %v1418_v16 = vadd.f32 %v5101_v41, %v4515_v61 }
 0x185   :  { %v1464_v30 = vadd.f32 %v1350_v54, %v4508_v58 }
 0x186   :  { %v1438_v20 = vmax.f32 %v1414_v51, 0.0  ;;  %v1484_v57 = vmax.f32 %v1460_v3, 0.0  ;;  %v1559_v37 = vadd.f32 %v1558_v13, %v1534_v55  ;;  %v1443_v51 = vmax.f32 %v1419_v18, 0.0 }
 0x187   :  { %3927 = vmatmul.msk.f32.gmra.mxu0 %vm47_vm1, %v5357_v60  ;;  %v1488_v1 = vmax.f32 %v1464_v30, 0.0  ;;  %v1442_v36 = vmax.f32 %v1418_v16, 0.0 }
 0x188   :  { %v1508_v39 = vmax.f32 %v1436_v46, %v1484_v57  ;;  %v1510_v19 = vmax.f32 %v1438_v20, %v1486_v21  ;;  %3909 = vmatmul.msk.f32.gmra.mxu2 %vm47_vm1, %v5089_v6  ;;  %3918 = vmatmul.msk.f32.gmra.mxu3 %vm47_vm1, %v5089_v6  ;;  %v1391_v10 = vpop.f32.mrf.mxu1  ;;  %v5405_v46 = vld [vmem:[%s6671_s0 + $0x2c0] sm:$0xff] }
 0x189   :  { %1560 = vadd.xlane.f32.xlu2 %v1559_v37  ;;  %v1465_v17 = vadd.f32 %v1391_v10, %v4517_v62  ;;  %v1512_v42 = vmax.f32 %v1440_v22, %v1488_v1 }
 0x18a   :  { %v1535_v8 = vmul.f32 %v5277_v29, %v1508_v39  ;;  %v1537_v38 = vmul.f32 %v5287_v24, %v1510_v19  ;;  %v1422_v19 = vadd.f32 %v5162_v23, %v4508_v58 }
 0x18b   :  { %v1244_v49 = vpop.f32.mrf.mxu2  ;;  %v1309_v0 = vpop.f32.mrf.mxu3  ;;  %3936 = vmatmul.msk.f32.gmra.mxu1 %vm47_vm1, %v5357_v60  ;;  %v1489_v52 = vmax.f32 %v1465_v17, 0.0  ;;  %v1539_v31 = vmul.f32 %v5282_v34, %v1512_v42  ;;  %v6690_v17 = vld [vmem:[#allocation7_spill] sm:$0xff] }
 0x18c   :  { %v1417_v6 = vadd.f32 %v1244_v49, %v4517_v62  ;;  %v1463_v33 = vadd.f32 %v1309_v0, %v4515_v61  ;;  %v1353_v50 = vpop.f32.mrf.mxu0  ;;  %v1562_v63 = vadd.f32 %v1536_v4, %v1535_v8  ;;  %v1421_v8 = vadd.f32 %v6690_v17, %v4515_v61  ;;  %v5464_v17 = vld [vmem:[%s6670_s1 + $0x40] sm:$0x3] }
 0x18d   :  { %v1467_v32 = vadd.f32 %v1353_v50, %v4508_v58  ;;  %v1446_v0 = vmax.f32 %v1422_v19, 0.0 }
 0x18e   :  { %v1441_v5 = vmax.f32 %v1417_v6, 0.0  ;;  %v1487_v12 = vmax.f32 %v1463_v33, 0.0  ;;  %v1563_v2 = vadd.f32 %v1562_v63, %v1537_v38 }
 0x18f   :  { %3928 = vmatmul.msk.f32.gmra.mxu0 %vm47_vm1, %v5381_v44  ;;  %v1491_v53 = vmax.f32 %v1467_v32, 0.0 }
 0x190   :  { %v1511_v25 = vmax.f32 %v1439_v26, %v1487_v12  ;;  %v1513_v9 = vmax.f32 %v1441_v5, %v1489_v52  ;;  %3910 = vmatmul.msk.f32.gmra.mxu2 %vm47_vm1, %v5125_v45  ;;  %3919 = vmatmul.msk.f32.gmra.mxu3 %vm47_vm1, %v5125_v45  ;;  %v1394_v15 = vpop.f32.mrf.mxu1  ;;  %v5429_v26 = vld [vmem:[%s6671_s0 + $0x330] sm:$0xff]  ;;  %v1445_v5 = vmax.f32 %v1421_v8, 0.0 }
 0x191   :  { %1564 = vadd.xlane.f32.xlu0 %v1563_v2  ;;  %v1468_v55 = vadd.f32 %v1394_v15, %v4517_v62  ;;  %v1515_v57 = vmax.f32 %v1443_v51, %v1491_v53  ;;  %v6691_v53 = vld [vmem:[#allocation8_spill] sm:$0xff] }
 0x192   :  { %v1538_v40 = vmul.f32 %v5277_v29, %v1511_v25  ;;  %v1540_v27 = vmul.f32 %v5287_v24, %v1513_v9  ;;  %v1425_v9 = vadd.f32 %v5201_v47, %v4508_v58 }
 0x193   :  { %v1247_v3 = vpop.f32.mrf.mxu2  ;;  %v1312_v54 = vpop.f32.mrf.mxu3  ;;  %3937 = vmatmul.msk.f32.gmra.mxu1 %vm47_vm1, %v5381_v44  ;;  %v1492_v13 = vmax.f32 %v1468_v55, 0.0  ;;  %v1542_v22 = vmul.f32 %v5282_v34, %v1515_v57 }
 0x194   :  { %v1420_v45 = vadd.f32 %v1247_v3, %v4517_v62  ;;  %v1466_v41 = vadd.f32 %v1312_v54, %v4515_v61  ;;  %v1356_v21 = vpop.f32.mrf.mxu0  ;;  %v1566_v30 = vadd.f32 %v1539_v31, %v1538_v40  ;;  %v1424_v40 = vadd.f32 %v6691_v53, %v4515_v61 }
 0x195   :  { %v1470_v20 = vadd.f32 %v1356_v21, %v4508_v58  ;;  %v1449_v54 = vmax.f32 %v1425_v9, 0.0 }
 0x196   :  { %v1444_v37 = vmax.f32 %v1420_v45, 0.0  ;;  %v1490_v59 = vmax.f32 %v1466_v41, 0.0  ;;  %v1567_v39 = vadd.f32 %v1566_v30, %v1540_v27  ;;  %v1448_v57 = vmax.f32 %v1424_v40, 0.0  ;;  %v2139_v40 = vld [vmem:[%s6671_s0 + $0x218] sm:$0xff] }
 0x197   :  { %3929 = vmatmul.msk.f32.gmra.mxu0 %vm47_vm1, %v5405_v46  ;;  %v1494_v4 = vmax.f32 %v1470_v20, 0.0 }
 0x198   :  { %v1514_v10 = vmax.f32 %v1442_v36, %v1490_v59  ;;  %v1516_v11 = vmax.f32 %v1444_v37, %v1492_v13  ;;  %3911 = vmatmul.msk.f32.gmra.mxu2 %vm47_vm1, %v5167_v43  ;;  %3920 = vmatmul.msk.f32.gmra.mxu3 %vm47_vm1, %v5167_v43  ;;  %v1397_v1 = vpop.f32.mrf.mxu1  ;;  %v2135_v36 = vld [vmem:[%s6671_s0 + $0x58] sm:$0xff] }
 0x199   :  { %1568 = vadd.xlane.f32.xlu0 %v1567_v39  ;;  %v1471_v38 = vadd.f32 %v1397_v1, %v4517_v62  ;;  %v1518_v12 = vmax.f32 %v1446_v0, %v1494_v4 }
 0x19a   :  { %v1541_v23 = vmul.f32 %v5277_v29, %v1514_v10  ;;  %v1543_v49 = vmul.f32 %v5287_v24, %v1516_v11 }
 0x19b   :  { %v1250_v6 = vpop.f32.mrf.mxu2  ;;  %v1315_v33 = vpop.f32.mrf.mxu3  ;;  %3938 = vmatmul.msk.f32.gmra.mxu1 %vm47_vm1, %v5405_v46  ;;  %v1495_v63 = vmax.f32 %v1471_v38, 0.0  ;;  %v1545_v51 = vmul.f32 %v5282_v34, %v1518_v12 }
 0x19c   :  { %v1423_v43 = vadd.f32 %v1250_v6, %v4517_v62  ;;  %v1469_v50 = vadd.f32 %v1315_v33, %v4515_v61  ;;  %v1359_v52 = vpop.f32.mrf.mxu0  ;;  %v1570_v42 = vadd.f32 %v1542_v22, %v1541_v23  ;;  %v5481_v23 = vld [vmem:[%s6670_s1 + $0x30] sm:$0x3]  ;;  %v5506_v6 = vld [vmem:[%s6670_s1 + $0x20] sm:$0xff]  ;;  %v5512_v33 = vld [vmem:[%s6670_s1 + $0x18] sm:$0xff] }
 0x19d   :  { %v1473_v18 = vadd.f32 %v1359_v52, %v4508_v58  ;;  %v5525_v52 = vld [vmem:[%s6670_s1 + $0x8] sm:$0xff] }
 0x19e   :  { %v1447_v32 = vmax.f32 %v1423_v43, 0.0  ;;  %v1493_v2 = vmax.f32 %v1469_v50, 0.0  ;;  %v1571_v25 = vadd.f32 %v1570_v42, %v1543_v49  ;;  %v2136_v49 = vld [vmem:[%s6671_s0 + $0xc8] sm:$0xff]  ;;  %v5518_v43 = vld [vmem:[%s6670_s1 + $0x10] sm:$0xff]  ;;  %v5537_v42 = vld [vmem:[%s6670_s1] sm:$0xff] }
 0x19f   :  { %3930 = vmatmul.msk.f32.gmra.mxu0 %vm47_vm1, %v5429_v26  ;;  %v1497_v27 = vmax.f32 %v1473_v18, 0.0 }
 0x1a0   :  { %v1517_v15 = vmax.f32 %v1445_v5, %v1493_v2  ;;  %v1519_v16 = vmax.f32 %v1447_v32, %v1495_v63  ;;  %3912 = vmatmul.msk.f32.gmra.mxu2 %vm47_vm1, %v5206_v56  ;;  %3921 = vmatmul.msk.f32.gmra.mxu3 %vm47_vm1, %v5206_v56  ;;  %v1400_v55 = vpop.f32.mrf.mxu1  ;;  %v2137_v32 = vld [vmem:[%s6671_s0 + $0x138] sm:$0xff] }
 0x1a1   :  { %1572 = vadd.xlane.f32.xlu2 %v1571_v25  ;;  %v1474_v31 = vadd.f32 %v1400_v55, %v4517_v62  ;;  %v1521_v37 = vmax.f32 %v1449_v54, %v1497_v27 }
 0x1a2   :  { %v1544_v47 = vmul.f32 %v5277_v29, %v1517_v15  ;;  %v1546_v3 = vmul.f32 %v5287_v24, %v1519_v16  ;;  %v2138_v15 = vld [vmem:[%s6671_s0 + $0x1a8] sm:$0xff] }
 0x1a3   :  { %v1253_v45 = vpop.f32.mrf.mxu2  ;;  %v1318_v41 = vpop.f32.mrf.mxu3  ;;  %3939 = vmatmul.msk.f32.gmra.mxu1 %vm47_vm1, %v5429_v26  ;;  %v1498_v13 = vmax.f32 %v1474_v31, 0.0  ;;  %v1548_v4 = vmul.f32 %v5282_v34, %v1521_v37 }
 0x1a4   :  { %v1426_v56 = vadd.f32 %v1253_v45, %v4517_v62  ;;  %v1472_v21 = vadd.f32 %v1318_v41, %v4515_v61  ;;  %v5450_v30 = vpop.f32.mrf.mxu0  ;;  %v1574_v20 = vadd.f32 %v1545_v51, %v1544_v47  ;;  %v2140_v51 = vld [vmem:[%s6671_s0 + $0x288] sm:$0xff] }
 0x1a6   :  { %v1450_v59 = vmax.f32 %v1426_v56, 0.0  ;;  %v1496_v39 = vmax.f32 %v1472_v21, 0.0  ;;  %v1575_v19 = vadd.f32 %v1574_v20, %v1546_v3  ;;  %v2141_v21 = vld [vmem:[%s6671_s0 + $0x2f8] sm:$0xff] }
 0x1a7   :  { %3959 = vmatmul.msk.f32.vlgmr.msrb.gmra.mxu0 %vm47_vm1, %v2135_v36 }
 0x1a8   :  { %v1520_v10 = vmax.f32 %v1448_v57, %v1496_v39  ;;  %v1522_v11 = vmax.f32 %v1450_v59, %v1498_v13  ;;  %3941 = vmatmul.msk.f32.vlgmr.msrb.gmra.mxu2 %vm47_vm1, %v5223_v35  ;;  %3950 = vmatmul.msk.f32.vlgmr.msrb.gmra.mxu3 %vm47_vm1, %v2135_v36  ;;  %v5459_v1 = vpop.f32.mrf.mxu1  ;;  %v5474_v35 = vld [vmem:[%s6670_s1 + $0x38] sm:$0x3]  ;;  %v2142_v59 = vld [vmem:[%s6671_s0 + $0x368] sm:$0xff] }
 0x1a9   :  { %1576 = vadd.xlane.f32.xlu0 %v1575_v19  ;;  %4021 = vmatpush.msk.msrb.mxu3 %vm72_vm0, %v5464_v17 }
 0x1aa   :  { %v1547_v8 = vmul.f32 %v5277_v29, %v1520_v10  ;;  %v1549_v38 = vmul.f32 %v5287_v24, %v1522_v11  ;;  %4012 = vmatpush.msk.msrb.mxu2 %vm72_vm0, %v5474_v35  ;;  %4030 = vmatpush.msk.msrb.mxu0 %vm72_vm0, %v5481_v23  ;;  %v5493_v24 = vld [vmem:[%s6670_s1 + $0x28] sm:$0xff] }
 0x1ab   :  { %v5485_v29 = vpop.f32.mrf.mxu2  ;;  %v5487_v34 = vpop.f32.mrf.mxu3  ;;  %3968 = vmatmul.msk.f32.vlgmr.msrb.gmra.mxu1 %vm47_vm1, %v2135_v36  ;;  %2927 = vmatpush.msrb.mxu3 %v5493_v24 }
 0x1ac   :  { %v5496_v22 = vpop.f32.mrf.mxu0  ;;  %v1578_v0 = vadd.f32 %v1548_v4, %v1547_v8  ;;  %4039 = vmatpush.msk.msrb.mxu1 %vm72_vm0, %v5474_v35  ;;  %2886 = vmatpush.msrb.mxu2 %v5506_v6  ;;  %v1036_v3 = vpop.xlane.xlu0 %1035 }
 0x1ad   :  { %3215 = vmatpush.msrb.mxu0 %v5512_v33  ;;  %2928 = vmatpush.msrb.mxu3 %v5518_v43  ;;  %v1073_v11 = vperm.slane %v1036_v3, %v5158_v14 }
 0x1ae   :  { %v1579_v50 = vadd.f32 %v1578_v0, %v1549_v38  ;;  %3256 = vmatpush.msrb.mxu1 %v5506_v6  ;;  %2887 = vmatpush.msrb.mxu2 %v5525_v52 }
 0x1af   :  { %3960 = vmatmul.msk.f32.gmra.mxu0 %vm47_vm1, %v2136_v49 }
 0x1b0   :  { %3942 = vmatmul.msk.f32.gmra.mxu2 %vm47_vm1, %v5260_v48  ;;  %3951 = vmatmul.msk.f32.gmra.mxu3 %vm47_vm1, %v2136_v49  ;;  %v5532_v63 = vpop.f32.mrf.mxu1 }
 0x1b1   :  { %1580 = vadd.xlane.f32.xlu0 %v1579_v50  ;;  %3216 = vmatpush.msrb.mxu0 %v5537_v42 }
 0x1b2   :  { %3257 = vmatpush.msrb.mxu1 %v5525_v52 }
 0x1b3   :  { %v5541_v5 = vpop.f32.mrf.mxu2  ;;  %v5543_v12 = vpop.f32.mrf.mxu3  ;;  %3969 = vmatmul.msk.f32.gmra.mxu1 %vm47_vm1, %v2136_v49 }
 0x1b4   :  { %v5546_v48 = vpop.f32.mrf.mxu0  ;;  %v1040_v41 = vpop.xlane.xlu1 %1039 }
 0x1b5   :  { %v1074_v39 = vperm.slane %v1040_v41, %v5158_v14 }
 0x1b7   :  { %3961 = vmatmul.msk.f32.gmra.mxu0 %vm47_vm1, %v2137_v32  ;;  %v1081_v0 = vsel %vm556_vm2, %v1074_v39, %v1073_v11  ;;  %v1920_v39 = vadd.f32 %v5485_v29, %v4515_v61  ;;  %v5675_v29 = vld [vmem:[%s6671_s0 + $0x60] sm:$0xff] }
 0x1b8   :  { %3943 = vmatmul.msk.f32.gmra.mxu2 %vm47_vm1, %v5309_v7  ;;  %3952 = vmatmul.msk.f32.gmra.mxu3 %vm47_vm1, %v2137_v32  ;;  %v5555_v2 = vpop.f32.mrf.mxu1 }
 0x1bb   :  { %v5557_v18 = vpop.f32.mrf.mxu2  ;;  %v5559_v25 = vpop.f32.mrf.mxu3  ;;  %3970 = vmatmul.msk.f32.gmra.mxu1 %vm47_vm1, %v2137_v32 }
 0x1bc   :  { %v5562_v9 = vpop.f32.mrf.mxu0  ;;  %v1044_v13 = vpop.xlane.xlu2 %1043 }
 0x1bf   :  { %3962 = vmatmul.msk.f32.gmra.mxu0 %vm47_vm1, %v2138_v15 }
 0x1c0   :  { %3944 = vmatmul.msk.f32.gmra.mxu2 %vm47_vm1, %v5333_v28  ;;  %3953 = vmatmul.msk.f32.gmra.mxu3 %vm47_vm1, %v2138_v15  ;;  %v5571_v7 = vpop.f32.mrf.mxu1 }
 0x1c3   :  { %v5573_v16 = vpop.f32.mrf.mxu2  ;;  %v5575_v55 = vpop.f32.mrf.mxu3  ;;  %3971 = vmatmul.msk.f32.gmra.mxu1 %vm47_vm1, %v2138_v15 }
 0x1c4   :  { %v5578_v53 = vpop.f32.mrf.mxu0  ;;  %v1048_v36 = vpop.xlane.xlu0 %1047 }
 0x1c5   :  { %v1076_v8 = vperm.slane %v1048_v36, %v5158_v14 }
 0x1c7   :  { %3963 = vmatmul.msk.f32.gmra.mxu0 %vm47_vm1, %v2139_v40 }
 0x1c8   :  { %3945 = vmatmul.msk.f32.gmra.mxu2 %vm47_vm1, %v5357_v60  ;;  %3954 = vmatmul.msk.f32.gmra.mxu3 %vm47_vm1, %v2139_v40  ;;  %v5587_v28 = vpop.f32.mrf.mxu1 }
 0x1cb   :  { %v5589_v31 = vpop.f32.mrf.mxu2  ;;  %v5591_v27 = vpop.f32.mrf.mxu3  ;;  %3972 = vmatmul.msk.f32.gmra.mxu1 %vm47_vm1, %v2139_v40 }
 0x1cc   :  { %v5594_v47 = vpop.f32.mrf.mxu0  ;;  %v1052_v37 = vpop.xlane.xlu1 %1051 }
 0x1cd   :  { %v1077_v38 = vperm.slane %v1052_v37, %v5158_v14 }
 0x1cf   :  { %3964 = vmatmul.msk.f32.gmra.mxu0 %vm47_vm1, %v2140_v51 }
 0x1d0   :  { %3946 = vmatmul.msk.f32.gmra.mxu2 %vm47_vm1, %v5381_v44  ;;  %3955 = vmatmul.msk.f32.gmra.mxu3 %vm47_vm1, %v2140_v51  ;;  %v5603_v60 = vpop.f32.mrf.mxu1 }
 0x1d3   :  { %v5605_v54 = vpop.f32.mrf.mxu2  ;;  %v5607_v45 = vpop.f32.mrf.mxu3  ;;  %3973 = vmatmul.msk.f32.gmra.mxu1 %vm47_vm1, %v2140_v51 }
 0x1d4   :  { %v5610_v56 = vpop.f32.mrf.mxu0  ;;  %v1056_v10 = vpop.xlane.xlu2 %1055 }
 0x1d5   :  { %v1078_v50 = vperm.slane %v1056_v10, %v5158_v14 }
 0x1d7   :  { %3965 = vmatmul.msk.f32.gmra.mxu0 %vm47_vm1, %v2141_v21 }
 0x1d8   :  { %3947 = vmatmul.msk.f32.gmra.mxu2 %vm47_vm1, %v5405_v46  ;;  %3956 = vmatmul.msk.f32.gmra.mxu3 %vm47_vm1, %v2141_v21  ;;  %v5619_v44 = vpop.f32.mrf.mxu1  ;;  %v1075_v46 = vperm.slane %v1044_v13, %v5158_v14 }
 0x1da   :  { %v1082_v32 = vsel %vm558_vm3, %v1075_v46, %v1081_v0  ;;  %v1968_v46 = vadd.f32 %v5459_v1, %v4515_v61  ;;  %v1922_v1 = vadd.f32 %v5450_v30, %v4517_v62 }
 0x1db   :  { %v5621_v20 = vpop.f32.mrf.mxu2  ;;  %v5623_v57 = vpop.f32.mrf.mxu3  ;;  %3974 = vmatmul.msk.f32.gmra.mxu1 %vm47_vm1, %v2141_v21  ;;  %v1083_v40 = vsel %vm560_vm4, %v1076_v8, %v1082_v32  ;;  %v2644_v21 = vld [vmem:[%s6671_s0 + $0x28] sm:$0xff] }
 0x1dc   :  { %v5630_v19 = vpop.f32.mrf.mxu0  ;;  %v1060_v4 = vpop.xlane.xlu0 %1059  ;;  %v1992_v0 = vmax.f32 %v1968_v46, 0.0  ;;  %v1924_v46 = vadd.f32 %v5543_v12, %v4508_v58 }
 0x1dd   :  { %v1079_v15 = vperm.slane %v1060_v4, %v5158_v14  ;;  %v1944_v4 = vmax.f32 %v1920_v39, 0.0 }
 0x1df   :  { %3966 = vmatmul.msk.f32.gmra.mxu0 %vm47_vm1, %v2142_v59 }
 0x1e0   :  { %3948 = vmatmul.msk.f32.gmra.mxu2 %vm47_vm1, %v5429_v26  ;;  %3957 = vmatmul.msk.f32.gmra.mxu3 %vm47_vm1, %v2142_v59  ;;  %v5640_v49 = vpop.f32.mrf.mxu1  ;;  %v1084_v26 = vsel %vm562_vm5, %v1077_v38, %v1083_v40  ;;  %v1921_v38 = vadd.f32 %v5487_v34, %v4508_v58  ;;  %v2645_v34 = vld [vmem:[%s6671_s0 + $0x98] sm:$0xff] }
 0x1e1   :  { %v1085_v13 = vsel %vm564_vm6, %v1078_v50, %v1084_v26 }
 0x1e2   :  { %v1945_v26 = vmax.f32 %v1921_v38, 0.0 }
 0x1e3   :  { %v5647_v51 = vpop.f32.mrf.mxu2  ;;  %v5649_v3 = vpop.f32.mrf.mxu3  ;;  %3975 = vmatmul.msk.f32.gmra.mxu1 %vm47_vm1, %v2142_v59  ;;  %v1086_v59 = vsel %vm566_vm7, %v1079_v15, %v1085_v13  ;;  %v1923_v15 = vadd.f32 %v5541_v5, %v4515_v61  ;;  %v5726_v5 = vld [vmem:[%s6671_s0 + $0xd0] sm:$0xff] }
 0x1e4   :  { %v1064_v41 = vpop.xlane.xlu1 %1063  ;;  %v5658_v37 = vpop.f32.mrf.mxu0 }
 0x1e5   :  { %v1080_v36 = vperm.slane %v1064_v41, %v5158_v14  ;;  %v2016_v41 = vmax.f32 %v1944_v4, %v1992_v0  ;;  %v1947_v39 = vmax.f32 %v1923_v15, 0.0  ;;  %v2646_v0 = vld [vmem:[%s6671_s0 + $0x108] sm:$0xff] }
 0x1e7   :  { %3995 = vmatmul.msk.f32.vlgmr.msra.gmra.mxu0 %vm47_vm1, %v2644_v21  ;;  %v1087_v10 = vsel %vm568_vm8, %v1080_v36, %v1086_v59  ;;  %v1925_v36 = vadd.f32 %v5496_v22, %v4517_v62 }
 0x1e8   :  { %3977 = vmatmul.msk.f32.vlgmr.msra.gmra.mxu2 %vm47_vm1, %v2644_v21  ;;  %3986 = vmatmul.msk.f32.vlgmr.msra.gmra.mxu3 %vm47_vm1, %v2644_v21  ;;  %v1089_v11 = vsel %vm571_vm9, %v1087_v10, 0.0  ;;  %v5670_v8 = vpop.f32.mrf.mxu1  ;;  %v5735_v10 = vld [vmem:[%s6673_s3 + $0x58] sm:$0xff] }
 0x1e9   :  { %1090 = vadd.xlane.f32.xlu2 %v1089_v11  ;;  %4057 = vmatpush.msk.msra.mxu3 %vm72_vm0, %v5481_v23 }
 0x1ea   :  { %4048 = vmatpush.msk.msra.mxu2 %vm72_vm0, %v5464_v17  ;;  %4066 = vmatpush.msk.msra.mxu0 %vm72_vm0, %v5474_v35  ;;  %v1946_v35 = vmax.f32 %v1922_v1, 0.0 }
 0x1eb   :  { %v1855_v50 = vpop.f32.mrf.mxu2  ;;  %v1896_v32 = vpop.f32.mrf.mxu3  ;;  %4004 = vmatmul.msk.f32.vlgmr.msra.gmra.mxu1 %vm47_vm1, %v5675_v29  ;;  %3362 = vmatpush.msra.mxu3 %v5512_v33  ;;  %v1971_v33 = vadd.f32 %v5532_v63, %v4515_v61 }
 0x1ec   :  { %v1969_v30 = vadd.f32 %v1855_v50, %v4508_v58  ;;  %v1970_v23 = vadd.f32 %v1896_v32, %v4517_v62  ;;  %4075 = vmatpush.msk.msra.mxu1 %vm72_vm0, %v5464_v17  ;;  %3297 = vmatpush.msra.mxu2 %v5493_v24  ;;  %v5702_v40 = vpop.f32.mrf.mxu0  ;;  %v5712_v17 = vld [vmem:[%s6673_s3 + $0x48] sm:$0xff]  ;;  %v1949_v50 = vmax.f32 %v1925_v36, 0.0  ;;  %v1948_v32 = vmax.f32 %v1924_v46, 0.0 }
 0x1ed   :  { %3403 = vmatpush.msra.mxu0 %v5506_v6  ;;  %3363 = vmatpush.msra.mxu3 %v5537_v42  ;;  %v5717_v6 = vld [vmem:[%s6673_s3 + $0x50] sm:$0xff]  ;;  %v1995_v59 = vmax.f32 %v1971_v33, 0.0  ;;  %v2043_v11 = vmul.f32 %v5712_v17, %v2016_v41 }
 0x1ee   :  { %v1993_v21 = vmax.f32 %v1969_v30, 0.0  ;;  %v1994_v13 = vmax.f32 %v1970_v23, 0.0  ;;  %3444 = vmatpush.msra.mxu1 %v5493_v24  ;;  %3298 = vmatpush.msra.mxu2 %v5518_v43  ;;  %v1974_v23 = vadd.f32 %v5555_v2, %v4515_v61  ;;  %v5763_v2 = vld [vmem:[%s6671_s0 + $0x140] sm:$0xff] }
 0x1ef   :  { %3996 = vmatmul.msk.f32.gmra.mxu0 %vm47_vm1, %v2645_v34  ;;  %v2019_v30 = vmax.f32 %v1947_v39, %v1995_v59 }
 0x1f0   :  { %v2017_v63 = vmax.f32 %v1945_v26, %v1993_v21  ;;  %v2018_v42 = vmax.f32 %v1946_v35, %v1994_v13  ;;  %3978 = vmatmul.msk.f32.gmra.mxu2 %vm47_vm1, %v2645_v34  ;;  %3987 = vmatmul.msk.f32.gmra.mxu3 %vm47_vm1, %v2645_v34  ;;  %v5721_v24 = vpop.f32.mrf.mxu1  ;;  %v1926_v35 = vadd.f32 %v5557_v18, %v4515_v61  ;;  %v1998_v36 = vmax.f32 %v1974_v23, 0.0 }
 0x1f1   :  { %3404 = vmatpush.msra.mxu0 %v5525_v52  ;;  %3445 = vmatpush.msra.mxu1 %v5518_v43  ;;  %v1928_v18 = vadd.f32 %v5546_v48, %v4517_v62  ;;  %v2046_v39 = vmul.f32 %v5712_v17, %v2019_v30  ;;  %v2647_v48 = vld [vmem:[%s6671_s0 + $0x178] sm:$0xff] }
 0x1f2   :  { %v2044_v1 = vmul.f32 %v5717_v6, %v2017_v63  ;;  %v2045_v52 = vmul.f32 %v5735_v10, %v2018_v42  ;;  %v1927_v63 = vadd.f32 %v5559_v25, %v4508_v58  ;;  %v1950_v42 = vmax.f32 %v1926_v35, 0.0 }
 0x1f3   :  { %v1858_v4 = vpop.f32.mrf.mxu2  ;;  %v1899_v22 = vpop.f32.mrf.mxu3  ;;  %4005 = vmatmul.msk.f32.gmra.mxu1 %vm47_vm1, %v5726_v5 }
 0x1f4   :  { %v1972_v12 = vadd.f32 %v1858_v4, %v4508_v58  ;;  %v1973_v38 = vadd.f32 %v1899_v22, %v4517_v62  ;;  %v2067_v43 = vadd.f32 %v2044_v1, %v2043_v11  ;;  %v5751_v34 = vpop.f32.mrf.mxu0 }
 0x1f6   :  { %v1996_v15 = vmax.f32 %v1972_v12, 0.0  ;;  %v1997_v33 = vmax.f32 %v1973_v38, 0.0  ;;  %v2068_v26 = vadd.f32 %v2067_v43, %v2045_v52  ;;  %v1952_v12 = vmax.f32 %v1928_v18, 0.0 }
 0x1f7   :  { %3997 = vmatmul.msk.f32.gmra.mxu0 %vm47_vm1, %v2646_v0  ;;  %v1951_v38 = vmax.f32 %v1927_v63, 0.0  ;;  %v1977_v52 = vadd.f32 %v5571_v7, %v4515_v61  ;;  %v5793_v7 = vld [vmem:[%s6671_s0 + $0x1b0] sm:$0xff] }
 0x1f8   :  { %v2020_v41 = vmax.f32 %v1948_v32, %v1996_v15  ;;  %v2021_v21 = vmax.f32 %v1949_v50, %v1997_v33  ;;  %3979 = vmatmul.msk.f32.gmra.mxu2 %vm47_vm1, %v2646_v0  ;;  %3988 = vmatmul.msk.f32.gmra.mxu3 %vm47_vm1, %v2646_v0  ;;  %v5758_v13 = vpop.f32.mrf.mxu1  ;;  %v1929_v0 = vadd.f32 %v5573_v16, %v4515_v61 }
 0x1f9   :  { %2069 = vadd.xlane.f32.xlu1 %v2068_v26  ;;  %v2022_v50 = vmax.f32 %v1950_v42, %v1998_v36  ;;  %v1931_v16 = vadd.f32 %v5562_v9, %v4517_v62  ;;  %v2648_v9 = vld [vmem:[%s6671_s0 + $0x1e8] sm:$0xff] }
 0x1fa   :  { %v2047_v46 = vmul.f32 %v5717_v6, %v2020_v41  ;;  %v2048_v25 = vmul.f32 %v5735_v10, %v2021_v21  ;;  %v1953_v26 = vmax.f32 %v1929_v0, 0.0  ;;  %v1930_v41 = vadd.f32 %v5575_v55, %v4508_v58 }
 0x1fb   :  { %v1861_v59 = vpop.f32.mrf.mxu2  ;;  %v1902_v11 = vpop.f32.mrf.mxu3  ;;  %4006 = vmatmul.msk.f32.gmra.mxu1 %vm47_vm1, %v5763_v2  ;;  %v2001_v21 = vmax.f32 %v1977_v52, 0.0  ;;  %v2049_v18 = vmul.f32 %v5712_v17, %v2022_v50 }
 0x1fc   :  { %v1975_v1 = vadd.f32 %v1861_v59, %v4508_v58  ;;  %v1976_v4 = vadd.f32 %v1902_v11, %v4517_v62  ;;  %v2071_v22 = vadd.f32 %v2047_v46, %v2046_v39  ;;  %v5783_v43 = vpop.f32.mrf.mxu0  ;;  %v1955_v11 = vmax.f32 %v1931_v16, 0.0 }
 0x1fe   :  { %v1999_v32 = vmax.f32 %v1975_v1, 0.0  ;;  %v2000_v30 = vmax.f32 %v1976_v4, 0.0  ;;  %v2072_v23 = vadd.f32 %v2071_v22, %v2048_v25  ;;  %v1954_v1 = vmax.f32 %v1930_v41, 0.0 }
 0x1ff   :  { %3998 = vmatmul.msk.f32.gmra.mxu0 %vm47_vm1, %v2647_v48  ;;  %v2025_v4 = vmax.f32 %v1953_v26, %v2001_v21  ;;  %v1932_v22 = vadd.f32 %v5589_v31, %v4515_v61  ;;  %v1934_v31 = vadd.f32 %v5578_v53, %v4517_v62  ;;  %v2649_v53 = vld [vmem:[%s6671_s0 + $0x258] sm:$0xff] }
 0x200   :  { %v2023_v35 = vmax.f32 %v1951_v38, %v1999_v32  ;;  %v2024_v15 = vmax.f32 %v1952_v12, %v2000_v30  ;;  %3980 = vmatmul.msk.f32.gmra.mxu2 %vm47_vm1, %v2647_v48  ;;  %3989 = vmatmul.msk.f32.gmra.mxu3 %vm47_vm1, %v2647_v48  ;;  %v5788_v33 = vpop.f32.mrf.mxu1  ;;  %v1980_v48 = vadd.f32 %v5587_v28, %v4515_v61  ;;  %v5823_v28 = vld [vmem:[%s6671_s0 + $0x220] sm:$0xff] }
 0x201   :  { %2073 = vadd.xlane.f32.xlu2 %v2072_v23  ;;  %v1933_v30 = vadd.f32 %v5591_v27, %v4508_v58  ;;  %v1956_v23 = vmax.f32 %v1932_v22, 0.0 }
 0x202   :  { %v2050_v63 = vmul.f32 %v5717_v6, %v2023_v35  ;;  %v2051_v55 = vmul.f32 %v5735_v10, %v2024_v15  ;;  %v2004_v35 = vmax.f32 %v1980_v48, 0.0  ;;  %v2052_v15 = vmul.f32 %v5712_v17, %v2025_v4 }
 0x203   :  { %v1864_v42 = vpop.f32.mrf.mxu2  ;;  %v1905_v36 = vpop.f32.mrf.mxu3  ;;  %4007 = vmatmul.msk.f32.gmra.mxu1 %vm47_vm1, %v5793_v7 }
 0x204   :  { %v1978_v39 = vadd.f32 %v1864_v42, %v4508_v58  ;;  %v1979_v46 = vadd.f32 %v1905_v36, %v4517_v62  ;;  %v2075_v59 = vadd.f32 %v2050_v63, %v2049_v18  ;;  %v5811_v25 = vpop.f32.mrf.mxu0  ;;  %v1958_v42 = vmax.f32 %v1934_v31, 0.0 }
 0x205   :  { %v1957_v36 = vmax.f32 %v1933_v30, 0.0 }
 0x206   :  { %v2002_v12 = vmax.f32 %v1978_v39, 0.0  ;;  %v2003_v38 = vmax.f32 %v1979_v46, 0.0  ;;  %v2076_v0 = vadd.f32 %v2075_v59, %v2051_v55  ;;  %v1935_v39 = vadd.f32 %v5605_v54, %v4515_v61 }
 0x207   :  { %3999 = vmatmul.msk.f32.gmra.mxu0 %vm47_vm1, %v2648_v9  ;;  %v1983_v46 = vadd.f32 %v5603_v60, %v4515_v61  ;;  %v2028_v55 = vmax.f32 %v1956_v23, %v2004_v35  ;;  %v5853_v60 = vld [vmem:[%s6671_s0 + $0x290] sm:$0xff]  ;;  %v1937_v54 = vadd.f32 %v5594_v47, %v4517_v62  ;;  %v2650_v47 = vld [vmem:[%s6671_s0 + $0x2c8] sm:$0xff] }
 0x208   :  { %v2026_v52 = vmax.f32 %v1954_v1, %v2002_v12  ;;  %v2027_v50 = vmax.f32 %v1955_v11, %v2003_v38  ;;  %3981 = vmatmul.msk.f32.gmra.mxu2 %vm47_vm1, %v2648_v9  ;;  %3990 = vmatmul.msk.f32.gmra.mxu3 %vm47_vm1, %v2648_v9  ;;  %v5818_v32 = vpop.f32.mrf.mxu1  ;;  %v1959_v12 = vmax.f32 %v1935_v39, 0.0  ;;  %v1936_v38 = vadd.f32 %v5607_v45, %v4508_v58 }
 0x209   :  { %2077 = vadd.xlane.f32.xlu1 %v2076_v0  ;;  %v2007_v0 = vmax.f32 %v1983_v46, 0.0 }
 0x20a   :  { %v2053_v16 = vmul.f32 %v5717_v6, %v2026_v52  ;;  %v2054_v27 = vmul.f32 %v5735_v10, %v2027_v50  ;;  %v2055_v52 = vmul.f32 %v5712_v17, %v2028_v55  ;;  %v1939_v55 = vadd.f32 %v5623_v57, %v4508_v58 }
 0x20b   :  { %v1867_v26 = vpop.f32.mrf.mxu2  ;;  %v1908_v41 = vpop.f32.mrf.mxu3  ;;  %4008 = vmatmul.msk.f32.gmra.mxu1 %vm47_vm1, %v5823_v28 }
 0x20c   :  { %v1981_v21 = vadd.f32 %v1867_v26, %v4508_v58  ;;  %v1982_v18 = vadd.f32 %v1908_v41, %v4517_v62  ;;  %v2079_v63 = vadd.f32 %v2053_v16, %v2052_v15  ;;  %v5843_v9 = vpop.f32.mrf.mxu0  ;;  %v1961_v16 = vmax.f32 %v1937_v54, 0.0 }
 0x20d   :  { %v1960_v26 = vmax.f32 %v1936_v38, 0.0  ;;  %v2031_v41 = vmax.f32 %v1959_v12, %v2007_v0 }
 0x20e   :  { %v2005_v59 = vmax.f32 %v1981_v21, 0.0  ;;  %v2006_v11 = vmax.f32 %v1982_v18, 0.0  ;;  %v2080_v1 = vadd.f32 %v2079_v63, %v2054_v27  ;;  %v1986_v21 = vadd.f32 %v5619_v44, %v4515_v61  ;;  %v5883_v44 = vld [vmem:[%s6671_s0 + $0x300] sm:$0xff] }
 0x20f   :  { %4000 = vmatmul.msk.f32.gmra.mxu0 %vm47_vm1, %v2649_v53 }
 0x210   :  { %v2029_v4 = vmax.f32 %v1957_v36, %v2005_v59  ;;  %v2030_v48 = vmax.f32 %v1958_v42, %v2006_v11  ;;  %3982 = vmatmul.msk.f32.gmra.mxu2 %vm47_vm1, %v2649_v53  ;;  %3991 = vmatmul.msk.f32.gmra.mxu3 %vm47_vm1, %v2649_v53  ;;  %v5848_v22 = vpop.f32.mrf.mxu1  ;;  %v1938_v53 = vadd.f32 %v5621_v20, %v4515_v61  ;;  %v2010_v11 = vmax.f32 %v1986_v21, 0.0 }
 0x211   :  { %2081 = vadd.xlane.f32.xlu0 %v2080_v1  ;;  %v1940_v20 = vadd.f32 %v5610_v56, %v4517_v62  ;;  %v2058_v1 = vmul.f32 %v5712_v17, %v2031_v41  ;;  %v2651_v56 = vld [vmem:[%s6671_s0 + $0x338] sm:$0xff] }
 0x212   :  { %v2056_v50 = vmul.f32 %v5717_v6, %v2029_v4  ;;  %v2057_v45 = vmul.f32 %v5735_v10, %v2030_v48  ;;  %v1962_v59 = vmax.f32 %v1938_v53, 0.0  ;;  %v1942_v53 = vadd.f32 %v5649_v3, %v4508_v58 }
 0x213   :  { %v1870_v31 = vpop.f32.mrf.mxu2  ;;  %v1911_v30 = vpop.f32.mrf.mxu3  ;;  %4009 = vmatmul.msk.f32.gmra.mxu1 %vm47_vm1, %v5853_v60 }
 0x214   :  { %v1984_v23 = vadd.f32 %v1870_v31, %v4508_v58  ;;  %v1985_v35 = vadd.f32 %v1911_v30, %v4517_v62  ;;  %v2083_v15 = vadd.f32 %v2056_v50, %v2055_v52  ;;  %v5871_v18 = vpop.f32.mrf.mxu0  ;;  %v1964_v52 = vmax.f32 %v1940_v20, 0.0 }
 0x215   :  { %v1963_v50 = vmax.f32 %v1939_v55, 0.0  ;;  %v1941_v31 = vadd.f32 %v5647_v51, %v4515_v61  ;;  %v1989_v30 = vadd.f32 %v5640_v49, %v4515_v61  ;;  %v5913_v49 = vld [vmem:[%s6671_s0 + $0x370] sm:$0xff]  ;;  %v1943_v51 = vadd.f32 %v5630_v19, %v4517_v62 }
 0x216   :  { %v2008_v27 = vmax.f32 %v1984_v23, 0.0  ;;  %v2009_v63 = vmax.f32 %v1985_v35, 0.0  ;;  %v2084_v42 = vadd.f32 %v2083_v15, %v2057_v45  ;;  %v2034_v35 = vmax.f32 %v1962_v59, %v2010_v11  ;;  %v5928_v19 = vld [vmem:[%s6671_s0 + $0x30] sm:$0xff] }
 0x217   :  { %4001 = vmatmul.msk.f32.gmra.mxu0 %vm47_vm1, %v2650_v47  ;;  %v1965_v21 = vmax.f32 %v1941_v31, 0.0  ;;  %v1967_v11 = vmax.f32 %v1943_v51, 0.0  ;;  %v2437_v31 = vadd.f32 %v5658_v37, %v4515_v61 }
 0x218   :  { %v2032_v36 = vmax.f32 %v1960_v26, %v2008_v27  ;;  %v2033_v39 = vmax.f32 %v1961_v16, %v2009_v63  ;;  %3983 = vmatmul.msk.f32.gmra.mxu2 %vm47_vm1, %v2650_v47  ;;  %3992 = vmatmul.msk.f32.gmra.mxu3 %vm47_vm1, %v2650_v47  ;;  %v5878_v46 = vpop.f32.mrf.mxu1  ;;  %v2013_v27 = vmax.f32 %v1989_v30, 0.0  ;;  %v2061_v63 = vmul.f32 %v5712_v17, %v2034_v35 }
 0x219   :  { %2085 = vadd.xlane.f32.xlu1 %v2084_v42 }
 0x21a   :  { %v2059_v4 = vmul.f32 %v5717_v6, %v2032_v36  ;;  %v2060_v57 = vmul.f32 %v5735_v10, %v2033_v39 }
 0x21b   :  { %v1873_v48 = vpop.f32.mrf.mxu2  ;;  %v1914_v54 = vpop.f32.mrf.mxu3  ;;  %4010 = vmatmul.msk.f32.gmra.mxu1 %vm47_vm1, %v5883_v44 }
 0x21c   :  { %v1987_v12 = vadd.f32 %v1873_v48, %v4508_v58  ;;  %v1988_v38 = vadd.f32 %v1914_v54, %v4517_v62  ;;  %v2087_v0 = vadd.f32 %v2059_v4, %v2058_v1  ;;  %v5903_v23 = vpop.f32.mrf.mxu0  ;;  %v1966_v1 = vmax.f32 %v1942_v53, 0.0 }
 0x21d   :  { %v2037_v4 = vmax.f32 %v1965_v21, %v2013_v27  ;;  %v5953_v21 = vld [vmem:[%s6671_s0 + $0xa0] sm:$0xff] }
 0x21e   :  { %v2011_v47 = vmax.f32 %v1987_v12, 0.0  ;;  %v2012_v45 = vmax.f32 %v1988_v38, 0.0  ;;  %v2088_v15 = vadd.f32 %v2087_v0, %v2060_v57  ;;  %v2438_v57 = vadd.f32 %v5670_v8, %v4508_v58 }
 0x21f   :  { %4002 = vmatmul.msk.f32.gmra.mxu0 %vm47_vm1, %v2651_v56  ;;  %v2064_v8 = vmul.f32 %v5712_v17, %v2037_v4 }
 0x220   :  { %v2035_v16 = vmax.f32 %v1963_v50, %v2011_v47  ;;  %v2036_v26 = vmax.f32 %v1964_v52, %v2012_v45  ;;  %3984 = vmatmul.msk.f32.gmra.mxu2 %vm47_vm1, %v2651_v56  ;;  %3993 = vmatmul.msk.f32.gmra.mxu3 %vm47_vm1, %v2651_v56  ;;  %v5908_v41 = vpop.f32.mrf.mxu1  ;;  %v2462_v45 = vmax.f32 %v2438_v57, 0.0 }
 0x221   :  { %2089 = vadd.xlane.f32.xlu1 %v2088_v15 }
 0x222   :  { %v2062_v42 = vmul.f32 %v5717_v6, %v2035_v16  ;;  %v2063_v3 = vmul.f32 %v5735_v10, %v2036_v26 }
 0x223   :  { %v1876_v36 = vpop.f32.mrf.mxu2  ;;  %v1917_v39 = vpop.f32.mrf.mxu3  ;;  %4011 = vmatmul.msk.f32.gmra.mxu1 %vm47_vm1, %v5913_v49 }
 0x224   :  { %v1990_v20 = vadd.f32 %v1876_v36, %v4508_v58  ;;  %v1991_v55 = vadd.f32 %v1917_v39, %v4517_v62  ;;  %v2091_v59 = vadd.f32 %v2062_v42, %v2061_v63  ;;  %v2372_v48 = vpop.f32.mrf.mxu0 }
 0x225   :  { %v2486_v38 = vadd.f32 %v2372_v48, %v4508_v58 }
 0x226   :  { %v2014_v54 = vmax.f32 %v1990_v20, 0.0  ;;  %v2015_v12 = vmax.f32 %v1991_v55, 0.0  ;;  %v2092_v56 = vadd.f32 %v2091_v59, %v2063_v3  ;;  %v5963_v20 = vld [vmem:[%s6673_s3 + $0x60] sm:$0xff]  ;;  %v5968_v55 = vld [vmem:[%s6673_s3 + $0x68] sm:$0xff]  ;;  %v5973_v3 = vld [vmem:[%s6673_s3 + $0x70] sm:$0xff] }
 0x227   :  { %4031 = vmatmul.msk.f32.vlgmr.msrb.gmra.mxu0 %vm47_vm1, %v5928_v19  ;;  %v2510_v30 = vmax.f32 %v2486_v38, 0.0 }
 0x228   :  { %v2038_v0 = vmax.f32 %v1966_v1, %v2014_v54  ;;  %v2039_v52 = vmax.f32 %v1967_v11, %v2015_v12  ;;  %4013 = vmatmul.msk.f32.vlgmr.msrb.gmra.mxu2 %vm47_vm1, %v5675_v29  ;;  %4022 = vmatmul.msk.f32.vlgmr.msrb.gmra.mxu3 %vm47_vm1, %v5675_v29  ;;  %v2413_v50 = vpop.f32.mrf.mxu1  ;;  %v2440_v1 = vadd.f32 %v5702_v40, %v4515_v61 }
 0x229   :  { %2093 = vadd.xlane.f32.xlu2 %v2092_v56  ;;  %v2487_v35 = vadd.f32 %v2413_v50, %v4517_v62  ;;  %v2534_v53 = vmax.f32 %v2462_v45, %v2510_v30  ;;  %v5992_v50 = vld [vmem:[%s6671_s0 + $0x110] sm:$0xff] }
 0x22a   :  { %v2065_v47 = vmul.f32 %v5717_v6, %v2038_v0  ;;  %v2066_v29 = vmul.f32 %v5735_v10, %v2039_v52  ;;  %v2461_v6 = vmax.f32 %v2437_v31, 0.0  ;;  %v2441_v10 = vadd.f32 %v5721_v24, %v4508_v58 }
 0x22b   :  { %v2266_v15 = vpop.f32.mrf.mxu2  ;;  %v2331_v16 = vpop.f32.mrf.mxu3  ;;  %4040 = vmatmul.msk.f32.vlgmr.msrb.gmra.mxu1 %vm47_vm1, %v5928_v19  ;;  %v2511_v51 = vmax.f32 %v2487_v35, 0.0  ;;  %v2561_v12 = vmul.f32 %v5968_v55, %v2534_v53  ;;  %v2464_v30 = vmax.f32 %v2440_v1, 0.0 }
 0x22c   :  { %v2439_v26 = vadd.f32 %v2266_v15, %v4517_v62  ;;  %v2485_v37 = vadd.f32 %v2331_v16, %v4515_v61  ;;  %v2095_v17 = vadd.f32 %v2065_v47, %v2064_v8  ;;  %v2375_v27 = vpop.f32.mrf.mxu0  ;;  %v2465_v56 = vmax.f32 %v2441_v10, 0.0 }
 0x22d   :  { %v2489_v36 = vadd.f32 %v2375_v27, %v4508_v58 }
 0x22e   :  { %v2463_v63 = vmax.f32 %v2439_v26, 0.0  ;;  %v2509_v42 = vmax.f32 %v2485_v37, 0.0  ;;  %v2096_v39 = vadd.f32 %v2095_v17, %v2066_v29  ;;  %v2444_v29 = vadd.f32 %v5758_v13, %v4508_v58 }
 0x22f   :  { %4032 = vmatmul.msk.f32.gmra.mxu0 %vm47_vm1, %v5953_v21  ;;  %v2513_v4 = vmax.f32 %v2489_v36, 0.0  ;;  %v2443_v17 = vadd.f32 %v5751_v34, %v4515_v61 }
 0x230   :  { %v2533_v59 = vmax.f32 %v2461_v6, %v2509_v42  ;;  %v2535_v24 = vmax.f32 %v2463_v63, %v2511_v51  ;;  %4014 = vmatmul.msk.f32.gmra.mxu2 %vm47_vm1, %v5726_v5  ;;  %4023 = vmatmul.msk.f32.gmra.mxu3 %vm47_vm1, %v5726_v5  ;;  %v2416_v11 = vpop.f32.mrf.mxu1  ;;  %v2468_v42 = vmax.f32 %v2444_v29, 0.0 }
 0x231   :  { %2097 = vadd.xlane.f32.xlu2 %v2096_v39  ;;  %v2490_v48 = vadd.f32 %v2416_v11, %v4517_v62  ;;  %v2537_v35 = vmax.f32 %v2465_v56, %v2513_v4  ;;  %v2467_v11 = vmax.f32 %v2443_v17, 0.0  ;;  %v2447_v56 = vadd.f32 %v5788_v33, %v4508_v58 }
 0x232   :  { %v2560_v54 = vmul.f32 %v5963_v20, %v2533_v59  ;;  %v2562_v38 = vmul.f32 %v5973_v3, %v2535_v24  ;;  %v6016_v59 = vld [vmem:[%s6671_s0 + $0x180] sm:$0xff] }
 0x233   :  { %v2269_v57 = vpop.f32.mrf.mxu2  ;;  %v2334_v0 = vpop.f32.mrf.mxu3  ;;  %4041 = vmatmul.msk.f32.gmra.mxu1 %vm47_vm1, %v5953_v21  ;;  %v2514_v52 = vmax.f32 %v2490_v48, 0.0  ;;  %v2564_v27 = vmul.f32 %v5968_v55, %v2537_v35 }
 0x234   :  { %v2442_v5 = vadd.f32 %v2269_v57, %v4517_v62  ;;  %v2488_v40 = vadd.f32 %v2334_v0, %v4515_v61  ;;  %v2584_v31 = vadd.f32 %v2561_v12, %v2560_v54  ;;  %v2378_v8 = vpop.f32.mrf.mxu0 }
 0x235   :  { %v2492_v15 = vadd.f32 %v2378_v8, %v4508_v58  ;;  %v2471_v8 = vmax.f32 %v2447_v56, 0.0 }
 0x236   :  { %v2466_v47 = vmax.f32 %v2442_v5, 0.0  ;;  %v2512_v45 = vmax.f32 %v2488_v40, 0.0  ;;  %v2585_v16 = vadd.f32 %v2584_v31, %v2562_v38  ;;  %v2446_v40 = vadd.f32 %v5783_v43, %v4515_v61 }
 0x237   :  { %4033 = vmatmul.msk.f32.gmra.mxu0 %vm47_vm1, %v5992_v50  ;;  %v2516_v6 = vmax.f32 %v2492_v15, 0.0 }
 0x238   :  { %v2536_v26 = vmax.f32 %v2464_v30, %v2512_v45  ;;  %v2538_v37 = vmax.f32 %v2466_v47, %v2514_v52  ;;  %4015 = vmatmul.msk.f32.gmra.mxu2 %vm47_vm1, %v5763_v2  ;;  %4024 = vmatmul.msk.f32.gmra.mxu3 %vm47_vm1, %v5763_v2  ;;  %v2419_v51 = vpop.f32.mrf.mxu1 }
 0x239   :  { %2586 = vadd.xlane.f32.xlu1 %v2585_v16  ;;  %v2493_v53 = vadd.f32 %v2419_v51, %v4517_v62  ;;  %v2540_v1 = vmax.f32 %v2468_v42, %v2516_v6  ;;  %v6040_v16 = vld [vmem:[%s6671_s0 + $0x1f0] sm:$0xff] }
 0x23a   :  { %v2563_v13 = vmul.f32 %v5963_v20, %v2536_v26  ;;  %v2565_v63 = vmul.f32 %v5973_v3, %v2538_v37  ;;  %v2470_v26 = vmax.f32 %v2446_v40, 0.0 }
 0x23b   :  { %v2272_v36 = vpop.f32.mrf.mxu2  ;;  %v2337_v39 = vpop.f32.mrf.mxu3  ;;  %4042 = vmatmul.msk.f32.gmra.mxu1 %vm47_vm1, %v5992_v50  ;;  %v2517_v10 = vmax.f32 %v2493_v53, 0.0  ;;  %v2567_v30 = vmul.f32 %v5968_v55, %v2540_v1 }
 0x23c   :  { %v2445_v2 = vadd.f32 %v2272_v36, %v4517_v62  ;;  %v2491_v34 = vadd.f32 %v2337_v39, %v4515_v61  ;;  %v2588_v24 = vadd.f32 %v2564_v27, %v2563_v13  ;;  %v2381_v4 = vpop.f32.mrf.mxu0  ;;  %v2450_v27 = vadd.f32 %v5818_v32, %v4508_v58 }
 0x23d   :  { %v2495_v12 = vadd.f32 %v2381_v4, %v4508_v58  ;;  %v2449_v39 = vadd.f32 %v5811_v25, %v4515_v61 }
 0x23e   :  { %v2469_v48 = vmax.f32 %v2445_v2, 0.0  ;;  %v2515_v54 = vmax.f32 %v2491_v34, 0.0  ;;  %v2589_v38 = vadd.f32 %v2588_v24, %v2565_v63 }
 0x23f   :  { %4034 = vmatmul.msk.f32.gmra.mxu0 %vm47_vm1, %v6016_v59  ;;  %v2519_v52 = vmax.f32 %v2495_v12, 0.0 }
 0x240   :  { %v2539_v57 = vmax.f32 %v2467_v11, %v2515_v54  ;;  %v2541_v0 = vmax.f32 %v2469_v48, %v2517_v10  ;;  %4016 = vmatmul.msk.f32.gmra.mxu2 %vm47_vm1, %v5793_v7  ;;  %4025 = vmatmul.msk.f32.gmra.mxu3 %vm47_vm1, %v5793_v7  ;;  %v2422_v5 = vpop.f32.mrf.mxu1  ;;  %v2474_v11 = vmax.f32 %v2450_v27, 0.0  ;;  %v6064_v54 = vld [vmem:[%s6671_s0 + $0x260] sm:$0xff] }
 0x241   :  { %2590 = vadd.xlane.f32.xlu2 %v2589_v38  ;;  %v2496_v31 = vadd.f32 %v2422_v5, %v4517_v62  ;;  %v2543_v37 = vmax.f32 %v2471_v8, %v2519_v52  ;;  %v2473_v38 = vmax.f32 %v2449_v39, 0.0  ;;  %v2452_v8 = vadd.f32 %v5843_v9, %v4515_v61 }
 0x242   :  { %v2566_v33 = vmul.f32 %v5963_v20, %v2539_v57  ;;  %v2568_v35 = vmul.f32 %v5973_v3, %v2541_v0  ;;  %v2456_v39 = vadd.f32 %v5878_v46, %v4508_v58 }
 0x243   :  { %v2275_v47 = vpop.f32.mrf.mxu2  ;;  %v2340_v45 = vpop.f32.mrf.mxu3  ;;  %4043 = vmatmul.msk.f32.gmra.mxu1 %vm47_vm1, %v6016_v59  ;;  %v2520_v15 = vmax.f32 %v2496_v31, 0.0  ;;  %v2570_v10 = vmul.f32 %v5968_v55, %v2543_v37  ;;  %v2453_v31 = vadd.f32 %v5848_v22, %v4508_v58 }
 0x244   :  { %v2448_v7 = vadd.f32 %v2275_v47, %v4517_v62  ;;  %v2494_v43 = vadd.f32 %v2340_v45, %v4515_v61  ;;  %v2592_v29 = vadd.f32 %v2567_v30, %v2566_v33  ;;  %v2384_v51 = vpop.f32.mrf.mxu0 }
 0x245   :  { %v2498_v53 = vadd.f32 %v2384_v51, %v4508_v58  ;;  %v6088_v51 = vld [vmem:[%s6671_s0 + $0x2d0] sm:$0xff] }
 0x246   :  { %v2472_v17 = vmax.f32 %v2448_v7, 0.0  ;;  %v2518_v6 = vmax.f32 %v2494_v43, 0.0  ;;  %v2593_v13 = vadd.f32 %v2592_v29, %v2568_v35 }
 0x247   :  { %4035 = vmatmul.msk.f32.gmra.mxu0 %vm47_vm1, %v6040_v16  ;;  %v2522_v2 = vmax.f32 %v2498_v53, 0.0 }
 0x248   :  { %v2542_v63 = vmax.f32 %v2470_v26, %v2518_v6  ;;  %v2544_v42 = vmax.f32 %v2472_v17, %v2520_v15  ;;  %4017 = vmatmul.msk.f32.gmra.mxu2 %vm47_vm1, %v5823_v28  ;;  %4026 = vmatmul.msk.f32.gmra.mxu3 %vm47_vm1, %v5823_v28  ;;  %v2425_v36 = vpop.f32.mrf.mxu1  ;;  %v2477_v15 = vmax.f32 %v2453_v31, 0.0  ;;  %v2476_v6 = vmax.f32 %v2452_v8, 0.0 }
 0x249   :  { %2594 = vadd.xlane.f32.xlu2 %v2593_v13  ;;  %v2499_v34 = vadd.f32 %v2425_v36, %v4517_v62  ;;  %v2546_v56 = vmax.f32 %v2474_v11, %v2522_v2 }
 0x24a   :  { %v2569_v32 = vmul.f32 %v5963_v20, %v2542_v63  ;;  %v2571_v24 = vmul.f32 %v5973_v3, %v2544_v42 }
 0x24b   :  { %v2278_v1 = vpop.f32.mrf.mxu2  ;;  %v2343_v4 = vpop.f32.mrf.mxu3  ;;  %4044 = vmatmul.msk.f32.gmra.mxu1 %vm47_vm1, %v6040_v16  ;;  %v2523_v48 = vmax.f32 %v2499_v34, 0.0  ;;  %v2573_v7 = vmul.f32 %v5968_v55, %v2546_v56 }
 0x24c   :  { %v2451_v28 = vadd.f32 %v2278_v1, %v4517_v62  ;;  %v2497_v25 = vadd.f32 %v2343_v4, %v4515_v61  ;;  %v2596_v12 = vadd.f32 %v2570_v10, %v2569_v32  ;;  %v2387_v57 = vpop.f32.mrf.mxu0  ;;  %v2455_v10 = vadd.f32 %v5871_v18, %v4515_v61 }
 0x24d   :  { %v2501_v40 = vadd.f32 %v2387_v57, %v4508_v58 }
 0x24e   :  { %v2475_v0 = vmax.f32 %v2451_v28, 0.0  ;;  %v2521_v5 = vmax.f32 %v2497_v25, 0.0  ;;  %v2597_v52 = vadd.f32 %v2596_v12, %v2571_v24  ;;  %v2480_v28 = vmax.f32 %v2456_v39, 0.0 }
 0x24f   :  { %4036 = vmatmul.msk.f32.gmra.mxu0 %vm47_vm1, %v6064_v54  ;;  %v2525_v47 = vmax.f32 %v2501_v40, 0.0  ;;  %v2479_v57 = vmax.f32 %v2455_v10, 0.0 }
 0x250   :  { %v2545_v33 = vmax.f32 %v2473_v38, %v2521_v5  ;;  %v2547_v30 = vmax.f32 %v2475_v0, %v2523_v48  ;;  %4018 = vmatmul.msk.f32.gmra.mxu2 %vm47_vm1, %v5853_v60  ;;  %4027 = vmatmul.msk.f32.gmra.mxu3 %vm47_vm1, %v5853_v60  ;;  %v2428_v35 = vpop.f32.mrf.mxu1  ;;  %v6112_v38 = vld [vmem:[%s6671_s0 + $0x340] sm:$0xff] }
 0x251   :  { %2598 = vadd.xlane.f32.xlu2 %v2597_v52  ;;  %v2502_v45 = vadd.f32 %v2428_v35, %v4517_v62  ;;  %v2549_v53 = vmax.f32 %v2477_v15, %v2525_v47 }
 0x252   :  { %v2572_v22 = vmul.f32 %v5963_v20, %v2545_v33  ;;  %v2574_v43 = vmul.f32 %v5973_v3, %v2547_v30  ;;  %v2459_v30 = vadd.f32 %v5908_v41, %v4508_v58 }
 0x253   :  { %v2281_v29 = vpop.f32.mrf.mxu2  ;;  %v2346_v26 = vpop.f32.mrf.mxu3  ;;  %4045 = vmatmul.msk.f32.gmra.mxu1 %vm47_vm1, %v6064_v54  ;;  %v2526_v37 = vmax.f32 %v2502_v45, 0.0  ;;  %v2576_v1 = vmul.f32 %v5968_v55, %v2549_v53  ;;  %v2458_v45 = vadd.f32 %v5903_v23, %v4515_v61 }
 0x254   :  { %v2454_v60 = vadd.f32 %v2281_v29, %v4517_v62  ;;  %v2500_v9 = vadd.f32 %v2346_v26, %v4515_v61  ;;  %v2600_v17 = vadd.f32 %v2573_v7, %v2572_v22  ;;  %v2390_v13 = vpop.f32.mrf.mxu0  ;;  %v2483_v29 = vmax.f32 %v2459_v30, 0.0 }
 0x255   :  { %v2504_v42 = vadd.f32 %v2390_v13, %v4508_v58 }
 0x256   :  { %v2478_v27 = vmax.f32 %v2454_v60, 0.0  ;;  %v2524_v63 = vmax.f32 %v2500_v9, 0.0  ;;  %v2601_v36 = vadd.f32 %v2600_v17, %v2574_v43 }
 0x257   :  { %4037 = vmatmul.msk.f32.gmra.mxu0 %vm47_vm1, %v6088_v51  ;;  %v2528_v24 = vmax.f32 %v2504_v42, 0.0 }
 0x258   :  { %v2548_v2 = vmax.f32 %v2476_v6, %v2524_v63  ;;  %v2550_v34 = vmax.f32 %v2478_v27, %v2526_v37  ;;  %4019 = vmatmul.msk.f32.gmra.mxu2 %vm47_vm1, %v5883_v44  ;;  %4028 = vmatmul.msk.f32.gmra.mxu3 %vm47_vm1, %v5883_v44  ;;  %v2431_v32 = vpop.f32.mrf.mxu1  ;;  %v3169_v37 = vld [vmem:[%s6671_s0 + $0x68] sm:$0xff]  ;;  %v2482_v6 = vmax.f32 %v2458_v45, 0.0 }
 0x259   :  { %2602 = vadd.xlane.f32.xlu0 %v2601_v36  ;;  %v2505_v11 = vadd.f32 %v2431_v32, %v4517_v62  ;;  %v2552_v0 = vmax.f32 %v2480_v28, %v2528_v24  ;;  %v3171_v28 = vld [vmem:[%s6671_s0 + $0x148] sm:$0xff] }
 0x25a   :  { %v2575_v46 = vmul.f32 %v5963_v20, %v2548_v2  ;;  %v2577_v4 = vmul.f32 %v5973_v3, %v2550_v34 }
 0x25b   :  { %v2284_v25 = vpop.f32.mrf.mxu2  ;;  %v2349_v48 = vpop.f32.mrf.mxu3  ;;  %4046 = vmatmul.msk.f32.gmra.mxu1 %vm47_vm1, %v6088_v51  ;;  %v2529_v12 = vmax.f32 %v2505_v11, 0.0  ;;  %v2579_v43 = vmul.f32 %v5968_v55, %v2552_v0  ;;  %v3173_v0 = vld [vmem:[%s6671_s0 + $0x228] sm:$0xff] }
 0x25c   :  { %v2457_v44 = vadd.f32 %v2284_v25, %v4517_v62  ;;  %v2503_v18 = vadd.f32 %v2349_v48, %v4515_v61  ;;  %v2604_v56 = vadd.f32 %v2576_v1, %v2575_v46  ;;  %v2393_v5 = vpop.f32.mrf.mxu0  ;;  %v3170_v46 = vld [vmem:[%s6671_s0 + $0xd8] sm:$0xff] }
 0x25d   :  { %v2507_v31 = vadd.f32 %v2393_v5, %v4508_v58 }
 0x25e   :  { %v2481_v40 = vmax.f32 %v2457_v44, 0.0  ;;  %v2527_v52 = vmax.f32 %v2503_v18, 0.0  ;;  %v2605_v33 = vadd.f32 %v2604_v56, %v2577_v4  ;;  %v3172_v18 = vld [vmem:[%s6671_s0 + $0x1b8] sm:$0xff] }
 0x25f   :  { %4038 = vmatmul.msk.f32.gmra.mxu0 %vm47_vm1, %v6112_v38  ;;  %v2531_v7 = vmax.f32 %v2507_v31, 0.0  ;;  %v3174_v31 = vld [vmem:[%s6671_s0 + $0x298] sm:$0xff] }
 0x260   :  { %v2551_v35 = vmax.f32 %v2479_v57, %v2527_v52  ;;  %v2553_v8 = vmax.f32 %v2481_v40, %v2529_v12  ;;  %4020 = vmatmul.msk.f32.gmra.mxu2 %vm47_vm1, %v5913_v49  ;;  %4029 = vmatmul.msk.f32.gmra.mxu3 %vm47_vm1, %v5913_v49  ;;  %v2434_v47 = vpop.f32.mrf.mxu1 }
 0x261   :  { %2606 = vadd.xlane.f32.xlu0 %v2605_v33  ;;  %v2508_v22 = vadd.f32 %v2434_v47, %v4517_v62  ;;  %v2555_v13 = vmax.f32 %v2483_v29, %v2531_v7  ;;  %v3176_v7 = vld [vmem:[%s6671_s0 + $0x378] sm:$0xff] }
 0x262   :  { %v2578_v41 = vmul.f32 %v5963_v20, %v2551_v35  ;;  %v2580_v15 = vmul.f32 %v5973_v3, %v2553_v8  ;;  %v3175_v8 = vld [vmem:[%s6671_s0 + $0x308] sm:$0xff] }
 0x263   :  { %v2287_v26 = vpop.f32.mrf.mxu2  ;;  %v2352_v60 = vpop.f32.mrf.mxu3  ;;  %4047 = vmatmul.msk.f32.gmra.mxu1 %vm47_vm1, %v6112_v38  ;;  %v2532_v9 = vmax.f32 %v2508_v22, 0.0  ;;  %v2582_v32 = vmul.f32 %v5968_v55, %v2555_v13 }
 0x264   :  { %v2460_v49 = vadd.f32 %v2287_v26, %v4517_v62  ;;  %v2506_v23 = vadd.f32 %v2352_v60, %v4515_v61  ;;  %v2608_v17 = vadd.f32 %v2579_v43, %v2578_v41  ;;  %v6136_v53 = vpop.f32.mrf.mxu0 }
 0x266   :  { %v2484_v27 = vmax.f32 %v2460_v49, 0.0  ;;  %v2530_v63 = vmax.f32 %v2506_v23, 0.0  ;;  %v2609_v42 = vadd.f32 %v2608_v17, %v2580_v15  ;;  %v2956_v23 = vadd.f32 %v6136_v53, %v4517_v62 }
 0x267   :  { %4067 = vmatmul.msk.f32.vlgmr.msra.gmra.mxu0 %vm47_vm1, %v3169_v37 }
 0x268   :  { %v2554_v36 = vmax.f32 %v2482_v6, %v2530_v63  ;;  %v2556_v39 = vmax.f32 %v2484_v27, %v2532_v9  ;;  %4058 = vmatmul.msk.f32.vlgmr.msra.gmra.mxu3 %vm47_vm1, %v3169_v37  ;;  %2610 = vadd.xlane.f32.xlu1 %v2609_v42  ;;  %v6140_v2 = vpop.f32.mrf.mxu1  ;;  %v2980_v63 = vmax.f32 %v2956_v23, 0.0 }
 0x269   :  { %4049 = vmatmul.msk.f32.vlgmr.msra.gmra.mxu2 %vm47_vm1, %v5928_v19  ;;  %v3002_v60 = vadd.f32 %v6140_v2, %v4515_v61 }
 0x26a   :  { %v2581_v34 = vmul.f32 %v5963_v20, %v2554_v36  ;;  %v2583_v10 = vmul.f32 %v5973_v3, %v2556_v39 }
 0x26b   :  { %v6147_v24 = vpop.f32.mrf.mxu2  ;;  %v6149_v11 = vpop.f32.mrf.mxu3  ;;  %4076 = vmatmul.msk.f32.vlgmr.msra.gmra.mxu1 %vm47_vm1, %v3169_v37  ;;  %v3026_v37 = vmax.f32 %v3002_v60, 0.0 }
 0x26c   :  { %v2612_v1 = vadd.f32 %v2582_v32, %v2581_v34  ;;  %v6155_v4 = vpop.f32.mrf.mxu0  ;;  %v2954_v26 = vadd.f32 %v6147_v24, %v4515_v61  ;;  %v2955_v9 = vadd.f32 %v6149_v11, %v4508_v58  ;;  %v6292_v24 = vld [vmem:[%s6673_s3 + $0x80] sm:$0xff] }
 0x26e   :  { %v2613_v19 = vadd.f32 %v2612_v1, %v2583_v10  ;;  %v2979_v53 = vmax.f32 %v2955_v9, 0.0  ;;  %v6287_v10 = vld [vmem:[%s6673_s3 + $0x78] sm:$0xff] }
 0x26f   :  { %4068 = vmatmul.msk.f32.gmra.mxu0 %vm47_vm1, %v3170_v46 }
 0x270   :  { %4059 = vmatmul.msk.f32.gmra.mxu3 %vm47_vm1, %v3170_v46  ;;  %2614 = vadd.xlane.f32.xlu1 %v2613_v19  ;;  %v6159_v20 = vpop.f32.mrf.mxu1  ;;  %v2959_v19 = vadd.f32 %v6155_v4, %v4517_v62 }
 0x271   :  { %4050 = vmatmul.msk.f32.gmra.mxu2 %vm47_vm1, %v5953_v21  ;;  %v3005_v36 = vadd.f32 %v6159_v20, %v4515_v61 }
 0x273   :  { %v6163_v55 = vpop.f32.mrf.mxu2  ;;  %v6165_v3 = vpop.f32.mrf.mxu3  ;;  %4077 = vmatmul.msk.f32.gmra.mxu1 %vm47_vm1, %v3170_v46 }
 0x274   :  { %v6171_v25 = vpop.f32.mrf.mxu0  ;;  %v2957_v42 = vadd.f32 %v6163_v55, %v4515_v61  ;;  %v2958_v55 = vadd.f32 %v6165_v3, %v4508_v58  ;;  %v2983_v3 = vmax.f32 %v2959_v19, 0.0 }
 0x276   :  { %v2981_v20 = vmax.f32 %v2957_v42, 0.0 }
 0x277   :  { %4069 = vmatmul.msk.f32.gmra.mxu0 %vm47_vm1, %v3171_v28 }
 0x278   :  { %4060 = vmatmul.msk.f32.gmra.mxu3 %vm47_vm1, %v3171_v28  ;;  %v6175_v48 = vpop.f32.mrf.mxu1 }
 0x279   :  { %4051 = vmatmul.msk.f32.gmra.mxu2 %vm47_vm1, %v5992_v50 }
 0x27b   :  { %v6179_v21 = vpop.f32.mrf.mxu2  ;;  %v6181_v44 = vpop.f32.mrf.mxu3  ;;  %4078 = vmatmul.msk.f32.gmra.mxu1 %vm47_vm1, %v3171_v28  ;;  %v3029_v28 = vmax.f32 %v3005_v36, 0.0 }
 0x27c   :  { %v6187_v12 = vpop.f32.mrf.mxu0 }
 0x27d   :  { %v3053_v9 = vmax.f32 %v2981_v20, %v3029_v28 }
 0x27f   :  { %4070 = vmatmul.msk.f32.gmra.mxu0 %vm47_vm1, %v3172_v18 }
 0x280   :  { %4061 = vmatmul.msk.f32.gmra.mxu3 %vm47_vm1, %v3172_v18  ;;  %v6191_v56 = vpop.f32.mrf.mxu1 }
 0x281   :  { %4052 = vmatmul.msk.f32.gmra.mxu2 %vm47_vm1, %v6016_v59 }
 0x283   :  { %v6195_v50 = vpop.f32.mrf.mxu2  ;;  %v6197_v57 = vpop.f32.mrf.mxu3  ;;  %4079 = vmatmul.msk.f32.gmra.mxu1 %vm47_vm1, %v3172_v18  ;;  %v6303_v18 = vld [vmem:[%s6673_s3 + $0x88] sm:$0xff] }
 0x284   :  { %v6203_v5 = vpop.f32.mrf.mxu0 }
 0x287   :  { %4071 = vmatmul.msk.f32.gmra.mxu0 %vm47_vm1, %v3173_v0 }
 0x288   :  { %4062 = vmatmul.msk.f32.gmra.mxu3 %vm47_vm1, %v3173_v0  ;;  %v6207_v40 = vpop.f32.mrf.mxu1 }
 0x289   :  { %4053 = vmatmul.msk.f32.gmra.mxu2 %vm47_vm1, %v6040_v16 }
 0x28b   :  { %v6211_v59 = vpop.f32.mrf.mxu2  ;;  %v6213_v52 = vpop.f32.mrf.mxu3  ;;  %4080 = vmatmul.msk.f32.gmra.mxu1 %vm47_vm1, %v3173_v0 }
 0x28c   :  { %v6219_v33 = vpop.f32.mrf.mxu0 }
 0x28f   :  { %4072 = vmatmul.msk.f32.gmra.mxu0 %vm47_vm1, %v3174_v31 }
 0x290   :  { %4063 = vmatmul.msk.f32.gmra.mxu3 %vm47_vm1, %v3174_v31  ;;  %v6223_v30 = vpop.f32.mrf.mxu1 }
 0x291   :  { %4054 = vmatmul.msk.f32.gmra.mxu2 %vm47_vm1, %v6064_v54 }
 0x293   :  { %v6227_v16 = vpop.f32.mrf.mxu2  ;;  %v6229_v35 = vpop.f32.mrf.mxu3  ;;  %4081 = vmatmul.msk.f32.gmra.mxu1 %vm47_vm1, %v3174_v31 }
 0x294   :  { %v6235_v47 = vpop.f32.mrf.mxu0 }
 0x297   :  { %4073 = vmatmul.msk.f32.gmra.mxu0 %vm47_vm1, %v3175_v8 }
 0x298   :  { %4064 = vmatmul.msk.f32.gmra.mxu3 %vm47_vm1, %v3175_v8  ;;  %v6239_v45 = vpop.f32.mrf.mxu1 }
 0x299   :  { %4055 = vmatmul.msk.f32.gmra.mxu2 %vm47_vm1, %v6088_v51 }
 0x29b   :  { %v6243_v54 = vpop.f32.mrf.mxu2  ;;  %v6245_v22 = vpop.f32.mrf.mxu3  ;;  %4082 = vmatmul.msk.f32.gmra.mxu1 %vm47_vm1, %v3175_v8 }
 0x29c   :  { %v6251_v41 = vpop.f32.mrf.mxu0 }
 0x29f   :  { %4074 = vmatmul.msk.f32.gmra.mxu0 %vm47_vm1, %v3176_v7 }
 0x2a0   :  { %4065 = vmatmul.msk.f32.gmra.mxu3 %vm47_vm1, %v3176_v7  ;;  %v6255_v43 = vpop.f32.mrf.mxu1 }
 0x2a1   :  { %4056 = vmatmul.msk.f32.gmra.mxu2 %vm47_vm1, %v6112_v38  ;;  %v2978_v38 = vmax.f32 %v2954_v26, 0.0 }
 0x2a3   :  { %v6259_v51 = vpop.f32.mrf.mxu2  ;;  %v6261_v15 = vpop.f32.mrf.mxu3  ;;  %4083 = vmatmul.msk.f32.gmra.mxu1 %vm47_vm1, %v3176_v7  ;;  %v3050_v2 = vmax.f32 %v2978_v38, %v3026_v37  ;;  %v2982_v38 = vmax.f32 %v2958_v55, 0.0  ;;  %v3008_v37 = vadd.f32 %v6175_v48, %v4515_v61  ;;  %v3080_v48 = vmul.f32 %v6287_v10, %v3053_v9 }
 0x2a4   :  { %v6264_v29 = vpop.f32.mrf.mxu0 }
 0x2a5   :  { %v3077_v0 = vmul.f32 %v6287_v10, %v3050_v2  ;;  %v2962_v2 = vadd.f32 %v6171_v25, %v4517_v62 }
 0x2a8   :  { %v6270_v49 = vpop.f32.mrf.mxu1 }
 0x2ab   :  { %v2889_v17 = vpop.f32.mrf.mxu2  ;;  %v2930_v6 = vpop.f32.mrf.mxu3 }
 0x2ac   :  { %v3003_v13 = vadd.f32 %v2889_v17, %v4508_v58  ;;  %v3004_v27 = vadd.f32 %v2930_v6, %v4517_v62  ;;  %v6282_v39 = vpop.f32.mrf.mxu0  ;;  %v2960_v6 = vadd.f32 %v6179_v21, %v4515_v61 }
 0x2ae   :  { %v3027_v34 = vmax.f32 %v3003_v13, 0.0  ;;  %v3028_v32 = vmax.f32 %v3004_v27, 0.0 }
 0x2b0   :  { %v3051_v11 = vmax.f32 %v2979_v53, %v3027_v34  ;;  %v3052_v46 = vmax.f32 %v2980_v63, %v3028_v32  ;;  %v6294_v1 = vpop.f32.mrf.mxu1  ;;  %v2961_v34 = vadd.f32 %v6181_v44, %v4508_v58  ;;  %v2984_v32 = vmax.f32 %v2960_v6, 0.0 }
 0x2b1   :  { %v2963_v44 = vadd.f32 %v6195_v50, %v4515_v61  ;;  %v2964_v50 = vadd.f32 %v6197_v57, %v4508_v58  ;;  %v3014_v57 = vadd.f32 %v6207_v40, %v4515_v61 }
 0x2b2   :  { %v3078_v31 = vmul.f32 %v6292_v24, %v3051_v11  ;;  %v3079_v60 = vmul.f32 %v6303_v18, %v3052_v46  ;;  %v3032_v11 = vmax.f32 %v3008_v37, 0.0  ;;  %v2985_v25 = vmax.f32 %v2961_v34, 0.0 }
 0x2b3   :  { %v2892_v8 = vpop.f32.mrf.mxu2  ;;  %v2933_v7 = vpop.f32.mrf.mxu3  ;;  %v2965_v37 = vadd.f32 %v6187_v12, %v4517_v62  ;;  %v2987_v6 = vmax.f32 %v2963_v44, 0.0  ;;  %v2988_v12 = vmax.f32 %v2964_v50, 0.0  ;;  %v2967_v44 = vadd.f32 %v6213_v52, %v4508_v58 }
 0x2b4   :  { %v3006_v26 = vadd.f32 %v2892_v8, %v4508_v58  ;;  %v3007_v4 = vadd.f32 %v2933_v7, %v4517_v62  ;;  %v3101_v23 = vadd.f32 %v3078_v31, %v3077_v0  ;;  %v6312_v17 = vpop.f32.mrf.mxu0  ;;  %v2986_v31 = vmax.f32 %v2962_v2, 0.0 }
 0x2b5   :  { %v3011_v8 = vadd.f32 %v6191_v56, %v4515_v61  ;;  %v2969_v52 = vadd.f32 %v6227_v16, %v4515_v61  ;;  %v3017_v50 = vadd.f32 %v6223_v30, %v4515_v61  ;;  %v2970_v16 = vadd.f32 %v6229_v35, %v4508_v58 }
 0x2b6   :  { %v3030_v13 = vmax.f32 %v3006_v26, 0.0  ;;  %v3031_v27 = vmax.f32 %v3007_v4, 0.0  ;;  %v3102_v63 = vadd.f32 %v3101_v23, %v3079_v60  ;;  %v3056_v26 = vmax.f32 %v2984_v32, %v3032_v11 }
 0x2b7   :  { %v2989_v32 = vmax.f32 %v2965_v37, 0.0  ;;  %v3020_v35 = vadd.f32 %v6239_v45, %v4515_v61  ;;  %v6390_v45 = vpop.xlane.xlu2 %573 }
 0x2b8   :  { %v3054_v42 = vmax.f32 %v2982_v38, %v3030_v13  ;;  %v3055_v36 = vmax.f32 %v2983_v3, %v3031_v27  ;;  %3103 = vadd.xlane.f32.xlu0 %v3102_v63  ;;  %v6316_v53 = vpop.f32.mrf.mxu1  ;;  %v3035_v13 = vmax.f32 %v3011_v8, 0.0  ;;  %v3083_v56 = vmul.f32 %v6287_v10, %v3056_v26 }
 0x2b9   :  { %v3038_v26 = vmax.f32 %v3014_v57, 0.0 }
 0x2ba   :  { %v3081_v21 = vmul.f32 %v6292_v24, %v3054_v42  ;;  %v3082_v28 = vmul.f32 %v6303_v18, %v3055_v36  ;;  %v3059_v11 = vmax.f32 %v2987_v6, %v3035_v13 }
 0x2bb   :  { %v2895_v46 = vpop.f32.mrf.mxu2  ;;  %v2936_v19 = vpop.f32.mrf.mxu3 }
 0x2bc   :  { %v3009_v20 = vadd.f32 %v2895_v46, %v4508_v58  ;;  %v3010_v55 = vadd.f32 %v2936_v19, %v4517_v62  ;;  %v3105_v0 = vadd.f32 %v3081_v21, %v3080_v48  ;;  %v6331_v7 = vpop.f32.mrf.mxu0  ;;  %v2966_v46 = vadd.f32 %v6211_v59, %v4515_v61 }
 0x2bd   :  { %v3086_v40 = vmul.f32 %v6287_v10, %v3059_v11 }
 0x2be   :  { %v3033_v4 = vmax.f32 %v3009_v20, 0.0  ;;  %v3034_v60 = vmax.f32 %v3010_v55, 0.0  ;;  %v3106_v23 = vadd.f32 %v3105_v0, %v3082_v28  ;;  %v2990_v8 = vmax.f32 %v2966_v46, 0.0 }
 0x2c0   :  { %v3057_v3 = vmax.f32 %v2985_v25, %v3033_v4  ;;  %v3058_v38 = vmax.f32 %v2986_v31, %v3034_v60  ;;  %3107 = vadd.xlane.f32.xlu1 %v3106_v23  ;;  %v6333_v9 = vpop.f32.mrf.mxu1  ;;  %v2968_v25 = vadd.f32 %v6203_v5, %v4517_v62  ;;  %v2991_v5 = vmax.f32 %v2967_v44, 0.0 }
 0x2c2   :  { %v3084_v27 = vmul.f32 %v6292_v24, %v3057_v3  ;;  %v3085_v34 = vmul.f32 %v6303_v18, %v3058_v38  ;;  %v2992_v6 = vmax.f32 %v2968_v25, 0.0 }
 0x2c3   :  { %v2898_v63 = vpop.f32.mrf.mxu2  ;;  %v2939_v42 = vpop.f32.mrf.mxu3 }
 0x2c4   :  { %v3012_v36 = vadd.f32 %v2898_v63, %v4508_v58  ;;  %v3013_v2 = vadd.f32 %v2939_v42, %v4517_v62  ;;  %v3109_v48 = vadd.f32 %v3084_v27, %v3083_v56  ;;  %v6346_v21 = vpop.f32.mrf.mxu0  ;;  %v3062_v56 = vmax.f32 %v2990_v8, %v3038_v26 }
 0x2c6   :  { %v3036_v19 = vmax.f32 %v3012_v36, 0.0  ;;  %v3037_v20 = vmax.f32 %v3013_v2, 0.0  ;;  %v3110_v55 = vadd.f32 %v3109_v48, %v3085_v34  ;;  %v2971_v48 = vadd.f32 %v6219_v33, %v4517_v62 }
 0x2c7   :  { %v3089_v30 = vmul.f32 %v6287_v10, %v3062_v56  ;;  %v2994_v33 = vmax.f32 %v2970_v16, 0.0 }
 0x2c8   :  { %v3060_v28 = vmax.f32 %v2988_v12, %v3036_v19  ;;  %v3061_v0 = vmax.f32 %v2989_v32, %v3037_v20  ;;  %3111 = vadd.xlane.f32.xlu1 %v3110_v55  ;;  %v6350_v31 = vpop.f32.mrf.mxu1  ;;  %v2993_v32 = vmax.f32 %v2969_v52, 0.0  ;;  %v3041_v12 = vmax.f32 %v3017_v50, 0.0 }
 0x2ca   :  { %v3087_v59 = vmul.f32 %v6292_v24, %v3060_v28  ;;  %v3088_v38 = vmul.f32 %v6303_v18, %v3061_v0  ;;  %v2995_v0 = vmax.f32 %v2971_v48, 0.0  ;;  %v3065_v25 = vmax.f32 %v2993_v32, %v3041_v12 }
 0x2cb   :  { %v2901_v4 = vpop.f32.mrf.mxu2  ;;  %v2942_v60 = vpop.f32.mrf.mxu3 }
 0x2cc   :  { %v3015_v23 = vadd.f32 %v2901_v4, %v4508_v58  ;;  %v3016_v3 = vadd.f32 %v2942_v60, %v4517_v62  ;;  %v3113_v37 = vadd.f32 %v3087_v59, %v3086_v40  ;;  %v6365_v13 = vpop.f32.mrf.mxu0  ;;  %v2972_v40 = vadd.f32 %v6243_v54, %v4515_v61 }
 0x2cd   :  { %v3044_v54 = vmax.f32 %v3020_v35, 0.0 }
 0x2ce   :  { %v3039_v27 = vmax.f32 %v3015_v23, 0.0  ;;  %v3040_v63 = vmax.f32 %v3016_v3, 0.0  ;;  %v3114_v42 = vadd.f32 %v3113_v37, %v3088_v38  ;;  %v2974_v3 = vadd.f32 %v6235_v47, %v4517_v62 }
 0x2cf   :  { %v2973_v38 = vadd.f32 %v6245_v22, %v4508_v58  ;;  %v3092_v37 = vmul.f32 %v6287_v10, %v3065_v25  ;;  %v2975_v22 = vadd.f32 %v6259_v51, %v4515_v61  ;;  %v2976_v51 = vadd.f32 %v6261_v15, %v4508_v58 }
 0x2d0   :  { %v3063_v36 = vmax.f32 %v2991_v5, %v3039_v27  ;;  %v3064_v2 = vmax.f32 %v2992_v6, %v3040_v63  ;;  %3115 = vadd.xlane.f32.xlu1 %v3114_v42  ;;  %v6367_v34 = vpop.f32.mrf.mxu1  ;;  %v2996_v6 = vmax.f32 %v2972_v40, 0.0  ;;  %v2998_v42 = vmax.f32 %v2974_v3, 0.0 }
 0x2d2   :  { %v3090_v11 = vmul.f32 %v6292_v24, %v3063_v36  ;;  %v3091_v55 = vmul.f32 %v6303_v18, %v3064_v2  ;;  %v2997_v36 = vmax.f32 %v2973_v38, 0.0  ;;  %v3023_v2 = vadd.f32 %v6255_v43, %v4515_v61  ;;  %v6409_v43 = vpop.xlane.xlu2 %1560 }
 0x2d3   :  { %v2904_v57 = vpop.f32.mrf.mxu2  ;;  %v2945_v46 = vpop.f32.mrf.mxu3  ;;  %v3068_v32 = vmax.f32 %v2996_v6, %v3044_v54  ;;  %v3472_v6 = vadd.f32 %v6270_v49, %v4508_v58 }
 0x2d4   :  { %v3018_v19 = vadd.f32 %v2904_v57, %v4508_v58  ;;  %v3019_v20 = vadd.f32 %v2945_v46, %v4517_v62  ;;  %v3117_v28 = vadd.f32 %v3090_v11, %v3089_v30  ;;  %v6380_v44 = vpop.f32.mrf.mxu0 }
 0x2d6   :  { %v3042_v8 = vmax.f32 %v3018_v19, 0.0  ;;  %v3043_v26 = vmax.f32 %v3019_v20, 0.0  ;;  %v3118_v59 = vadd.f32 %v3117_v28, %v3091_v55  ;;  %v2977_v19 = vadd.f32 %v6251_v41, %v4517_v62 }
 0x2d7   :  { %v2999_v20 = vmax.f32 %v2975_v22, 0.0  ;;  %v3047_v55 = vmax.f32 %v3023_v2, 0.0  ;;  %v3095_v28 = vmul.f32 %v6287_v10, %v3068_v32  ;;  %v3496_v22 = vmax.f32 %v3472_v6, 0.0 }
 0x2d8   :  { %v3066_v4 = vmax.f32 %v2994_v33, %v3042_v8  ;;  %v3067_v60 = vmax.f32 %v2995_v0, %v3043_v26  ;;  %3119 = vadd.xlane.f32.xlu2 %v3118_v59  ;;  %v6384_v23 = vpop.f32.mrf.mxu1  ;;  %v3001_v26 = vmax.f32 %v2977_v19, 0.0  ;;  %v3000_v59 = vmax.f32 %v2976_v51, 0.0  ;;  %v6435_v51 = vld [vmem:[%s6673_s3 + $0x98] sm:$0xff] }
 0x2da   :  { %v3093_v5 = vmul.f32 %v6292_v24, %v3066_v4  ;;  %v3094_v63 = vmul.f32 %v6303_v18, %v3067_v60  ;;  %v3071_v4 = vmax.f32 %v2999_v20, %v3047_v55 }
 0x2db   :  { %v2907_v52 = vpop.f32.mrf.mxu2  ;;  %v2948_v50 = vpop.f32.mrf.mxu3 }
 0x2dc   :  { %v3021_v56 = vadd.f32 %v2907_v52, %v4508_v58  ;;  %v3022_v27 = vadd.f32 %v2948_v50, %v4517_v62  ;;  %v3121_v47 = vadd.f32 %v3093_v5, %v3092_v37  ;;  %v6401_v48 = vpop.f32.mrf.mxu0  ;;  %v3471_v50 = vadd.f32 %v6264_v29, %v4515_v61 }
 0x2de   :  { %v3045_v16 = vmax.f32 %v3021_v56, 0.0  ;;  %v3046_v12 = vmax.f32 %v3022_v27, 0.0  ;;  %v3122_v30 = vadd.f32 %v3121_v47, %v3094_v63  ;;  %v3098_v27 = vmul.f32 %v6287_v10, %v3071_v4 }
 0x2df   :  { %v3495_v29 = vmax.f32 %v3471_v50, 0.0 }
 0x2e0   :  { %v3069_v11 = vmax.f32 %v2997_v36, %v3045_v16  ;;  %v3070_v57 = vmax.f32 %v2998_v42, %v3046_v12  ;;  %3123 = vadd.xlane.f32.xlu2 %v3122_v30  ;;  %v6403_v46 = vpop.f32.mrf.mxu1  ;;  %v6424_v42 = vpop.xlane.xlu2 %1572 }
 0x2e1   :  { %v6428_v12 = vpop.xlane.xlu0 %1552 }
 0x2e2   :  { %v3096_v0 = vmul.f32 %v6292_v24, %v3069_v11  ;;  %v3097_v8 = vmul.f32 %v6303_v18, %v3070_v57 }
 0x2e3   :  { %v2910_v33 = vpop.f32.mrf.mxu2  ;;  %v2951_v25 = vpop.f32.mrf.mxu3 }
 0x2e4   :  { %v3024_v35 = vadd.f32 %v2910_v33, %v4508_v58  ;;  %v3025_v40 = vadd.f32 %v2951_v25, %v4517_v62  ;;  %v3125_v41 = vadd.f32 %v3096_v0, %v3095_v28  ;;  %v3406_v15 = vpop.f32.mrf.mxu0  ;;  %v3475_v28 = vadd.f32 %v6294_v1, %v4508_v58  ;;  %v6447_v25 = vld [vmem:[%s6673_s3 + $0xa0] sm:$0xff] }
 0x2e5   :  { %v3520_v38 = vadd.f32 %v3406_v15, %v4508_v58 }
 0x2e6   :  { %v3048_v60 = vmax.f32 %v3024_v35, 0.0  ;;  %v3049_v3 = vmax.f32 %v3025_v40, 0.0  ;;  %v3126_v37 = vadd.f32 %v3125_v41, %v3097_v8  ;;  %v6449_v35 = vpop.xlane.xlu1 %1556  ;;  %v3474_v40 = vadd.f32 %v6282_v39, %v4515_v61 }
 0x2e7   :  { %v3544_v47 = vmax.f32 %v3520_v38, 0.0 }
 0x2e8   :  { %v3072_v54 = vmax.f32 %v3000_v59, %v3048_v60  ;;  %v3073_v5 = vmax.f32 %v3001_v26, %v3049_v3  ;;  %3127 = vadd.xlane.f32.xlu1 %v3126_v37  ;;  %v3447_v52 = vpop.f32.mrf.mxu1  ;;  %v6456_v4 = vpop.xlane.xlu2 %1090  ;;  %v3499_v3 = vmax.f32 %v3475_v28, 0.0  ;;  %v3498_v39 = vmax.f32 %v3474_v40, 0.0 }
 0x2e9   :  { %v3521_v56 = vadd.f32 %v3447_v52, %v4517_v62  ;;  %v3568_v57 = vmax.f32 %v3496_v22, %v3544_v47  ;;  %v3478_v22 = vadd.f32 %v6316_v53, %v4508_v58 }
 0x2ea   :  { %v3099_v63 = vmul.f32 %v6292_v24, %v3072_v54  ;;  %v3100_v32 = vmul.f32 %v6303_v18, %v3073_v5  ;;  %v6440_v18 = vld [vmem:[%s6673_s3 + $0x90] sm:$0xff]  ;;  %v6460_v54 = vpop.xlane.xlu0 %1564 }
 0x2eb   :  { %v3365_v36 = vpop.f32.mrf.mxu3  ;;  %v3545_v10 = vmax.f32 %v3521_v56, 0.0  ;;  %v3595_v26 = vmul.f32 %v6435_v51, %v3568_v57 }
 0x2ec   :  { %v3519_v49 = vadd.f32 %v3365_v36, %v4515_v61  ;;  %v3300_v2 = vpop.f32.mrf.mxu2  ;;  %v3129_v16 = vadd.f32 %v3099_v63, %v3098_v27  ;;  %v3409_v11 = vpop.f32.mrf.mxu0 }
 0x2ed   :  { %v3473_v30 = vadd.f32 %v3300_v2, %v4517_v62  ;;  %v3523_v19 = vadd.f32 %v3409_v11, %v4508_v58 }
 0x2ee   :  { %v3543_v24 = vmax.f32 %v3519_v49, 0.0  ;;  %v3130_v20 = vadd.f32 %v3129_v16, %v3100_v32  ;;  %v6466_v32 = vpop.xlane.xlu1 %2069  ;;  %v3477_v16 = vadd.f32 %v6312_v17, %v4515_v61 }
 0x2ef   :  { %v3497_v55 = vmax.f32 %v3473_v30, 0.0  ;;  %v3547_v59 = vmax.f32 %v3523_v19, 0.0 }
 0x2f0   :  { %v3567_v0 = vmax.f32 %v3495_v29, %v3543_v24  ;;  %3131 = vadd.xlane.f32.xlu0 %v3130_v20  ;;  %v3450_v33 = vpop.f32.mrf.mxu1  ;;  %v6473_v24 = vpop.xlane.xlu2 %2073  ;;  %v3502_v20 = vmax.f32 %v3478_v22, 0.0 }
 0x2f1   :  { %v3569_v8 = vmax.f32 %v3497_v55, %v3545_v10  ;;  %v3524_v41 = vadd.f32 %v3450_v33, %v4517_v62  ;;  %v3571_v56 = vmax.f32 %v3499_v3, %v3547_v59  ;;  %v3501_v33 = vmax.f32 %v3477_v16, 0.0 }
 0x2f2   :  { %v3594_v1 = vmul.f32 %v6440_v18, %v3567_v0  ;;  %v3481_v3 = vadd.f32 %v6333_v9, %v4508_v58 }
 0x2f3   :  { %v3368_v15 = vpop.f32.mrf.mxu3  ;;  %v3596_v60 = vmul.f32 %v6447_v25, %v3569_v8  ;;  %v3548_v50 = vmax.f32 %v3524_v41, 0.0  ;;  %v3598_v11 = vmul.f32 %v6435_v51, %v3571_v56 }
 0x2f4   :  { %v3522_v38 = vadd.f32 %v3368_v15, %v4515_v61  ;;  %v3303_v37 = vpop.f32.mrf.mxu2  ;;  %v3618_v6 = vadd.f32 %v3595_v26, %v3594_v1  ;;  %v3412_v52 = vpop.f32.mrf.mxu0 }
 0x2f5   :  { %v3476_v5 = vadd.f32 %v3303_v37, %v4517_v62  ;;  %v3526_v63 = vadd.f32 %v3412_v52, %v4508_v58  ;;  %v6479_v15 = vpop.xlane.xlu0 %1568 }
 0x2f6   :  { %v3546_v27 = vmax.f32 %v3522_v38, 0.0  ;;  %v3619_v47 = vadd.f32 %v3618_v6, %v3596_v60  ;;  %v6483_v6 = vpop.xlane.xlu1 %2077 }
 0x2f7   :  { %v3500_v36 = vmax.f32 %v3476_v5, 0.0  ;;  %v3550_v57 = vmax.f32 %v3526_v63, 0.0 }
 0x2f8   :  { %v3570_v49 = vmax.f32 %v3498_v39, %v3546_v27  ;;  %3620 = vadd.xlane.f32.xlu2 %v3619_v47  ;;  %v3453_v2 = vpop.f32.mrf.mxu1  ;;  %v3480_v39 = vadd.f32 %v6331_v7, %v4515_v61  ;;  %v6490_v63 = vpop.xlane.xlu2 %2093 }
 0x2f9   :  { %v3572_v29 = vmax.f32 %v3500_v36, %v3548_v50  ;;  %v3527_v30 = vadd.f32 %v3453_v2, %v4517_v62  ;;  %v3574_v41 = vmax.f32 %v3502_v20, %v3550_v57  ;;  %v3505_v36 = vmax.f32 %v3481_v3, 0.0 }
 0x2fa   :  { %v3597_v10 = vmul.f32 %v6440_v18, %v3570_v49  ;;  %v3504_v16 = vmax.f32 %v3480_v39, 0.0 }
 0x2fb   :  { %v3371_v19 = vpop.f32.mrf.mxu3  ;;  %v3599_v53 = vmul.f32 %v6447_v25, %v3572_v29  ;;  %v3551_v8 = vmax.f32 %v3527_v30, 0.0  ;;  %v3601_v50 = vmul.f32 %v6435_v51, %v3574_v41 }
 0x2fc   :  { %v3525_v55 = vadd.f32 %v3371_v19, %v4515_v61  ;;  %v3306_v28 = vpop.f32.mrf.mxu2  ;;  %v3622_v0 = vadd.f32 %v3598_v11, %v3597_v10  ;;  %v3415_v40 = vpop.f32.mrf.mxu0 }
 0x2fd   :  { %v3479_v17 = vadd.f32 %v3306_v28, %v4517_v62  ;;  %v3529_v1 = vadd.f32 %v3415_v40, %v4508_v58 }
 0x2fe   :  { %v3549_v26 = vmax.f32 %v3525_v55, 0.0  ;;  %v3623_v59 = vadd.f32 %v3622_v0, %v3599_v53  ;;  %v6496_v53 = vpop.xlane.xlu0 %1576  ;;  %v3484_v55 = vadd.f32 %v6350_v31, %v4508_v58 }
 0x2ff   :  { %v3503_v60 = vmax.f32 %v3479_v17, 0.0  ;;  %v3553_v27 = vmax.f32 %v3529_v1, 0.0  ;;  %v3483_v17 = vadd.f32 %v6346_v21, %v4515_v61 }
 0x300   :  { %v3573_v38 = vmax.f32 %v3501_v33, %v3549_v26  ;;  %3624 = vadd.xlane.f32.xlu0 %v3623_v59  ;;  %v3456_v37 = vpop.f32.mrf.mxu1  ;;  %v6500_v33 = vpop.xlane.xlu1 %2085  ;;  %v3508_v31 = vmax.f32 %v3484_v55, 0.0  ;;  %v1591_v55 = vperm.slane %v6449_v35, %v5158_v14 }
 0x301   :  { %v3575_v5 = vmax.f32 %v3503_v60, %v3551_v8  ;;  %v3530_v52 = vadd.f32 %v3456_v37, %v4517_v62  ;;  %v3577_v11 = vmax.f32 %v3505_v36, %v3553_v27  ;;  %v6509_v39 = vpop.xlane.xlu2 %2097 }
 0x302   :  { %v3600_v56 = vmul.f32 %v6440_v18, %v3573_v38 }
 0x303   :  { %v3374_v47 = vpop.f32.mrf.mxu3  ;;  %v3602_v9 = vmul.f32 %v6447_v25, %v3575_v5  ;;  %v3554_v30 = vmax.f32 %v3530_v52, 0.0  ;;  %v3604_v41 = vmul.f32 %v6435_v51, %v3577_v11  ;;  %v3507_v5 = vmax.f32 %v3483_v17, 0.0 }
 0x304   :  { %v3528_v22 = vadd.f32 %v3374_v47, %v4515_v61  ;;  %v3309_v49 = vpop.f32.mrf.mxu2  ;;  %v3626_v2 = vadd.f32 %v3601_v50, %v3600_v56  ;;  %v3418_v29 = vpop.f32.mrf.mxu0 }
 0x305   :  { %v3482_v7 = vadd.f32 %v3309_v49, %v4517_v62  ;;  %v3532_v57 = vadd.f32 %v3418_v29, %v4508_v58 }
 0x306   :  { %v3552_v10 = vmax.f32 %v3528_v22, 0.0  ;;  %v3627_v19 = vadd.f32 %v3626_v2, %v3602_v9  ;;  %v3487_v22 = vadd.f32 %v6367_v34, %v4508_v58 }
 0x307   :  { %v3506_v20 = vmax.f32 %v3482_v7, 0.0  ;;  %v3556_v1 = vmax.f32 %v3532_v57, 0.0  ;;  %v3486_v7 = vadd.f32 %v6365_v13, %v4515_v61 }
 0x308   :  { %v3576_v28 = vmax.f32 %v3504_v16, %v3552_v10  ;;  %3628 = vadd.xlane.f32.xlu0 %v3627_v19  ;;  %v3459_v0 = vpop.f32.mrf.mxu1  ;;  %v6515_v16 = vpop.xlane.xlu0 %1580 }
 0x309   :  { %v3578_v40 = vmax.f32 %v3506_v20, %v3554_v30  ;;  %v3533_v8 = vadd.f32 %v3459_v0, %v4517_v62  ;;  %v3580_v56 = vmax.f32 %v3508_v31, %v3556_v1  ;;  %v6522_v19 = vpop.xlane.xlu1 %2089 }
 0x30a   :  { %v3603_v26 = vmul.f32 %v6440_v18, %v3576_v28  ;;  %v3511_v28 = vmax.f32 %v3487_v22, 0.0 }
 0x30b   :  { %v3377_v59 = vpop.f32.mrf.mxu3  ;;  %v3605_v60 = vmul.f32 %v6447_v25, %v3578_v40  ;;  %v3557_v50 = vmax.f32 %v3533_v8, 0.0  ;;  %v3607_v11 = vmul.f32 %v6435_v51, %v3580_v56  ;;  %v1592_v40 = vperm.slane %v6409_v43, %v5158_v14  ;;  %v6530_v8 = vpop.xlane.xlu2 %2590 }
 0x30c   :  { %v3531_v3 = vadd.f32 %v3377_v59, %v4515_v61  ;;  %v3312_v38 = vpop.f32.mrf.mxu2  ;;  %v3630_v37 = vadd.f32 %v3604_v41, %v3603_v26  ;;  %v3421_v52 = vpop.f32.mrf.mxu0  ;;  %v3510_v41 = vmax.f32 %v3486_v7, 0.0  ;;  %v3490_v43 = vadd.f32 %v6384_v23, %v4508_v58 }
 0x30d   :  { %v3485_v21 = vadd.f32 %v3312_v38, %v4517_v62  ;;  %v3535_v47 = vadd.f32 %v3421_v52, %v4508_v58  ;;  %v1590_v38 = vperm.slane %v6428_v12, %v5158_v14 }
 0x30e   :  { %v3555_v27 = vmax.f32 %v3531_v3, 0.0  ;;  %v3631_v9 = vadd.f32 %v3630_v37, %v3605_v60  ;;  %v1593_v37 = vperm.slane %v6460_v54, %v5158_v14 }
 0x30f   :  { %v3509_v36 = vmax.f32 %v3485_v21, 0.0  ;;  %v3559_v57 = vmax.f32 %v3535_v47, 0.0 }
 0x310   :  { %v3579_v49 = vmax.f32 %v3507_v5, %v3555_v27  ;;  %3632 = vadd.xlane.f32.xlu0 %v3631_v9  ;;  %v3462_v2 = vpop.f32.mrf.mxu1  ;;  %v6541_v56 = vpop.xlane.xlu0 %2081  ;;  %v3489_v27 = vadd.f32 %v6380_v44, %v4515_v61 }
 0x311   :  { %v3581_v29 = vmax.f32 %v3509_v36, %v3557_v50  ;;  %v3536_v30 = vadd.f32 %v3462_v2, %v4517_v62  ;;  %v3583_v60 = vmax.f32 %v3511_v28, %v3559_v57  ;;  %v1598_v50 = vsel %vm556_vm2, %v1591_v55, %v1590_v38  ;;  %v6552_v2 = vpop.xlane.xlu1 %2586 }
 0x312   :  { %v3606_v10 = vmul.f32 %v6440_v18, %v3579_v49  ;;  %v1599_v9 = vsel %vm558_vm3, %v1592_v40, %v1598_v50  ;;  %v1594_v49 = vperm.slane %v6479_v15, %v5158_v14 }
 0x313   :  { %v3380_v20 = vpop.f32.mrf.mxu3  ;;  %v3608_v34 = vmul.f32 %v6447_v25, %v3581_v29  ;;  %v3560_v59 = vmax.f32 %v3536_v30, 0.0  ;;  %v3610_v54 = vmul.f32 %v6435_v51, %v3583_v60  ;;  %v1600_v22 = vsel %vm560_vm4, %v1593_v37, %v1599_v9 }
 0x314   :  { %v3534_v0 = vadd.f32 %v3380_v20, %v4515_v61  ;;  %v3315_v13 = vpop.f32.mrf.mxu2  ;;  %v3634_v17 = vadd.f32 %v3607_v11, %v3606_v10  ;;  %v3424_v1 = vpop.f32.mrf.mxu0  ;;  %v1595_v29 = vperm.slane %v6424_v42, %v5158_v14  ;;  %v3514_v30 = vmax.f32 %v3490_v43, 0.0 }
 0x315   :  { %v3488_v26 = vadd.f32 %v3315_v13, %v4517_v62  ;;  %v3538_v3 = vadd.f32 %v3424_v1, %v4508_v58  ;;  %v1596_v20 = vperm.slane %v6496_v53, %v5158_v14  ;;  %v1601_v42 = vsel %vm562_vm5, %v1594_v49, %v1600_v22  ;;  %v6567_v1 = vpop.xlane.xlu2 %2594 }
 0x316   :  { %v3558_v31 = vmax.f32 %v3534_v0, 0.0  ;;  %v3635_v35 = vadd.f32 %v3634_v17, %v3608_v34  ;;  %v3513_v34 = vmax.f32 %v3489_v27, 0.0  ;;  %v3493_v60 = vadd.f32 %v6403_v46, %v4508_v58 }
 0x317   :  { %v3512_v5 = vmax.f32 %v3488_v26, 0.0  ;;  %v3562_v23 = vmax.f32 %v3538_v3, 0.0  ;;  %v2108_v26 = vperm.slane %v6473_v24, %v5158_v14 }
 0x318   :  { %v3582_v21 = vmax.f32 %v3510_v41, %v3558_v31  ;;  %3636 = vadd.xlane.f32.xlu2 %v3635_v35  ;;  %v3465_v52 = vpop.f32.mrf.mxu1  ;;  %v1597_v41 = vperm.slane %v6515_v16, %v5158_v14  ;;  %v2107_v35 = vperm.slane %v6466_v32, %v5158_v14  ;;  %v6574_v38 = vpop.xlane.xlu0 %2602  ;;  %v2109_v32 = vperm.slane %v6483_v6, %v5158_v14 }
 0x319   :  { %v3584_v47 = vmax.f32 %v3512_v5, %v3560_v59  ;;  %v3539_v12 = vadd.f32 %v3465_v52, %v4517_v62  ;;  %v3586_v0 = vmax.f32 %v3514_v30, %v3562_v23  ;;  %v1602_v59 = vsel %vm564_vm6, %v1595_v29, %v1601_v42  ;;  %v2611_v52 = vpop.xlane.xlu1 %2610 }
 0x31a   :  { %v3609_v36 = vmul.f32 %v6440_v18, %v3582_v21  ;;  %v1603_v24 = vsel %vm566_vm7, %v1596_v20, %v1602_v59  ;;  %v3492_v5 = vadd.f32 %v6401_v48, %v4515_v61  ;;  %v2115_v21 = vsel %vm556_vm2, %v2108_v26, %v2107_v35 }
 0x31b   :  { %v3383_v7 = vpop.f32.mrf.mxu3  ;;  %v3611_v44 = vmul.f32 %v6447_v25, %v3584_v47  ;;  %v3563_v28 = vmax.f32 %v3539_v12, 0.0  ;;  %v3613_v43 = vmul.f32 %v6435_v51, %v3586_v0  ;;  %v1604_v47 = vsel %vm568_vm8, %v1597_v41, %v1603_v24 }
 0x31c   :  { %v3537_v11 = vadd.f32 %v3383_v7, %v4515_v61  ;;  %v3318_v10 = vpop.f32.mrf.mxu2  ;;  %v3638_v57 = vadd.f32 %v3610_v54, %v3609_v36  ;;  %v3427_v15 = vpop.f32.mrf.mxu0  ;;  %v2110_v12 = vperm.slane %v6541_v56, %v5158_v14  ;;  %v3517_v48 = vmax.f32 %v3493_v60, 0.0 }
 0x31d   :  { %v3491_v55 = vadd.f32 %v3318_v10, %v4517_v62  ;;  %v3541_v17 = vadd.f32 %v3427_v15, %v4508_v58  ;;  %v2111_v23 = vperm.slane %v6500_v33, %v5158_v14  ;;  %v2112_v6 = vperm.slane %v6522_v19, %v5158_v14  ;;  %v2599_v20 = vpop.xlane.xlu2 %2598 }
 0x31e   :  { %v3561_v13 = vmax.f32 %v3537_v11, 0.0  ;;  %v3639_v40 = vadd.f32 %v3638_v57, %v3611_v44  ;;  %v3516_v7 = vmax.f32 %v3492_v5, 0.0  ;;  %v2116_v56 = vsel %vm558_vm3, %v2109_v32, %v2115_v21 }
 0x31f   :  { %v3515_v53 = vmax.f32 %v3491_v55, 0.0  ;;  %v3565_v46 = vmax.f32 %v3541_v17, 0.0  ;;  %v1606_v10 = vsel %vm571_vm9, %v1604_v47, 0.0  ;;  %v2117_v33 = vsel %vm560_vm4, %v2110_v12, %v2116_v56 }
 0x320   :  { %v3585_v31 = vmax.f32 %v3513_v34, %v3561_v13  ;;  %3640 = vadd.xlane.f32.xlu1 %v3639_v40  ;;  %v3468_v3 = vpop.f32.mrf.mxu1  ;;  %v2114_v19 = vperm.slane %v6509_v39, %v5158_v14  ;;  %v2626_v0 = vperm.slane %v6567_v1, %v5158_v14  ;;  %v2607_v39 = vpop.xlane.xlu0 %2606  ;;  %v2624_v40 = vperm.slane %v6552_v2, %v5158_v14 }
 0x321   :  { %v3587_v16 = vmax.f32 %v3515_v53, %v3563_v28  ;;  %v3542_v37 = vadd.f32 %v3468_v3, %v4517_v62  ;;  %v3589_v44 = vmax.f32 %v3517_v48, %v3565_v46  ;;  %v2627_v42 = vperm.slane %v2599_v20, %v5158_v14 }
 0x322   :  { %v3612_v58 = vmul.f32 %v6440_v18, %v3585_v31  ;;  %v2629_v1 = vperm.slane %v2607_v39, %v5158_v14  ;;  %v2630_v59 = vperm.slane %v2611_v52, %v5158_v14 }
 0x323   :  { %v3386_v50 = vpop.f32.mrf.mxu3  ;;  %v3614_v27 = vmul.f32 %v6447_v25, %v3587_v16  ;;  %v3566_v49 = vmax.f32 %v3542_v37, 0.0  ;;  %v3616_v15 = vmul.f32 %v6435_v51, %v3589_v44  ;;  %v2628_v51 = vperm.slane %v6574_v38, %v5158_v14 }
 0x324   :  { %v3540_v9 = vadd.f32 %v3386_v50, %v4515_v61  ;;  %v3321_v54 = vpop.f32.mrf.mxu2  ;;  %v3642_v36 = vadd.f32 %v3613_v43, %v3612_v58  ;;  %v2113_v61 = vperm.slane %v6490_v63, %v5158_v14  ;;  %v2625_v63 = vperm.slane %v6530_v8, %v5158_v14 }
 0x325   :  { %v3494_v22 = vadd.f32 %v3321_v54, %v4517_v62  ;;  %v2118_v62 = vsel %vm562_vm5, %v2111_v23, %v2117_v33 }
 0x326   :  { %v3564_v29 = vmax.f32 %v3540_v9, 0.0  ;;  %v3643_v30 = vadd.f32 %v3642_v36, %v3614_v27  ;;  %v2119_v55 = vsel %vm564_vm6, %v2112_v6, %v2118_v62  ;;  %v2632_v26 = vsel %vm556_vm2, %v2625_v63, %v2624_v40 }
 0x327   :  { %v3518_v11 = vmax.f32 %v3494_v22, 0.0  ;;  %v2120_v17 = vsel %vm566_vm7, %v2113_v61, %v2119_v55 }
 0x328   :  { %v3588_v57 = vmax.f32 %v3516_v7, %v3564_v29  ;;  %3644 = vadd.xlane.f32.xlu2 %v3643_v30  ;;  %1607 = vadd.xlane.f32.xlu1 %v1606_v10  ;;  %v2121_v8 = vsel %vm568_vm8, %v2114_v19, %v2120_v17 }
 0x329   :  { %v3590_v34 = vmax.f32 %v3518_v11, %v3566_v49  ;;  %v2123_v2 = vsel %vm571_vm9, %v2121_v8, 0.0 }
 0x32a   :  { %v3615_v28 = vmul.f32 %v6440_v18, %v3588_v57  ;;  %v2615_v18 = vpop.xlane.xlu1 %2614 }
 0x32b   :  { %v3617_v13 = vmul.f32 %v6447_v25, %v3590_v34  ;;  %v2633_v25 = vsel %vm558_vm3, %v2626_v0, %v2632_v26  ;;  %v2631_v31 = vperm.slane %v2615_v18, %v5158_v14  ;;  %v3104_v46 = vpop.xlane.xlu0 %3103 }
 0x32c   :  { %v3646_v41 = vadd.f32 %v3616_v15, %v3615_v28  ;;  %v2634_v60 = vsel %vm560_vm4, %v2627_v42, %v2633_v25  ;;  %v3141_v50 = vperm.slane %v3104_v46, %v5158_v14 }
 0x32d   :  { %v2635_v3 = vsel %vm562_vm5, %v2628_v51, %v2634_v60 }
 0x32e   :  { %v3647_v53 = vadd.f32 %v3646_v41, %v3617_v13  ;;  %v2636_v35 = vsel %vm564_vm6, %v2629_v1, %v2635_v3  ;;  %v1092_v1 = vadd.f32 %v6456_v4, %v6390_v45 }
 0x32f   :  { %v2637_v38 = vsel %vm566_vm7, %v2630_v59, %v2636_v35 }
 0x330   :  { %3648 = vadd.xlane.f32.xlu0 %v3647_v53  ;;  %2124 = vadd.xlane.f32.xlu2 %v2123_v2  ;;  %v2638_v16 = vsel %vm568_vm8, %v2631_v31, %v2637_v38 }
 0x331   :  { %v2640_v37 = vsel %vm571_vm9, %v2638_v16, 0.0 }
 0x333   :  { %v3108_v24 = vpop.xlane.xlu1 %3107 }
 0x334   :  { %v3142_v21 = vperm.slane %v3108_v24, %v5158_v14 }
 0x336   :  { %v3149_v48 = vsel %vm556_vm2, %v3142_v21, %v3141_v50 }
 0x338   :  { %2641 = vadd.xlane.f32.xlu0 %v2640_v37 }
 0x33b   :  { %v3112_v5 = vpop.xlane.xlu1 %3111 }
 0x33c   :  { %v3143_v32 = vperm.slane %v3112_v5, %v5158_v14 }
 0x33e   :  { %v3150_v54 = vsel %vm558_vm3, %v3143_v32, %v3149_v48 }
 0x343   :  { %v3116_v58 = vpop.xlane.xlu1 %3115 }
 0x344   :  { %v3144_v27 = vperm.slane %v3116_v58, %v5158_v14 }
 0x346   :  { %v3151_v23 = vsel %vm560_vm4, %v3144_v27, %v3150_v54 }
 0x34b   :  { %v3120_v43 = vpop.xlane.xlu2 %3119 }
 0x34c   :  { %v3145_v12 = vperm.slane %v3120_v43, %v5158_v14 }
 0x34e   :  { %v3152_v6 = vsel %vm562_vm5, %v3145_v12, %v3151_v23 }
 0x353   :  { %v3124_v52 = vpop.xlane.xlu2 %3123 }
 0x354   :  { %v3146_v9 = vperm.slane %v3124_v52, %v5158_v14 }
 0x356   :  { %v3153_v49 = vsel %vm564_vm6, %v3146_v9, %v3152_v6 }
 0x35b   :  { %v3128_v47 = vpop.xlane.xlu1 %3127 }
 0x35c   :  { %v3147_v36 = vperm.slane %v3128_v47, %v5158_v14 }
 0x35e   :  { %v3154_v44 = vsel %vm566_vm7, %v3147_v36, %v3153_v49 }
 0x363   :  { %v3132_v22 = vpop.xlane.xlu0 %3131 }
 0x364   :  { %v3148_v7 = vperm.slane %v3132_v22, %v5158_v14 }
 0x366   :  { %v3155_v29 = vsel %vm568_vm8, %v3148_v7, %v3154_v44 }
 0x367   :  { %v3157_v30 = vsel %vm571_vm9, %v3155_v29, 0.0 }
 0x368   :  { %3158 = vadd.xlane.f32.xlu1 %v3157_v30 }
 0x36b   :  { %v3621_v61 = vpop.xlane.xlu2 %3620 }
 0x36c   :  { %v3658_v20 = vperm.slane %v3621_v61, %v5158_v14 }
 0x373   :  { %v3625_v56 = vpop.xlane.xlu0 %3624 }
 0x374   :  { %v3659_v19 = vperm.slane %v3625_v56, %v5158_v14 }
 0x376   :  { %v3666_v15 = vsel %vm556_vm2, %v3659_v19, %v3658_v20 }
 0x37b   :  { %v3629_v11 = vpop.xlane.xlu0 %3628 }
 0x37c   :  { %v3660_v57 = vperm.slane %v3629_v11, %v5158_v14 }
 0x37e   :  { %v3667_v0 = vsel %vm558_vm3, %v3660_v57, %v3666_v15 }
 0x383   :  { %v3633_v33 = vpop.xlane.xlu0 %3632 }
 0x384   :  { %v3661_v34 = vperm.slane %v3633_v33, %v5158_v14 }
 0x386   :  { %v3668_v13 = vsel %vm560_vm4, %v3661_v34, %v3667_v0 }
 0x38b   :  { %v3637_v10 = vpop.xlane.xlu2 %3636 }
 0x38c   :  { %v3662_v63 = vperm.slane %v3637_v10, %v5158_v14 }
 0x38e   :  { %v3669_v17 = vsel %vm562_vm5, %v3662_v63, %v3668_v13 }
 0x393   :  { %v3641_v62 = vpop.xlane.xlu1 %3640 }
 0x394   :  { %v3663_v28 = vperm.slane %v3641_v62, %v5158_v14 }
 0x396   :  { %v3670_v42 = vsel %vm564_vm6, %v3663_v28, %v3669_v17 }
 0x39b   :  { %v3645_v55 = vpop.xlane.xlu2 %3644  ;;  %v1608_v26 = vpop.xlane.xlu1 %1607 }
 0x39c   :  { %v3664_v39 = vperm.slane %v3645_v55, %v5158_v14  ;;  %v1609_v25 = vadd.f32 %v1608_v26, %v1092_v1 }
 0x39e   :  { %v3671_v8 = vsel %vm566_vm7, %v3664_v39, %v3670_v42 }
 0x3a3   :  { %v3649_v40 = vpop.xlane.xlu0 %3648  ;;  %v2125_v53 = vpop.xlane.xlu2 %2124 }
 0x3a4   :  { %v3665_v41 = vperm.slane %v3649_v40, %v5158_v14  ;;  %v2126_v2 = vadd.f32 %v2125_v53, %v1609_v25  ;;  %v3679_v14 = vstv %s6674_s4 }
 0x3a6   :  { %v3672_v51 = vsel %vm568_vm8, %v3665_v41, %v3671_v8 }
 0x3a7   :  { %v3674_v18 = vsel %vm571_vm9, %v3672_v51, 0.0 }
 0x3a8   :  { %3675 = vadd.xlane.f32.xlu2 %v3674_v18 }
 0x3ab   :  { %v2642_v59 = vpop.xlane.xlu0 %2641 }
 0x3ac   :  { %v2643_v31 = vadd.f32 %v2642_v59, %v2126_v2 }
 0x3db   :  { %v3159_v60 = vpop.xlane.xlu1 %3158 }
 0x3dc   :  { %v3160_v3 = vadd.f32 %v3159_v60, %v2643_v31 }
 0x41b   :  { %v3676_v35 = vpop.xlane.xlu2 %3675 }
 0x41c   :  { %v3677_v38 = vadd.f32 %v3676_v35, %v3160_v3 }
 0x41e   :  { %v3680_v16 = vadd.f32 %v3679_v14, %v3677_v38 }
 0x420   :  { %v3681_v37 = vsub.f32 0.0, %v3680_v16 }
 0x422   :  { %v3682_v24 = vmul.f32 1.442695, %v3681_v37 }
 0x424   :  { %4090 = vpow2.f32 %v3682_v24 }
 0x42a   :  { %v4091_v5 = vpop.eup %4090 }
 0x42b   :  { %v3684_v43 = vadd.f32 1.0, %v4091_v5 }
 0x42d   :  { %4092 = vrcp.f32 %v3684_v43  ;;  %v3696_v46 = vand.u32 2147483648, %v3684_v43  ;;  %v3694_v32 = vand.u32 2147483647, %v3684_v43  ;;  %vm3690_vm11 = vweird.f32 %v3684_v43 }
 0x42f   :  { %v3697_v50 = vor.u32 1.1754944e-38, %v3696_v46  ;;  %vm3695_vm14 = vcmp.eq.f32.partialorder %v3694_v32, 8.507059e+37 }
 0x433   :  { %v4093_v45 = vpop.eup %4092 }
 0x434   :  { %v3686_v4 = vmul.f32 %v4093_v45, %v3684_v43  ;;  %vm3691_vm10 = vweird.f32 %v4093_v45 }
 0x435   :  { %vm3692_vm13 = vmor %vm3690_vm11, %vm3691_vm10 }
 0x436   :  { %v3687_v58 = vsub.f32 1.0, %v3686_v4 }
 0x438   :  { %v3688_v21 = vmul.f32 %v4093_v45, %v3687_v58 }
 0x43a   :  { %v3689_v52 = vadd.f32 %v4093_v45, %v3688_v21 }
 0x43c   :  { %v3693_v27 = vsel %vm3692_vm13, %v4093_v45, %v3689_v52 }
 0x43d   :  { %v3698_v47 = vsel %vm3695_vm14, %v3697_v50, %v3693_v27 }
 0x43e   :  { %3701 = vst.msk [vmem:[%s6675_s5] sm:$0xff] %vm3700_vm12, %v3698_v47 }

</bundles_post_ra>
